<compile_context>
chip_gen: v7x
topology: tpu7x:2x2x1
jax: 0.10.0
libtpu: 0.0.40
codegen_flags: <defaults>
</compile_context>

<pallas_src>
import jax
import jax.numpy as jnp
import numpy as np
from jax.experimental import pallas as pl
from jax.experimental.pallas import tpu as pltpu

X_DIM = 784
X_PAD = 896          # 7 * 128, lane-dense padding of the feature axis
H_DIM = 128
Z_DIM = 32
HEAD_PAD = 128       # mu || log_var (64) padded to a full lane tile
TB = 128             # batch tile (fills the MXU M dimension)


def vae_kernel(
    x_ref, eps_ref,
    w1_ref, b1_ref, w2_ref, b2_ref, w3_ref, b3_ref,
    wh_ref, bh_ref,                                  # fused, lane-padded mu||log_var head
    w4_ref, b4_ref, w5_ref, b5_ref, w6_ref, b6_ref, w7_ref, b7_ref,
    recon_ref, mulogvar_ref,
):
    def linear(h, w_ref, b_ref):
        # bf16 MXU matmul, f32 accumulation, f32 bias add.
        return jnp.dot(h.astype(jnp.bfloat16), w_ref[...],
                       preferred_element_type=jnp.float32) + b_ref[...]

    x = x_ref[...]                                   # (TB, X_PAD) bf16

    # ----- encoder -----
    h = jnp.maximum(linear(x, w1_ref, b1_ref), 0.0)
    h = jnp.maximum(linear(h, w2_ref, b2_ref), 0.0)
    h = jnp.maximum(linear(h, w3_ref, b3_ref), 0.0)

    ml = linear(h, wh_ref, bh_ref)                   # (TB, HEAD_PAD) f32; cols 64:128 are 0
    mu = ml[:, :Z_DIM]
    log_var = ml[:, Z_DIM:2 * Z_DIM]

    # ----- sampling (reparameterization):  z = eps * exp(0.5*log_var) + mu -----
    std = jnp.exp(0.5 * log_var)
    z = eps_ref[...] * std + mu                      # (TB, Z_DIM)

    # ----- decoder -----
    h = jnp.maximum(linear(z, w4_ref, b4_ref), 0.0)
    h = jnp.maximum(linear(h, w5_ref, b5_ref), 0.0)
    h = jnp.maximum(linear(h, w6_ref, b6_ref), 0.0)
    logits = linear(h, w7_ref, b7_ref)               # (TB, X_PAD)

    # sigmoid: exp on the EUP + approx reciprocal on the EUP (VPU divide avoided)
    recon = pl.reciprocal(1.0 + jnp.exp(-logits), approx=True)

    recon_ref[...] = recon.astype(recon_ref.dtype)       # lane-dense (TB, 896) store
    mulogvar_ref[...] = ml.astype(mulogvar_ref.dtype)    # lane-dense (TB, 128) store


def init_params(key, x_dim=X_DIM, h_dim=H_DIM, z_dim=Z_DIM):
    """Deterministic param init (PyTorch nn.Linear-style uniform).

    Weights stored as (in, out); biases as (1, out)."""
    shapes = {
        "fc1": (x_dim, h_dim), "fc2": (h_dim, h_dim), "fc3": (h_dim, h_dim),
        "fc41": (h_dim, z_dim), "fc42": (h_dim, z_dim),
        "fc4": (z_dim, h_dim), "fc5": (h_dim, h_dim), "fc6": (h_dim, h_dim),
        "fc7": (h_dim, x_dim),
    }
    params = {}
    for name, (fan_in, fan_out) in shapes.items():
        key, kw, kb = jax.random.split(key, 3)
        bound = 1.0 / np.sqrt(fan_in)
        params[name + "_w"] = jax.random.uniform(
            kw, (fan_in, fan_out), jnp.float32, -bound, bound)
        params[name + "_b"] = jax.random.uniform(
            kb, (1, fan_out), jnp.float32, -bound, bound)
    return params


def pack_params(params):
    """One-time padding / bf16 casting of the weights for the kernel."""
    p = params
    bf = lambda a: a.astype(jnp.bfloat16)
    # fc1: zero-pad fan-in rows (padded input columns contribute 0)
    w1 = bf(jnp.pad(p["fc1_w"], ((0, X_PAD - X_DIM), (0, 0))))
    # fc7: zero-pad fan-out columns (padded output columns are sliced away)
    w7 = bf(jnp.pad(p["fc7_w"], ((0, 0), (0, X_PAD - X_DIM))))
    b7 = jnp.pad(p["fc7_b"], ((0, 0), (0, X_PAD - X_DIM)))
    # fused mu || log_var head, zero-padded to a full 128-lane output tile
    wh = bf(jnp.pad(jnp.concatenate([p["fc41_w"], p["fc42_w"]], axis=1),
                    ((0, 0), (0, HEAD_PAD - 2 * Z_DIM))))
    bh = jnp.pad(jnp.concatenate([p["fc41_b"], p["fc42_b"]], axis=1),
                 ((0, 0), (0, HEAD_PAD - 2 * Z_DIM)))
    return (
        w1, p["fc1_b"], bf(p["fc2_w"]), p["fc2_b"], bf(p["fc3_w"]), p["fc3_b"],
        wh, bh,
        bf(p["fc4_w"]), p["fc4_b"], bf(p["fc5_w"]), p["fc5_b"],
        bf(p["fc6_w"]), p["fc6_b"], w7, b7,
    )


@jax.jit
def vae_forward(x, eps, packed):
    # glue: flatten NCHW image batch to (B, 784), like x.view(-1, 784)
    xf = x.reshape(-1, X_DIM).astype(jnp.float32)
    B = xf.shape[0]

    # pad batch up to a multiple of TB (sliced back at the end)
    Bp = ((B + TB - 1) // TB) * TB
    if Bp != B:
        xf = jnp.pad(xf, ((0, Bp - B), (0, 0)))
        eps = jnp.pad(eps, ((0, Bp - B), (0, 0)))

    # lane-dense feature padding 784 -> 896; bf16 inputs for the MXU
    xp = jnp.pad(xf, ((0, 0), (0, X_PAD - X_DIM))).astype(jnp.bfloat16)

    def whole(arr):
        # full weight / bias tile; constant block index -> stays resident in VMEM
        return pl.BlockSpec(arr.shape, lambda i: (0, 0))

    in_specs = [
        pl.BlockSpec((TB, X_PAD), lambda i: (i, 0)),       # x (padded, bf16)
        pl.BlockSpec((TB, Z_DIM), lambda i: (i, 0)),       # eps
    ] + [whole(a) for a in packed]

    out_specs = [
        pl.BlockSpec((TB, X_PAD), lambda i: (i, 0)),       # recon (padded)
        pl.BlockSpec((TB, HEAD_PAD), lambda i: (i, 0)),    # mu || log_var (padded)
    ]

    out_shape = (
        jax.ShapeDtypeStruct((Bp, X_PAD), jnp.float32),
        jax.ShapeDtypeStruct((Bp, HEAD_PAD), jnp.float32),
    )

    recon_p, mulogvar = pl.pallas_call(
        vae_kernel,
        out_shape=out_shape,
        grid_spec=pltpu.PrefetchScalarGridSpec(
            num_scalar_prefetch=0,
            grid=(Bp // TB,),
            in_specs=in_specs,
            out_specs=out_specs,
        ),
        compiler_params=pltpu.CompilerParams(
            dimension_semantics=("parallel",),
        ),
    )(xp, eps, *packed)

    recon = recon_p[:B, :X_DIM]
    mu = mulogvar[:B, :Z_DIM]
    log_var = mulogvar[:B, Z_DIM:2 * Z_DIM]
    return recon, mu, log_var


def vae_forward_ref(x, eps, params):
    """Pure-JAX f32 reference for correctness checking."""
    xf = x.reshape(-1, X_DIM).astype(jnp.float32)
    p = params
    relu = lambda v: jnp.maximum(v, 0.0)
    h = relu(xf @ p["fc1_w"] + p["fc1_b"])
    h = relu(h @ p["fc2_w"] + p["fc2_b"])
    h = relu(h @ p["fc3_w"] + p["fc3_b"])
    mu = h @ p["fc41_w"] + p["fc41_b"]
    log_var = h @ p["fc42_w"] + p["fc42_b"]
    z = eps * jnp.exp(0.5 * log_var) + mu
    h = relu(z @ p["fc4_w"] + p["fc4_b"])
    h = relu(h @ p["fc5_w"] + p["fc5_b"])
    h = relu(h @ p["fc6_w"] + p["fc6_b"])
    recon = jax.nn.sigmoid(h @ p["fc7_w"] + p["fc7_b"])
    return recon, mu, log_var


if __name__ == "__main__":
    key = jax.random.PRNGKey(0)
    k_params, k_x, k_eps = jax.random.split(key, 3)

    B = 256  # two TB=128 grid steps -> both v7x TensorCores get work
    # MNIST-like NCHW input, consistent with x.view(-1, 784)
    x = jax.random.uniform(k_x, (B, 1, 28, 28), jnp.float32)
    # eps plays the role of torch.randn_like(std) in sampling()
    eps = jax.random.normal(k_eps, (B, Z_DIM), jnp.float32)

    params = init_params(k_params)
    packed = jax.tree_util.tree_map(jnp.asarray, pack_params(params))

    recon, mu, log_var = vae_forward(x, eps, packed)
    jax.block_until_ready((recon, mu, log_var))

    r_ref, mu_ref, lv_ref = vae_forward_ref(x, eps, params)
    # bf16 matmul inputs + approx reciprocal -> relaxed tolerance vs f32 ref
    np.testing.assert_allclose(np.asarray(recon), np.asarray(r_ref), rtol=5e-2, atol=5e-2)
    np.testing.assert_allclose(np.asarray(mu), np.asarray(mu_ref), rtol=5e-2, atol=5e-2)
    np.testing.assert_allclose(np.asarray(log_var), np.asarray(lv_ref), rtol=5e-2, atol=5e-2)

    print("KERNEL_OK")
</pallas_src>

<mosaic_0001>
module attributes {stable_mosaic.version = 11 : i64} {
  func.func @vae_kernel(%arg0: i32, %arg1: memref<128x896xbf16, #tpu.memory_space<vmem>>, %arg2: memref<128x32xf32, #tpu.memory_space<vmem>>, %arg3: memref<896x128xbf16, #tpu.memory_space<vmem>>, %arg4: memref<1x128xf32, #tpu.memory_space<vmem>>, %arg5: memref<128x128xbf16, #tpu.memory_space<vmem>>, %arg6: memref<1x128xf32, #tpu.memory_space<vmem>>, %arg7: memref<128x128xbf16, #tpu.memory_space<vmem>>, %arg8: memref<1x128xf32, #tpu.memory_space<vmem>>, %arg9: memref<128x128xbf16, #tpu.memory_space<vmem>>, %arg10: memref<1x128xf32, #tpu.memory_space<vmem>>, %arg11: memref<32x128xbf16, #tpu.memory_space<vmem>>, %arg12: memref<1x128xf32, #tpu.memory_space<vmem>>, %arg13: memref<128x128xbf16, #tpu.memory_space<vmem>>, %arg14: memref<1x128xf32, #tpu.memory_space<vmem>>, %arg15: memref<128x128xbf16, #tpu.memory_space<vmem>>, %arg16: memref<1x128xf32, #tpu.memory_space<vmem>>, %arg17: memref<128x896xbf16, #tpu.memory_space<vmem>>, %arg18: memref<1x896xf32, #tpu.memory_space<vmem>>, %arg19: memref<128x896xf32, #tpu.memory_space<vmem>>, %arg20: memref<128x128xf32, #tpu.memory_space<vmem>>) attributes {dimension_semantics = [#tpu.dimension_semantics<parallel>], iteration_bounds = array<i64: 2>, scalar_prefetch = 0 : i64, scratch_operands = 0 : i64, tpu.core_type = #tpu.core_type<tc>, window_params = [{transform_indices = @transform_0, window_bounds = array<i64: 128, 896>}, {transform_indices = @transform_1, window_bounds = array<i64: 128, 32>}, {pipeline_mode = #tpu.pipeline_mode<synchronous>, transform_indices = @transform_2, window_bounds = array<i64: 896, 128>}, {pipeline_mode = #tpu.pipeline_mode<synchronous>, transform_indices = @transform_3, window_bounds = array<i64: 1, 128>}, {pipeline_mode = #tpu.pipeline_mode<synchronous>, transform_indices = @transform_4, window_bounds = array<i64: 128, 128>}, {pipeline_mode = #tpu.pipeline_mode<synchronous>, transform_indices = @transform_5, window_bounds = array<i64: 1, 128>}, {pipeline_mode = #tpu.pipeline_mode<synchronous>, transform_indices = @transform_6, window_bounds = array<i64: 128, 128>}, {pipeline_mode = #tpu.pipeline_mode<synchronous>, transform_indices = @transform_7, window_bounds = array<i64: 1, 128>}, {pipeline_mode = #tpu.pipeline_mode<synchronous>, transform_indices = @transform_8, window_bounds = array<i64: 128, 128>}, {pipeline_mode = #tpu.pipeline_mode<synchronous>, transform_indices = @transform_9, window_bounds = array<i64: 1, 128>}, {pipeline_mode = #tpu.pipeline_mode<synchronous>, transform_indices = @transform_10, window_bounds = array<i64: 32, 128>}, {pipeline_mode = #tpu.pipeline_mode<synchronous>, transform_indices = @transform_11, window_bounds = array<i64: 1, 128>}, {pipeline_mode = #tpu.pipeline_mode<synchronous>, transform_indices = @transform_12, window_bounds = array<i64: 128, 128>}, {pipeline_mode = #tpu.pipeline_mode<synchronous>, transform_indices = @transform_13, window_bounds = array<i64: 1, 128>}, {pipeline_mode = #tpu.pipeline_mode<synchronous>, transform_indices = @transform_14, window_bounds = array<i64: 128, 128>}, {pipeline_mode = #tpu.pipeline_mode<synchronous>, transform_indices = @transform_15, window_bounds = array<i64: 1, 128>}, {pipeline_mode = #tpu.pipeline_mode<synchronous>, transform_indices = @transform_16, window_bounds = array<i64: 128, 896>}, {pipeline_mode = #tpu.pipeline_mode<synchronous>, transform_indices = @transform_17, window_bounds = array<i64: 1, 896>}, {transform_indices = @transform_18, window_bounds = array<i64: 128, 896>}, {transform_indices = @transform_19, window_bounds = array<i64: 128, 128>}]} {
    %c0 = arith.constant 0 : index
    %c0_0 = arith.constant 0 : index
    %0 = vector.load %arg1[%c0, %c0_0] : memref<128x896xbf16, #tpu.memory_space<vmem>>, vector<128x896xbf16>
    %c0_1 = arith.constant 0 : index
    %c0_2 = arith.constant 0 : index
    %1 = vector.load %arg3[%c0_1, %c0_2] : memref<896x128xbf16, #tpu.memory_space<vmem>>, vector<896x128xbf16>
    %cst = arith.constant dense<0.000000e+00> : vector<128x128xf32>
    %2 = tpu.matmul %0, %1, %cst {dimension_numbers = #tpu.dot_dimension_numbers<[1], [0], [0], [1], [0, 0, 1, 1], [], []>} : vector<128x896xbf16>, vector<896x128xbf16>, vector<128x128xf32> -> vector<128x128xf32>
    %c0_3 = arith.constant 0 : index
    %c0_4 = arith.constant 0 : index
    %3 = vector.load %arg4[%c0_3, %c0_4] : memref<1x128xf32, #tpu.memory_space<vmem>>, vector<1x128xf32>
    %4 = vector.broadcast %3 : vector<1x128xf32> to vector<128x128xf32>
    %5 = arith.addf %2, %4 : vector<128x128xf32>
    %cst_5 = arith.constant 0.000000e+00 : f32
    %6 = vector.broadcast %cst_5 : f32 to vector<128x128xf32>
    %7 = arith.maximumf %5, %6 : vector<128x128xf32>
    %8 = arith.truncf %7 : vector<128x128xf32> to vector<128x128xbf16>
    %c0_6 = arith.constant 0 : index
    %c0_7 = arith.constant 0 : index
    %9 = vector.load %arg5[%c0_6, %c0_7] : memref<128x128xbf16, #tpu.memory_space<vmem>>, vector<128x128xbf16>
    %cst_8 = arith.constant dense<0.000000e+00> : vector<128x128xf32>
    %10 = tpu.matmul %8, %9, %cst_8 {dimension_numbers = #tpu.dot_dimension_numbers<[1], [0], [0], [1], [0, 0, 1, 1], [], []>} : vector<128x128xbf16>, vector<128x128xbf16>, vector<128x128xf32> -> vector<128x128xf32>
    %c0_9 = arith.constant 0 : index
    %c0_10 = arith.constant 0 : index
    %11 = vector.load %arg6[%c0_9, %c0_10] : memref<1x128xf32, #tpu.memory_space<vmem>>, vector<1x128xf32>
    %12 = vector.broadcast %11 : vector<1x128xf32> to vector<128x128xf32>
    %13 = arith.addf %10, %12 : vector<128x128xf32>
    %cst_11 = arith.constant 0.000000e+00 : f32
    %14 = vector.broadcast %cst_11 : f32 to vector<128x128xf32>
    %15 = arith.maximumf %13, %14 : vector<128x128xf32>
    %16 = arith.truncf %15 : vector<128x128xf32> to vector<128x128xbf16>
    %c0_12 = arith.constant 0 : index
    %c0_13 = arith.constant 0 : index
    %17 = vector.load %arg7[%c0_12, %c0_13] : memref<128x128xbf16, #tpu.memory_space<vmem>>, vector<128x128xbf16>
    %cst_14 = arith.constant dense<0.000000e+00> : vector<128x128xf32>
    %18 = tpu.matmul %16, %17, %cst_14 {dimension_numbers = #tpu.dot_dimension_numbers<[1], [0], [0], [1], [0, 0, 1, 1], [], []>} : vector<128x128xbf16>, vector<128x128xbf16>, vector<128x128xf32> -> vector<128x128xf32>
    %c0_15 = arith.constant 0 : index
    %c0_16 = arith.constant 0 : index
    %19 = vector.load %arg8[%c0_15, %c0_16] : memref<1x128xf32, #tpu.memory_space<vmem>>, vector<1x128xf32>
    %20 = vector.broadcast %19 : vector<1x128xf32> to vector<128x128xf32>
    %21 = arith.addf %18, %20 : vector<128x128xf32>
    %cst_17 = arith.constant 0.000000e+00 : f32
    %22 = vector.broadcast %cst_17 : f32 to vector<128x128xf32>
    %23 = arith.maximumf %21, %22 : vector<128x128xf32>
    %24 = arith.truncf %23 : vector<128x128xf32> to vector<128x128xbf16>
    %c0_18 = arith.constant 0 : index
    %c0_19 = arith.constant 0 : index
    %25 = vector.load %arg9[%c0_18, %c0_19] : memref<128x128xbf16, #tpu.memory_space<vmem>>, vector<128x128xbf16>
    %cst_20 = arith.constant dense<0.000000e+00> : vector<128x128xf32>
    %26 = tpu.matmul %24, %25, %cst_20 {dimension_numbers = #tpu.dot_dimension_numbers<[1], [0], [0], [1], [0, 0, 1, 1], [], []>} : vector<128x128xbf16>, vector<128x128xbf16>, vector<128x128xf32> -> vector<128x128xf32>
    %c0_21 = arith.constant 0 : index
    %c0_22 = arith.constant 0 : index
    %27 = vector.load %arg10[%c0_21, %c0_22] : memref<1x128xf32, #tpu.memory_space<vmem>>, vector<1x128xf32>
    %28 = vector.broadcast %27 : vector<1x128xf32> to vector<128x128xf32>
    %29 = arith.addf %26, %28 : vector<128x128xf32>
    %30 = vector.extract_strided_slice %29 {offsets = [0, 0], sizes = [128, 32], strides = [1, 1]} : vector<128x128xf32> to vector<128x32xf32>
    %31 = vector.extract_strided_slice %29 {offsets = [0, 32], sizes = [128, 32], strides = [1, 1]} : vector<128x128xf32> to vector<128x32xf32>
    %cst_23 = arith.constant 5.000000e-01 : f32
    %32 = vector.broadcast %cst_23 : f32 to vector<128x32xf32>
    %33 = arith.mulf %32, %31 : vector<128x32xf32>
    %34 = math.exp %33 : vector<128x32xf32>
    %c0_24 = arith.constant 0 : index
    %c0_25 = arith.constant 0 : index
    %35 = vector.load %arg2[%c0_24, %c0_25] : memref<128x32xf32, #tpu.memory_space<vmem>>, vector<128x32xf32>
    %36 = arith.mulf %35, %34 : vector<128x32xf32>
    %37 = arith.addf %36, %30 : vector<128x32xf32>
    %38 = arith.truncf %37 : vector<128x32xf32> to vector<128x32xbf16>
    %c0_26 = arith.constant 0 : index
    %c0_27 = arith.constant 0 : index
    %39 = vector.load %arg11[%c0_26, %c0_27] : memref<32x128xbf16, #tpu.memory_space<vmem>>, vector<32x128xbf16>
    %cst_28 = arith.constant dense<0.000000e+00> : vector<128x128xf32>
    %40 = tpu.matmul %38, %39, %cst_28 {dimension_numbers = #tpu.dot_dimension_numbers<[1], [0], [0], [1], [0, 0, 1, 1], [], []>} : vector<128x32xbf16>, vector<32x128xbf16>, vector<128x128xf32> -> vector<128x128xf32>
    %c0_29 = arith.constant 0 : index
    %c0_30 = arith.constant 0 : index
    %41 = vector.load %arg12[%c0_29, %c0_30] : memref<1x128xf32, #tpu.memory_space<vmem>>, vector<1x128xf32>
    %42 = vector.broadcast %41 : vector<1x128xf32> to vector<128x128xf32>
    %43 = arith.addf %40, %42 : vector<128x128xf32>
    %cst_31 = arith.constant 0.000000e+00 : f32
    %44 = vector.broadcast %cst_31 : f32 to vector<128x128xf32>
    %45 = arith.maximumf %43, %44 : vector<128x128xf32>
    %46 = arith.truncf %45 : vector<128x128xf32> to vector<128x128xbf16>
    %c0_32 = arith.constant 0 : index
    %c0_33 = arith.constant 0 : index
    %47 = vector.load %arg13[%c0_32, %c0_33] : memref<128x128xbf16, #tpu.memory_space<vmem>>, vector<128x128xbf16>
    %cst_34 = arith.constant dense<0.000000e+00> : vector<128x128xf32>
    %48 = tpu.matmul %46, %47, %cst_34 {dimension_numbers = #tpu.dot_dimension_numbers<[1], [0], [0], [1], [0, 0, 1, 1], [], []>} : vector<128x128xbf16>, vector<128x128xbf16>, vector<128x128xf32> -> vector<128x128xf32>
    %c0_35 = arith.constant 0 : index
    %c0_36 = arith.constant 0 : index
    %49 = vector.load %arg14[%c0_35, %c0_36] : memref<1x128xf32, #tpu.memory_space<vmem>>, vector<1x128xf32>
    %50 = vector.broadcast %49 : vector<1x128xf32> to vector<128x128xf32>
    %51 = arith.addf %48, %50 : vector<128x128xf32>
    %cst_37 = arith.constant 0.000000e+00 : f32
    %52 = vector.broadcast %cst_37 : f32 to vector<128x128xf32>
    %53 = arith.maximumf %51, %52 : vector<128x128xf32>
    %54 = arith.truncf %53 : vector<128x128xf32> to vector<128x128xbf16>
    %c0_38 = arith.constant 0 : index
    %c0_39 = arith.constant 0 : index
    %55 = vector.load %arg15[%c0_38, %c0_39] : memref<128x128xbf16, #tpu.memory_space<vmem>>, vector<128x128xbf16>
    %cst_40 = arith.constant dense<0.000000e+00> : vector<128x128xf32>
    %56 = tpu.matmul %54, %55, %cst_40 {dimension_numbers = #tpu.dot_dimension_numbers<[1], [0], [0], [1], [0, 0, 1, 1], [], []>} : vector<128x128xbf16>, vector<128x128xbf16>, vector<128x128xf32> -> vector<128x128xf32>
    %c0_41 = arith.constant 0 : index
    %c0_42 = arith.constant 0 : index
    %57 = vector.load %arg16[%c0_41, %c0_42] : memref<1x128xf32, #tpu.memory_space<vmem>>, vector<1x128xf32>
    %58 = vector.broadcast %57 : vector<1x128xf32> to vector<128x128xf32>
    %59 = arith.addf %56, %58 : vector<128x128xf32>
    %cst_43 = arith.constant 0.000000e+00 : f32
    %60 = vector.broadcast %cst_43 : f32 to vector<128x128xf32>
    %61 = arith.maximumf %59, %60 : vector<128x128xf32>
    %62 = arith.truncf %61 : vector<128x128xf32> to vector<128x128xbf16>
    %c0_44 = arith.constant 0 : index
    %c0_45 = arith.constant 0 : index
    %63 = vector.load %arg17[%c0_44, %c0_45] : memref<128x896xbf16, #tpu.memory_space<vmem>>, vector<128x896xbf16>
    %cst_46 = arith.constant dense<0.000000e+00> : vector<128x896xf32>
    %64 = tpu.matmul %62, %63, %cst_46 {dimension_numbers = #tpu.dot_dimension_numbers<[1], [0], [0], [1], [0, 0, 1, 1], [], []>} : vector<128x128xbf16>, vector<128x896xbf16>, vector<128x896xf32> -> vector<128x896xf32>
    %c0_47 = arith.constant 0 : index
    %c0_48 = arith.constant 0 : index
    %65 = vector.load %arg18[%c0_47, %c0_48] : memref<1x896xf32, #tpu.memory_space<vmem>>, vector<1x896xf32>
    %66 = vector.broadcast %65 : vector<1x896xf32> to vector<128x896xf32>
    %67 = arith.addf %64, %66 : vector<128x896xf32>
    %cst_49 = arith.constant 0.000000e+00 : f32
    %68 = vector.broadcast %cst_49 : f32 to vector<128x896xf32>
    %69 = arith.subf %68, %67 : vector<128x896xf32>
    %70 = math.exp %69 : vector<128x896xf32>
    %cst_50 = arith.constant 1.000000e+00 : f32
    %71 = vector.broadcast %cst_50 : f32 to vector<128x896xf32>
    %72 = arith.addf %71, %70 : vector<128x896xf32>
    %73 = tpu.reciprocal %72 {approx = true} : vector<128x896xf32> -> vector<128x896xf32>
    %c0_51 = arith.constant 0 : index
    %c0_52 = arith.constant 0 : index
    %74 = vector.load %arg19[%c0_51, %c0_52] : memref<128x896xf32, #tpu.memory_space<vmem>>, vector<128x896xf32>
    tpu.vector_store %arg19[%c0_51, %c0_52], %73 {strides = array<i32>} : memref<128x896xf32, #tpu.memory_space<vmem>>, vector<128x896xf32>,
    %c0_53 = arith.constant 0 : index
    %c0_54 = arith.constant 0 : index
    %75 = vector.load %arg20[%c0_53, %c0_54] : memref<128x128xf32, #tpu.memory_space<vmem>>, vector<128x128xf32>
    tpu.vector_store %arg20[%c0_53, %c0_54], %29 {strides = array<i32>} : memref<128x128xf32, #tpu.memory_space<vmem>>, vector<128x128xf32>,
    return
  }
  func.func @transform_0(%arg0: i32) -> (i32, i32) {
    %c0_i32 = arith.constant 0 : i32
    %c0_i32_0 = arith.constant 0 : i32
    return %arg0, %c0_i32 : i32, i32
  }
  func.func @transform_1(%arg0: i32) -> (i32, i32) {
    %c0_i32 = arith.constant 0 : i32
    %c0_i32_0 = arith.constant 0 : i32
    return %arg0, %c0_i32 : i32, i32
  }
  func.func @transform_2(%arg0: i32) -> (i32, i32) {
    %c0_i32 = arith.constant 0 : i32
    %c0_i32_0 = arith.constant 0 : i32
    %c0_i32_1 = arith.constant 0 : i32
    return %c0_i32, %c0_i32_0 : i32, i32
  }
  func.func @transform_3(%arg0: i32) -> (i32, i32) {
    %c0_i32 = arith.constant 0 : i32
    %c0_i32_0 = arith.constant 0 : i32
    %c0_i32_1 = arith.constant 0 : i32
    return %c0_i32, %c0_i32_0 : i32, i32
  }
  func.func @transform_4(%arg0: i32) -> (i32, i32) {
    %c0_i32 = arith.constant 0 : i32
    %c0_i32_0 = arith.constant 0 : i32
    %c0_i32_1 = arith.constant 0 : i32
    return %c0_i32, %c0_i32_0 : i32, i32
  }
  func.func @transform_5(%arg0: i32) -> (i32, i32) {
    %c0_i32 = arith.constant 0 : i32
    %c0_i32_0 = arith.constant 0 : i32
    %c0_i32_1 = arith.constant 0 : i32
    return %c0_i32, %c0_i32_0 : i32, i32
  }
  func.func @transform_6(%arg0: i32) -> (i32, i32) {
    %c0_i32 = arith.constant 0 : i32
    %c0_i32_0 = arith.constant 0 : i32
    %c0_i32_1 = arith.constant 0 : i32
    return %c0_i32, %c0_i32_0 : i32, i32
  }
  func.func @transform_7(%arg0: i32) -> (i32, i32) {
    %c0_i32 = arith.constant 0 : i32
    %c0_i32_0 = arith.constant 0 : i32
    %c0_i32_1 = arith.constant 0 : i32
    return %c0_i32, %c0_i32_0 : i32, i32
  }
  func.func @transform_8(%arg0: i32) -> (i32, i32) {
    %c0_i32 = arith.constant 0 : i32
    %c0_i32_0 = arith.constant 0 : i32
    %c0_i32_1 = arith.constant 0 : i32
    return %c0_i32, %c0_i32_0 : i32, i32
  }
  func.func @transform_9(%arg0: i32) -> (i32, i32) {
    %c0_i32 = arith.constant 0 : i32
    %c0_i32_0 = arith.constant 0 : i32
    %c0_i32_1 = arith.constant 0 : i32
    return %c0_i32, %c0_i32_0 : i32, i32
  }
  func.func @transform_10(%arg0: i32) -> (i32, i32) {
    %c0_i32 = arith.constant 0 : i32
    %c0_i32_0 = arith.constant 0 : i32
    %c0_i32_1 = arith.constant 0 : i32
    return %c0_i32, %c0_i32_0 : i32, i32
  }
  func.func @transform_11(%arg0: i32) -> (i32, i32) {
    %c0_i32 = arith.constant 0 : i32
    %c0_i32_0 = arith.constant 0 : i32
    %c0_i32_1 = arith.constant 0 : i32
    return %c0_i32, %c0_i32_0 : i32, i32
  }
  func.func @transform_12(%arg0: i32) -> (i32, i32) {
    %c0_i32 = arith.constant 0 : i32
    %c0_i32_0 = arith.constant 0 : i32
    %c0_i32_1 = arith.constant 0 : i32
    return %c0_i32, %c0_i32_0 : i32, i32
  }
  func.func @transform_13(%arg0: i32) -> (i32, i32) {
    %c0_i32 = arith.constant 0 : i32
    %c0_i32_0 = arith.constant 0 : i32
    %c0_i32_1 = arith.constant 0 : i32
    return %c0_i32, %c0_i32_0 : i32, i32
  }
  func.func @transform_14(%arg0: i32) -> (i32, i32) {
    %c0_i32 = arith.constant 0 : i32
    %c0_i32_0 = arith.constant 0 : i32
    %c0_i32_1 = arith.constant 0 : i32
    return %c0_i32, %c0_i32_0 : i32, i32
  }
  func.func @transform_15(%arg0: i32) -> (i32, i32) {
    %c0_i32 = arith.constant 0 : i32
    %c0_i32_0 = arith.constant 0 : i32
    %c0_i32_1 = arith.constant 0 : i32
    return %c0_i32, %c0_i32_0 : i32, i32
  }
  func.func @transform_16(%arg0: i32) -> (i32, i32) {
    %c0_i32 = arith.constant 0 : i32
    %c0_i32_0 = arith.constant 0 : i32
    %c0_i32_1 = arith.constant 0 : i32
    return %c0_i32, %c0_i32_0 : i32, i32
  }
  func.func @transform_17(%arg0: i32) -> (i32, i32) {
    %c0_i32 = arith.constant 0 : i32
    %c0_i32_0 = arith.constant 0 : i32
    %c0_i32_1 = arith.constant 0 : i32
    return %c0_i32, %c0_i32_0 : i32, i32
  }
  func.func @transform_18(%arg0: i32) -> (i32, i32) {
    %c0_i32 = arith.constant 0 : i32
    %c0_i32_0 = arith.constant 0 : i32
    return %arg0, %c0_i32 : i32, i32
  }
  func.func @transform_19(%arg0: i32) -> (i32, i32) {
    %c0_i32 = arith.constant 0 : i32
    %c0_i32_0 = arith.constant 0 : i32
    return %arg0, %c0_i32 : i32, i32
  }
}

</mosaic_0001>

<bundles_post_ra>
// kernel: vae_forward.1
= control target key start
LH: loop header
LB: loop body
LE: loop exit
PB: predicated region body
PF: predicated region fallthrough
CT: control target
= control target key end

     0   :  { %s7842_s0 = inlined_call_operand.vmem [shape: bf16[256,896], index: 0, kind: input, shape index: {}]   ;;  %s7843_s1 = inlined_call_operand.vmem [shape: f32[256,32], index: 1, kind: input, shape index: {}]   ;;  %s7844_s2 = inlined_call_operand.vmem [shape: bf16[896,128], index: 2, kind: input, shape index: {}]   ;;  %s7845_s3 = inlined_call_operand.vmem [shape: f32[1,128], index: 3, kind: input, shape index: {}]   ;;  %s7846_s4 = inlined_call_operand.vmem [shape: bf16[128,128], index: 4, kind: input, shape index: {}]   ;;  %s7847_s5 = inlined_call_operand.vmem [shape: f32[1,128], index: 5, kind: input, shape index: {}]   ;;  %s7848_s6 = inlined_call_operand.vmem [shape: bf16[128,128], index: 6, kind: input, shape index: {}]   ;;  %s7849_s7 = inlined_call_operand.vmem [shape: f32[1,128], index: 7, kind: input, shape index: {}]   ;;  %s7850_s8 = inlined_call_operand.vmem [shape: bf16[128,128], index: 8, kind: input, shape index: {}]   ;;  %s7851_s9 = inlined_call_operand.vmem [shape: f32[1,128], index: 9, kind: input, shape index: {}]   ;;  %s7852_s10 = inlined_call_operand.vmem [shape: bf16[32,128], index: 10, kind: input, shape index: {}]   ;;  %s7853_s11 = inlined_call_operand.vmem [shape: f32[1,128], index: 11, kind: input, shape index: {}]   ;;  %s7854_s12 = inlined_call_operand.vmem [shape: bf16[128,128], index: 12, kind: input, shape index: {}]   ;;  %s7855_s13 = inlined_call_operand.vmem [shape: f32[1,128], index: 13, kind: input, shape index: {}]   ;;  %s7856_s14 = inlined_call_operand.vmem [shape: bf16[128,128], index: 14, kind: input, shape index: {}]   ;;  %s7857_s15 = inlined_call_operand.vmem [shape: f32[1,128], index: 15, kind: input, shape index: {}]   ;;  %s7858_s16 = inlined_call_operand.vmem [shape: bf16[128,896], index: 16, kind: input, shape index: {}]   ;;  %s7859_s17 = inlined_call_operand.vmem [shape: f32[1,896], index: 17, kind: input, shape index: {}]   ;;  %s7860_s18 = inlined_call_operand.vmem [shape: f32[256,896], index: 18, kind: output, shape index: {0}]   ;;  %s7861_s19 = inlined_call_operand.vmem [shape: f32[256,128], index: 19, kind: output, shape index: {1}]  }
   0x1   :  { %7863 = sst [smem:[#allocation9_spill]] %s7842_s0  ;;  %s6416_s0 = smov 0  }
   0x2   :  { %7864 = sst [smem:[#allocation10_spill]] %s7843_s1 }
   0x3   :  { %7865 = sst [smem:[#allocation11_spill]] %s7844_s2 }
   0x4   :  { %7866 = sst [smem:[#allocation12_spill]] %s7845_s3 }
   0x5 LB: > { %s4757_s30 = sadd.s32 4294967295, %s6312_s0   ;;  %p4761_p0 = scmp.ge.s32.totalorder %s6312_s0, 1  ;;  %s6312_s0 = sphi %s6416_s0, %s30_s0  }
   0x6   : > { %p553_p1 = scmp.lt.s32.totalorder %s6312_s0, 3 }
   0x8   : > { %p554_p2 = pnand %p4761_p0, %p553_p1 }
   0xa   : > { %557 = sbr.rel (%p554_p2) target bundleno = 2279 (0x8e7), region = 92 }
  0x11   : > { %s7867_s1 = sld [smem:[#allocation11_spill]]  ;;  %s4762_s23 = sshll.u32 %s4757_s30, 4  ;;  %vm2610_vm0 = vcmask 261120  }
  0x12   : > { %p622_p3 = scmp.lt.s32.totalorder %s4762_s23, 31  ;;  %s7868_s21 = sld [smem:[#allocation9_spill]] }
  0x13   : > { %s7870_s29 = sld [smem:[#allocation10_spill]] }
  0x14   : > { %s7888_s23 = smov (!%p622_p3, %s4762_s23), 31 }
  0x15   : > { %s5555_s22 = smul.u32 28, %s7888_s23  ;;  %s4765_s30 = sshll.u32 %s7888_s23, 3 }
  0x16   : > { %s6825_s26 = scalar_lea.vmem %s7861_s19, %s4765_s30 }
  0x17   : > { %v5567_v0 = vld [vmem:[%s7867_s1 + $0x40] sm:$0xff]   ;;  %v5571_v4 = vld [vmem:[%s7867_s1 + $0x48] sm:$0xff]   ;;  %v5575_v8 = vld [vmem:[%s7867_s1 + $0x50] sm:$0xff]  }
  0x18   : > { %v5568_v1 = vld [vmem:[%s7867_s1] sm:$0xff]   ;;  %4997 = vmatprep.subr.bf16.mxu0 %v5567_v0  ;;  %v5572_v5 = vld [vmem:[%s7867_s1 + $0x8] sm:$0xff]   ;;  %v5576_v9 = vld [vmem:[%s7867_s1 + $0x10] sm:$0xff]   ;;  %s6519_s2 = scalar_lea.vmem %s7868_s21, %s5555_s22  ;;  %s6314_s22 = smov 96  }
  0x19   : > { %v5569_v2 = vld [vmem:[%s7867_s1 + $0xc0] sm:$0xff]   ;;  %4998 = vmatpush3.bf16.msra.mxu0 %v5568_v1  ;;  %v5573_v6 = vld [vmem:[%s7867_s1 + $0xc8] sm:$0xff]   ;;  %v5577_v10 = vld [vmem:[%s7867_s1 + $0xd0] sm:$0xff]   ;;  %s6962_s20 = scalar_lea.vmem %s7870_s29, %s4765_s30 }
  0x1a   : > { %v5570_v3 = vld [vmem:[%s7867_s1 + $0x80] sm:$0xff]   ;;  %5061 = vmatprep.subr.bf16.mxu1 %v5569_v2  ;;  %4999 = vmatprep.subr.bf16.mxu0 %v5571_v4  ;;  %v5574_v7 = vld [vmem:[%s7867_s1 + $0x88] sm:$0xff]   ;;  %v5578_v11 = vld [vmem:[%s7867_s1 + $0x90] sm:$0xff]  }
  0x1b   : > { %5062 = vmatpush3.bf16.msra.mxu1 %v5570_v3  ;;  %v5579_v12 = vld [vmem:[%s7867_s1 + $0x58] sm:$0xff]   ;;  %v5583_v16 = vld [vmem:[%s7867_s1 + $0x60] sm:$0xff]   ;;  %v5587_v20 = vld [vmem:[%s7867_s1 + $0x68] sm:$0xff]  }
  0x1c   : > { %5063 = vmatprep.subr.bf16.mxu1 %v5573_v6  ;;  %v5580_v13 = vld [vmem:[%s7867_s1 + $0x18] sm:$0xff]   ;;  %v5584_v17 = vld [vmem:[%s7867_s1 + $0x20] sm:$0xff]   ;;  %v5588_v21 = vld [vmem:[%s7867_s1 + $0x28] sm:$0xff]  }
  0x1d   : > { %5000 = vmatpush3.bf16.msra.mxu0 %v5572_v5  ;;  %v5581_v14 = vld [vmem:[%s7867_s1 + $0xd8] sm:$0xff]   ;;  %v5585_v18 = vld [vmem:[%s7867_s1 + $0xe0] sm:$0xff]   ;;  %v5589_v22 = vld [vmem:[%s7867_s1 + $0xe8] sm:$0xff]  }
  0x1e   : > { %5001 = vmatprep.subr.bf16.mxu0 %v5575_v8  ;;  %v5582_v15 = vld [vmem:[%s7867_s1 + $0x98] sm:$0xff]   ;;  %v5586_v19 = vld [vmem:[%s7867_s1 + $0xa0] sm:$0xff]   ;;  %v5590_v23 = vld [vmem:[%s7867_s1 + $0xa8] sm:$0xff]  }
  0x1f   : > { %5064 = vmatpush3.bf16.msra.mxu1 %v5574_v7  ;;  %v5591_v24 = vld [vmem:[%s7867_s1 + $0x70] sm:$0xff]   ;;  %v5595_v28 = vld [vmem:[%s7867_s1 + $0x78] sm:$0xff]   ;;  %v5600_v32 = vld [vmem:[%s6519_s2 + $0x4] ss:$28 sps:$4 sm:$0xff]  }
  0x20   : > { %5065 = vmatprep.subr.bf16.mxu1 %v5577_v10  ;;  %v5592_v25 = vld [vmem:[%s7867_s1 + $0x30] sm:$0xff]   ;;  %v5596_v29 = vld [vmem:[%s7867_s1 + $0x38] sm:$0xff]   ;;  %1487 = vmatprep.mubr.bf16.mxu0 %v5600_v32  ;;  %v5602_v34 = vld [vmem:[%s7867_s1 + $0x140] sm:$0xff]  }
  0x21   : > { %5002 = vmatpush3.bf16.msra.mxu0 %v5576_v9  ;;  %v5593_v26 = vld [vmem:[%s7867_s1 + $0xf0] sm:$0xff]   ;;  %v5597_v30 = vld [vmem:[%s7867_s1 + $0xf8] sm:$0xff]   ;;  %v5603_v35 = vld [vmem:[%s6519_s2 + $0x8] ss:$28 sps:$4 sm:$0xff]  }
  0x22   : > { %5003 = vmatprep.subr.bf16.mxu0 %v5579_v12  ;;  %v5594_v27 = vld [vmem:[%s7867_s1 + $0xb0] sm:$0xff]   ;;  %v5598_v31 = vld [vmem:[%s6519_s2] ss:$28 sps:$4 sm:$0xff]   ;;  %v5605_v36 = vld [vmem:[%s6519_s2 + $0xc] ss:$28 sps:$4 sm:$0xff]  }
  0x23   : > { %5066 = vmatpush3.bf16.msra.mxu1 %v5578_v11  ;;  %v5601_v33 = vld [vmem:[%s7867_s1 + $0xb8] sm:$0xff]   ;;  %v5606_v37 = vld [vmem:[%s7867_s1 + $0x100] sm:$0xff]   ;;  %1584 = vmatprep.mubr.bf16.mxu1 %v5605_v36  ;;  %v5610_v40 = vld [vmem:[%s7867_s1 + $0x148] sm:$0xff]  }
  0x24   : > { %5067 = vmatprep.subr.bf16.mxu1 %v5581_v14  ;;  %v5607_v38 = vld [vmem:[%s6519_s2 + $0x3c] ss:$28 sps:$4 sm:$0xff]   ;;  %v5611_v41 = vld [vmem:[%s6519_s2 + $0x44] ss:$28 sps:$4 sm:$0xff]   ;;  %v5613_v42 = vld [vmem:[%s7867_s1 + $0x108] sm:$0xff]  }
  0x25   : > { %5004 = vmatpush3.bf16.msra.mxu0 %v5580_v13  ;;  %v5609_v39 = vld [vmem:[%s6519_s2 + $0x38] ss:$28 sps:$4 sm:$0xff]   ;;  %v5614_v43 = vld [vmem:[%s6519_s2 + $0x40] ss:$28 sps:$4 sm:$0xff]   ;;  %v5618_v48 = vld [vmem:[%s6519_s2 + $0x70] ss:$28 sps:$4 sm:$0xff]  }
  0x26   : > { %5005 = vmatprep.subr.bf16.mxu0 %v5583_v16  ;;  %v5615_v44 = vld [vmem:[%s7867_s1 + $0x180] sm:$0xff]   ;;  %v5616_v45 = vld [vmem:[%s6519_s2 + $0x74] ss:$28 sps:$4 sm:$0xff]   ;;  %v5620_v47 = vld [vmem:[%s6519_s2 + $0x7c] ss:$28 sps:$4 sm:$0xff]  }
  0x27   : > { %5068 = vmatpush3.bf16.msra.mxu1 %v5582_v15  ;;  %v5619_v46 = vld [vmem:[%s7867_s1 + $0x150] sm:$0xff]   ;;  %v5624_v50 = vld [vmem:[%s7867_s1 + $0x188] sm:$0xff]   ;;  %v5628_v53 = vld [vmem:[%s7867_s1 + $0x158] sm:$0xff]  }
  0x28   : > { %5069 = vmatprep.subr.bf16.mxu1 %v5585_v18  ;;  %v5622_v49 = vld [vmem:[%s7867_s1 + $0x110] sm:$0xff]   ;;  %v5625_v51 = vld [vmem:[%s6519_s2 + $0xac] ss:$28 sps:$4 sm:$0xff]   ;;  %v5631_v55 = vld [vmem:[%s7867_s1 + $0x118] sm:$0xff]  }
  0x29   : > { %5006 = vmatpush3.bf16.msra.mxu0 %v5584_v17  ;;  %v5623_v52 = vld [vmem:[%s6519_s2 + $0x78] ss:$28 sps:$4 sm:$0xff]   ;;  %v5627_v57 = vld [vmem:[%s6519_s2 + $0xa8] ss:$28 sps:$4 sm:$0xff]   ;;  %v5632_v59 = vld [vmem:[%s6519_s2 + $0xb0] ss:$28 sps:$4 sm:$0xff]  }
  0x2a   : > { %5007 = vmatprep.subr.bf16.mxu0 %v5587_v20  ;;  %v5629_v54 = vld [vmem:[%s6519_s2 + $0xb4] ss:$28 sps:$4 sm:$0xff]   ;;  %v5637_v58 = vld [vmem:[%s7867_s1 + $0x160] sm:$0xff]   ;;  %v5638_v62 = vld [vmem:[%s6519_s2 + $0xec] ss:$28 sps:$4 sm:$0xff]  }
  0x2b   : > { %5070 = vmatpush3.bf16.msra.mxu1 %v5586_v19  ;;  %v5633_v56 = vld [vmem:[%s7867_s1 + $0x190] sm:$0xff]   ;;  %v5634_v60 = vld [vmem:[%s6519_s2 + $0xe4] ss:$28 sps:$4 sm:$0xff]   ;;  %v5642_v63 = vld [vmem:[%s7867_s1 + $0x198] sm:$0xff]  }
  0x2c   : > { %5071 = vmatprep.subr.bf16.mxu1 %v5589_v22  ;;  %v5640_v61 = vld [vmem:[%s7867_s1 + $0x120] sm:$0xff]   ;;  %v5646_v0 = vld [vmem:[%s7867_s1 + $0x168] sm:$0xff]   ;;  %v5643_v2 = vld [vmem:[%s6519_s2 + $0x11c] ss:$28 sps:$4 sm:$0xff]  }
  0x2d   : > { %5008 = vmatpush3.bf16.msra.mxu0 %v5588_v21  ;;  %v5636_v1 = vld [vmem:[%s6519_s2 + $0xe0] ss:$28 sps:$4 sm:$0xff]   ;;  %v5649_v3 = vld [vmem:[%s7867_s1 + $0x128] sm:$0xff]   ;;  %v5655_v7 = vld [vmem:[%s7867_s1 + $0x170] sm:$0xff]  }
  0x2e   : > { %5009 = vmatprep.subr.bf16.mxu0 %v5591_v24  ;;  %v5651_v4 = vld [vmem:[%s7867_s1 + $0x1a0] sm:$0xff]   ;;  %v5658_v8 = vld [vmem:[%s7867_s1 + $0x130] sm:$0xff]   ;;  %v5660_v9 = vld [vmem:[%s7867_s1 + $0x1a8] sm:$0xff]  }
  0x2f   : > { %5072 = vmatpush3.bf16.msra.mxu1 %v5590_v23  ;;  %v5641_v5 = vld [vmem:[%s6519_s2 + $0xe8] ss:$28 sps:$4 sm:$0xff]   ;;  %v5645_v10 = vld [vmem:[%s6519_s2 + $0x118] ss:$28 sps:$4 sm:$0xff]   ;;  %v5650_v13 = vld [vmem:[%s6519_s2 + $0x120] ss:$28 sps:$4 sm:$0xff]  }
  0x30   : > { %5073 = vmatprep.subr.bf16.mxu1 %v5593_v26  ;;  %v5647_v6 = vld [vmem:[%s6519_s2 + $0x124] ss:$28 sps:$4 sm:$0xff]   ;;  %v5652_v11 = vld [vmem:[%s6519_s2 + $0x154] ss:$28 sps:$4 sm:$0xff]   ;;  %v5664_v12 = vld [vmem:[%s7867_s1 + $0x178] sm:$0xff]  }
  0x31   : > { %5010 = vmatpush3.bf16.msra.mxu0 %v5592_v25  ;;  %v5667_v14 = vld [vmem:[%s7867_s1 + $0x138] sm:$0xff]   ;;  %v5669_v16 = vld [vmem:[%s7867_s1 + $0x1b0] sm:$0xff]   ;;  %v5661_v19 = vld [vmem:[%s6519_s2 + $0x18c] ss:$28 sps:$4 sm:$0xff]  }
  0x32   : > { %5011 = vmatprep.subr.bf16.mxu0 %v5595_v28  ;;  %v5656_v15 = vld [vmem:[%s6519_s2 + $0x15c] ss:$28 sps:$4 sm:$0xff]   ;;  %v5654_v18 = vld [vmem:[%s6519_s2 + $0x150] ss:$28 sps:$4 sm:$0xff]   ;;  %v5663_v22 = vld [vmem:[%s6519_s2 + $0x188] ss:$28 sps:$4 sm:$0xff]  }
  0x33   : > { %5074 = vmatpush3.bf16.msra.mxu1 %v5594_v27  ;;  %v5673_v17 = vld [vmem:[%s7867_s1 + $0x1b8] sm:$0xff]   ;;  %v5665_v21 = vld [vmem:[%s6519_s2 + $0x194] ss:$28 sps:$4 sm:$0xff]   ;;  %v5676_v27 = vld [vmem:[%s6519_s2 + $0x4c] ss:$28 sps:$4 sm:$0xff]  }
  0x34   : > { %5075 = vmatprep.subr.bf16.mxu1 %v5597_v30  ;;  %v5659_v20 = vld [vmem:[%s6519_s2 + $0x158] ss:$28 sps:$4 sm:$0xff]   ;;  %v5668_v24 = vld [vmem:[%s6519_s2 + $0x190] ss:$28 sps:$4 sm:$0xff]   ;;  %v5678_v30 = vld [vmem:[%s6519_s2 + $0x48] ss:$28 sps:$4 sm:$0xff]  }
  0x35   : > { %5012 = vmatpush3.bf16.msra.mxu0 %v5596_v29  ;;  %v5672_v23 = vld [vmem:[%s6519_s2 + $0x14] ss:$28 sps:$4 sm:$0xff]   ;;  %v5682_v29 = vld [vmem:[%s6519_s2 + $0x88] ss:$28 sps:$4 sm:$0xff]   ;;  %v5683_v32 = vld [vmem:[%s6519_s2 + $0xc0] ss:$28 sps:$4 sm:$0xff]  }
  0x36   : > { %5125 = vmatprep.subr.bf16.mxu0 %v5602_v34  ;;  %v5674_v25 = vld [vmem:[%s6519_s2 + $0x18] ss:$28 sps:$4 sm:$0xff]   ;;  %v5670_v26 = vld [vmem:[%s6519_s2 + $0x10] ss:$28 sps:$4 sm:$0xff]   ;;  %v5681_v34 = vld [vmem:[%s6519_s2 + $0x80] ss:$28 sps:$4 sm:$0xff]  }
  0x37   : > { %5076 = vmatpush3.bf16.msra.mxu1 %v5601_v33  ;;  %v5675_v28 = vld [vmem:[%s6519_s2 + $0x50] ss:$28 sps:$4 sm:$0xff]   ;;  %v5690_v33 = vld [vmem:[%s6519_s2 + $0xf8] ss:$28 sps:$4 sm:$0xff]  }
  0x38   : > { %1488 = vmatmul.mubr.bf16.vlgmr.msra.gmra.mrb[0].mxu0 %v5598_v31  ;;  %5311 = vmatprep.subr.bf16.mxu1 %v5615_v44  ;;  %v5679_v31 = vld [vmem:[%s6519_s2 + $0x84] ss:$28 sps:$4 sm:$0xff]   ;;  %v5691_v36 = vld [vmem:[%s6519_s2 + $0x130] ss:$28 sps:$4 sm:$0xff]  }
  0x39   : > { %5126 = vmatpush3.bf16.msra.mxu0 %v5606_v37  ;;  %1495 = vmatprep.mubr.bf16.mxu0 %v5607_v38  ;;  %v5698_v37 = vld [vmem:[%s6519_s2 + $0x168] ss:$28 sps:$4 sm:$0xff]   ;;  %v5686_v38 = vld [vmem:[%s6519_s2 + $0xb8] ss:$28 sps:$4 sm:$0xff]  }
  0x3a   : > { %1585 = vmatmul.mubr.bf16.vlgmr.msra.gmra.mrb[0].mxu1 %v5603_v35  ;;  %5127 = vmatprep.subr.bf16.mxu0 %v5610_v40  ;;  %v5684_v35 = vld [vmem:[%s6519_s2 + $0xbc] ss:$28 sps:$4 sm:$0xff]  }
  0x3b   : > { %1592 = vmatprep.mubr.bf16.mxu1 %v5611_v41  ;;  %5312 = vmatpush3.bf16.msra.mxu1 %v5615_v44  ;;  %v5699_v40 = vld [vmem:[%s6519_s2 + $0x1a0] ss:$28 sps:$4 sm:$0xff]   ;;  %v5689_v41 = vld [vmem:[%s6519_s2 + $0xf0] ss:$28 sps:$4 sm:$0xff]  }
  0x3c   : > { %5313 = vmatprep.subr.bf16.mxu1 %v5624_v50  ;;  %v5695_v44 = vld [vmem:[%s6519_s2 + $0x164] ss:$28 sps:$4 sm:$0xff]  }
  0x3d   : > { %5128 = vmatpush3.bf16.msra.mxu0 %v5613_v42  ;;  %v5692_v42 = vld [vmem:[%s6519_s2 + $0x12c] ss:$28 sps:$4 sm:$0xff]  }
  0x3e   : > { %5129 = vmatprep.subr.bf16.mxu0 %v5619_v46  ;;  %v5700_v46 = vld [vmem:[%s6519_s2 + $0x19c] ss:$28 sps:$4 sm:$0xff]  }
  0x3f   : > { %5314 = vmatpush3.bf16.msra.mxu1 %v5624_v50  ;;  %v5705_v50 = vld [vmem:[%s7846_s4 + $0x10] sm:$0xff]  }
  0x40   : > { %1496 = vmatmul.mubr.bf16.gmra.mrb[4].mxu0 %v5609_v39  ;;  %5315 = vmatprep.subr.bf16.mxu1 %v5633_v56  ;;  %v5687_v39 = vld [vmem:[%s6519_s2 + $0xf4] ss:$28 sps:$4 sm:$0xff]  }
  0x41   : > { %1503 = vmatprep.mubr.bf16.mxu0 %v5616_v45  ;;  %5130 = vmatpush3.bf16.msra.mxu0 %v5622_v49  ;;  %v5697_v45 = vld [vmem:[%s6519_s2 + $0x160] ss:$28 sps:$4 sm:$0xff]   ;;  %v5704_v49 = vld [vmem:[%s7846_s4 + $0x8] sm:$0xff]  }
  0x42   : > { %1593 = vmatmul.mubr.bf16.gmra.mrb[4].mxu1 %v5614_v43  ;;  %5131 = vmatprep.subr.bf16.mxu0 %v5628_v53  ;;  %v5694_v43 = vld [vmem:[%s6519_s2 + $0x128] ss:$28 sps:$4 sm:$0xff]  }
  0x43   : > { %1600 = vmatprep.mubr.bf16.mxu1 %v5620_v47  ;;  %5316 = vmatpush3.bf16.msra.mxu1 %v5633_v56  ;;  %v5702_v47 = vld [vmem:[%s6519_s2 + $0x198] ss:$28 sps:$4 sm:$0xff]   ;;  %v5708_v53 = vld [vmem:[%s7846_s4 + $0x28] sm:$0xff]   ;;  %s7869_s2 = sld [smem:[#allocation12_spill]] }
  0x44   : > { %5317 = vmatprep.subr.bf16.mxu1 %v5642_v63 }
  0x45   : > { %5132 = vmatpush3.bf16.msra.mxu0 %v5631_v55  ;;  %v5710_v55 = vld [vmem:[%s7846_s4 + $0x38] sm:$0xff]  }
  0x46   : > { %5133 = vmatprep.subr.bf16.mxu0 %v5637_v58 }
  0x47   : > { %5318 = vmatpush3.bf16.msra.mxu1 %v5642_v63 }
  0x48   : > { %1504 = vmatmul.mubr.bf16.gmra.mrb[8].mxu0 %v5618_v48  ;;  %5319 = vmatprep.subr.bf16.mxu1 %v5651_v4  ;;  %v5703_v48 = vld [vmem:[%s7846_s4] sm:$0xff]  }
  0x49   : > { %1511 = vmatprep.mubr.bf16.mxu0 %v5625_v51  ;;  %5134 = vmatpush3.bf16.msra.mxu0 %v5640_v61  ;;  %v5706_v51 = vld [vmem:[%s7846_s4 + $0x18] sm:$0xff]  }
  0x4a   : > { %1601 = vmatmul.mubr.bf16.gmra.mrb[8].mxu1 %v5623_v52  ;;  %5135 = vmatprep.subr.bf16.mxu0 %v5646_v0  ;;  %v5707_v52 = vld [vmem:[%s7846_s4 + $0x20] sm:$0xff]  }
  0x4b   : > { %1608 = vmatprep.mubr.bf16.mxu1 %v5629_v54  ;;  %5320 = vmatpush3.bf16.msra.mxu1 %v5651_v4  ;;  %v5709_v54 = vld [vmem:[%s7846_s4 + $0x30] sm:$0xff]  }
  0x4c   : > { %5321 = vmatprep.subr.bf16.mxu1 %v5660_v9 }
  0x4d   : > { %5136 = vmatpush3.bf16.msra.mxu0 %v5649_v3 }
  0x4e   : > { %5137 = vmatprep.subr.bf16.mxu0 %v5655_v7  ;;  %v5712_v7 = vld [vmem:[%s7848_s6 + $0x8] sm:$0xff]  }
  0x4f   : > { %5322 = vmatpush3.bf16.msra.mxu1 %v5660_v9 }
  0x50   : > { %1512 = vmatmul.mubr.bf16.gmra.mrb[12].mxu0 %v5627_v57  ;;  %5323 = vmatprep.subr.bf16.mxu1 %v5669_v16  ;;  %v6685_v57 = vld [vmem:[%s7869_s2] ss:$0 sm:$0xff] }
  0x51   : > { %1519 = vmatprep.mubr.bf16.mxu0 %v5634_v60  ;;  %5138 = vmatpush3.bf16.msra.mxu0 %v5658_v8 }
  0x52   : > { %1609 = vmatmul.mubr.bf16.gmra.mrb[12].mxu1 %v5632_v59  ;;  %5139 = vmatprep.subr.bf16.mxu0 %v5664_v12 }
  0x53   : > { %1616 = vmatprep.mubr.bf16.mxu1 %v5638_v62  ;;  %5324 = vmatpush3.bf16.msra.mxu1 %v5669_v16 }
  0x54   : > { %5325 = vmatprep.subr.bf16.mxu1 %v5673_v17 }
  0x55   : > { %5140 = vmatpush3.bf16.msra.mxu0 %v5667_v14 }
  0x57   : > { %5326 = vmatpush3.bf16.msra.mxu1 %v5673_v17 }
  0x58   : > { %1520 = vmatmul.mubr.bf16.gmra.mrb[16].mxu0 %v5636_v1  ;;  %5343 = vmatprep.subr.bf16.mxu1 %v5703_v48 }
  0x59   : > { %1527 = vmatprep.mubr.bf16.mxu0 %v5643_v2 }
  0x5a   : > { %1617 = vmatmul.mubr.bf16.gmra.mrb[16].mxu1 %v5641_v5 }
  0x5b   : > { %1624 = vmatprep.mubr.bf16.mxu1 %v5647_v6  ;;  %v5711_v6 = vld [vmem:[%s7848_s6] sm:$0xff]  }
  0x5c   : > { %5375 = vmatprep.subr.bf16.mxu0 %v5711_v6 }
  0x60   : > { %1528 = vmatmul.mubr.bf16.gmra.mrb[20].mxu0 %v5645_v10 }
  0x61   : > { %1535 = vmatprep.mubr.bf16.mxu0 %v5652_v11 }
  0x62   : > { %1625 = vmatmul.mubr.bf16.gmra.mrb[20].mxu1 %v5650_v13 }
  0x63   : > { %1632 = vmatprep.mubr.bf16.mxu1 %v5656_v15  ;;  %v5713_v15 = vld [vmem:[%s7848_s6 + $0x10] sm:$0xff]  }
  0x68   : > { %1536 = vmatmul.mubr.bf16.gmra.mrb[24].mxu0 %v5654_v18 }
  0x69   : > { %1543 = vmatprep.mubr.bf16.mxu0 %v5661_v19 }
  0x6a   : > { %1633 = vmatmul.mubr.bf16.gmra.mrb[24].mxu1 %v5659_v20 }
  0x6b   : > { %1640 = vmatprep.mubr.bf16.mxu1 %v5665_v21 }
  0x70   : > { %1544 = vmatmul.mubr.bf16.gmra.mrb[28].mxu0 %v5663_v22 }
  0x71   : > { %1681 = vmatprep.mubr.bf16.mxu0 %v5672_v23 }
  0x72   : > { %1641 = vmatmul.mubr.bf16.gmra.mrb[28].mxu1 %v5668_v24 }
  0x73   : > { %5327 = vmatprep.mubr.bf16.mxu1 %v5674_v25  ;;  %v5714_v25 = vld [vmem:[%s7848_s6 + $0x18] sm:$0xff]  }
  0x78   : > { %1682 = vmatmul.mubr.bf16.vlgmr.msra.gmra.mrb[32].mxu0 %v5670_v26 }
  0x79   : > { %1689 = vmatprep.mubr.bf16.mxu0 %v5676_v27  ;;  %5376 = vmatpush3.bf16.msra.mxu0 %v5711_v6 }
  0x7a   : > { %5328 = vmatmul.mubr.bf16.vlgmr.msra.gmra.mrb[32].mxu1 %v5675_v28  ;;  %5377 = vmatprep.subr.bf16.mxu0 %v5712_v7 }
  0x7b   : > { %5331 = vmatprep.mubr.bf16.mxu1 %v5682_v29  ;;  %5344 = vmatpush3.bf16.msra.mxu1 %v5703_v48 }
  0x7c   : > { %5345 = vmatprep.subr.bf16.mxu1 %v5704_v49 }
  0x7d   : > { %5378 = vmatpush3.bf16.msra.mxu0 %v5712_v7 }
  0x7e   : > { %5379 = vmatprep.subr.bf16.mxu0 %v5713_v15 }
  0x7f   : > { %5346 = vmatpush3.bf16.msra.mxu1 %v5704_v49 }
  0x80   : > { %1690 = vmatmul.mubr.bf16.gmra.mrb[36].mxu0 %v5678_v30  ;;  %5347 = vmatprep.subr.bf16.mxu1 %v5705_v50 }
  0x81   : > { %1697 = vmatprep.mubr.bf16.mxu0 %v5679_v31  ;;  %5380 = vmatpush3.bf16.msra.mxu0 %v5713_v15 }
  0x82   : > { %5332 = vmatmul.mubr.bf16.gmra.mrb[36].mxu1 %v5683_v32  ;;  %5381 = vmatprep.subr.bf16.mxu0 %v5714_v25 }
  0x83   : > { %5335 = vmatprep.mubr.bf16.mxu1 %v5690_v33  ;;  %5348 = vmatpush3.bf16.msra.mxu1 %v5705_v50  ;;  %v5715_v33 = vld [vmem:[%s7848_s6 + $0x20] sm:$0xff]  }
  0x84   : > { %5349 = vmatprep.subr.bf16.mxu1 %v5706_v51 }
  0x85   : > { %5382 = vmatpush3.bf16.msra.mxu0 %v5714_v25 }
  0x86   : > { %5383 = vmatprep.subr.bf16.mxu0 %v5715_v33 }
  0x87   : > { %5350 = vmatpush3.bf16.msra.mxu1 %v5706_v51  ;;  %v5717_v51 = vld [vmem:[%s7848_s6 + $0x30] sm:$0xff]  }
  0x88   : > { %1698 = vmatmul.mubr.bf16.gmra.mrb[40].mxu0 %v5681_v34  ;;  %5351 = vmatprep.subr.bf16.mxu1 %v5707_v52 }
  0x89   : > { %1705 = vmatprep.mubr.bf16.mxu0 %v5684_v35  ;;  %5384 = vmatpush3.bf16.msra.mxu0 %v5715_v33 }
  0x8a   : > { %5336 = vmatmul.mubr.bf16.gmra.mrb[40].mxu1 %v5691_v36 }
  0x8b   : > { %5339 = vmatprep.mubr.bf16.mxu1 %v5698_v37  ;;  %5352 = vmatpush3.bf16.msra.mxu1 %v5707_v52 }
  0x8c   : > { %5353 = vmatprep.subr.bf16.mxu1 %v5708_v53 }
  0x8f   : > { %5354 = vmatpush3.bf16.msra.mxu1 %v5708_v53 }
  0x90   : > { %1706 = vmatmul.mubr.bf16.gmra.mrb[44].mxu0 %v5686_v38  ;;  %5355 = vmatprep.subr.bf16.mxu1 %v5709_v54 }
  0x91   : > { %1713 = vmatprep.mubr.bf16.mxu0 %v5687_v39 }
  0x92   : > { %5340 = vmatmul.mubr.bf16.gmra.mrb[44].mxu1 %v5699_v40 }
  0x93   : > { %5356 = vmatpush3.bf16.msra.mxu1 %v5709_v54 }
  0x94   : > { %5357 = vmatprep.subr.bf16.mxu1 %v5710_v55 }
  0x97   : > { %5358 = vmatpush3.bf16.msra.mxu1 %v5710_v55 }
  0x98   : > { %1714 = vmatmul.mubr.bf16.gmra.mrb[48].mxu0 %v5689_v41 }
  0x99   : > { %1721 = vmatprep.mubr.bf16.mxu0 %v5692_v42 }
  0xa0   : > { %1722 = vmatmul.mubr.bf16.gmra.mrb[52].mxu0 %v5694_v43  ;;  %v5716_v43 = vld [vmem:[%s7848_s6 + $0x28] sm:$0xff]  }
  0xa1   : > { %1729 = vmatprep.mubr.bf16.mxu0 %v5695_v44  ;;  %5385 = vmatprep.subr.bf16.mxu0 %v5716_v43 }
  0xa2   : > { %5386 = vmatpush3.bf16.msra.mxu0 %v5716_v43 }
  0xa3   : > { %5387 = vmatprep.subr.bf16.mxu0 %v5717_v51 }
  0xa6   : > { %5388 = vmatpush3.bf16.msra.mxu0 %v5717_v51 }
  0xa8   : > { %1730 = vmatmul.mubr.bf16.gmra.mrb[56].mxu0 %v5697_v45 }
  0xa9   : > { %1737 = vmatprep.mubr.bf16.mxu0 %v5700_v46 }
  0xb0   : > { %1738 = vmatmul.mubr.bf16.gmra.mrb[60].mxu0 %v5702_v47 }
 0x10b   : > { %v5013_v56 = vpop.f32.mrb[0].mxu0 }
 0x10c   : > { %v5014_v58 = vpop.f32.mrb[1].mxu0 }
 0x10d   : > { %v5015_v59 = vadd.f32 %v5014_v58, %v5013_v56  ;;  %v5016_v60 = vpop.f32.mrb[2].mxu0  ;;  %v5077_v61 = vpop.f32.mrb[0].mxu1 }
 0x10e   : > { %v5017_v62 = vpop.f32.mrb[3].mxu0  ;;  %v5078_v1 = vpop.f32.mrb[1].mxu1 }
 0x10f   : > { %v1490_v63 = vadd.f32 %v5015_v59, %v6685_v57  ;;  %v5018_v0 = vadd.f32 %v5017_v62, %v5016_v60  ;;  %v5079_v2 = vadd.f32 %v5078_v1, %v5077_v61  ;;  %v5080_v3 = vpop.f32.mrb[2].mxu1 }
 0x110   : > { %v5081_v5 = vpop.f32.mrb[3].mxu1 }
 0x111   : > { %v1493_v4 = vadd.f32 %v5018_v0, %v6685_v57  ;;  %v6695_v8 = vadd.f32 %v5079_v2, %v1490_v63  ;;  %v5082_v9 = vadd.f32 %v5081_v5, %v5080_v3 }
 0x113   : > { %v5019_v10 = vpop.f32.mrb[4].mxu0  ;;  %v6697_v11 = vadd.f32 %v5082_v9, %v1493_v4 }
 0x114   : > { %v5020_v12 = vpop.f32.mrb[5].mxu0 }
 0x115   : > { %v5021_v13 = vadd.f32 %v5020_v12, %v5019_v10  ;;  %v5022_v14 = vpop.f32.mrb[6].mxu0  ;;  %v5083_v16 = vpop.f32.mrb[4].mxu1 }
 0x116   : > { %v5023_v17 = vpop.f32.mrb[7].mxu0  ;;  %v5084_v20 = vpop.f32.mrb[5].mxu1 }
 0x117   : > { %v1498_v18 = vadd.f32 %v5021_v13, %v6685_v57  ;;  %v5024_v19 = vadd.f32 %v5023_v17, %v5022_v14  ;;  %v5085_v21 = vadd.f32 %v5084_v20, %v5083_v16  ;;  %v5086_v22 = vpop.f32.mrb[6].mxu1 }
 0x118   : > { %v5087_v24 = vpop.f32.mrb[7].mxu1 }
 0x119   : > { %v1501_v23 = vadd.f32 %v5024_v19, %v6685_v57  ;;  %v6707_v26 = vadd.f32 %v5085_v21, %v1498_v18  ;;  %v5088_v27 = vadd.f32 %v5087_v24, %v5086_v22 }
 0x11b   : > { %v5025_v28 = vpop.f32.mrb[8].mxu0  ;;  %v6709_v29 = vadd.f32 %v5088_v27, %v1501_v23 }
 0x11c   : > { %v5026_v30 = vpop.f32.mrb[9].mxu0 }
 0x11d   : > { %v5027_v31 = vadd.f32 %v5026_v30, %v5025_v28  ;;  %v5028_v32 = vpop.f32.mrb[10].mxu0  ;;  %v5089_v34 = vpop.f32.mrb[8].mxu1 }
 0x11e   : > { %v5029_v35 = vpop.f32.mrb[11].mxu0  ;;  %v5090_v38 = vpop.f32.mrb[9].mxu1 }
 0x11f   : > { %v1506_v36 = vadd.f32 %v5027_v31, %v6685_v57  ;;  %v5030_v37 = vadd.f32 %v5029_v35, %v5028_v32  ;;  %v5091_v39 = vadd.f32 %v5090_v38, %v5089_v34  ;;  %v5092_v40 = vpop.f32.mrb[10].mxu1 }
 0x120   : > { %v5093_v42 = vpop.f32.mrb[11].mxu1 }
 0x121   : > { %v1509_v41 = vadd.f32 %v5030_v37, %v6685_v57  ;;  %v6719_v44 = vadd.f32 %v5091_v39, %v1506_v36  ;;  %v5094_v45 = vadd.f32 %v5093_v42, %v5092_v40 }
 0x123   : > { %v5031_v46 = vpop.f32.mrb[12].mxu0  ;;  %v6721_v47 = vadd.f32 %v5094_v45, %v1509_v41 }
 0x124   : > { %v5032_v48 = vpop.f32.mrb[13].mxu0 }
 0x125   : > { %v5033_v49 = vadd.f32 %v5032_v48, %v5031_v46  ;;  %v5034_v50 = vpop.f32.mrb[14].mxu0  ;;  %v5095_v52 = vpop.f32.mrb[12].mxu1 }
 0x126   : > { %v5035_v53 = vpop.f32.mrb[15].mxu0  ;;  %v5096_v56 = vpop.f32.mrb[13].mxu1 }
 0x127   : > { %v1514_v54 = vadd.f32 %v5033_v49, %v6685_v57  ;;  %v5036_v55 = vadd.f32 %v5035_v53, %v5034_v50  ;;  %v5097_v58 = vadd.f32 %v5096_v56, %v5095_v52  ;;  %v5098_v59 = vpop.f32.mrb[14].mxu1 }
 0x128   : > { %v5099_v61 = vpop.f32.mrb[15].mxu1 }
 0x129   : > { %v1517_v60 = vadd.f32 %v5036_v55, %v6685_v57  ;;  %v6728_v62 = vadd.f32 %v5097_v58, %v1514_v54  ;;  %v5100_v63 = vadd.f32 %v5099_v61, %v5098_v59 }
 0x12b   : > { %v5037_v0 = vpop.f32.mrb[16].mxu0  ;;  %v6730_v1 = vadd.f32 %v5100_v63, %v1517_v60 }
 0x12c   : > { %v5038_v2 = vpop.f32.mrb[17].mxu0 }
 0x12d   : > { %v5039_v3 = vadd.f32 %v5038_v2, %v5037_v0  ;;  %v5040_v4 = vpop.f32.mrb[18].mxu0  ;;  %v5101_v5 = vpop.f32.mrb[16].mxu1 }
 0x12e   : > { %v5041_v6 = vpop.f32.mrb[19].mxu0  ;;  %v5102_v10 = vpop.f32.mrb[17].mxu1 }
 0x12f   : > { %v1522_v7 = vadd.f32 %v5039_v3, %v6685_v57  ;;  %v5042_v9 = vadd.f32 %v5041_v6, %v5040_v4  ;;  %v5103_v12 = vadd.f32 %v5102_v10, %v5101_v5  ;;  %v5104_v13 = vpop.f32.mrb[18].mxu1 }
 0x130   : > { %v5105_v15 = vpop.f32.mrb[19].mxu1 }
 0x131   : > { %v1525_v14 = vadd.f32 %v5042_v9, %v6685_v57  ;;  %v6734_v16 = vadd.f32 %v5103_v12, %v1522_v7  ;;  %v5106_v17 = vadd.f32 %v5105_v15, %v5104_v13 }
 0x133   : > { %v5043_v18 = vpop.f32.mrb[20].mxu0  ;;  %v6736_v19 = vadd.f32 %v5106_v17, %v1525_v14 }
 0x134   : > { %v5044_v20 = vpop.f32.mrb[21].mxu0 }
 0x135   : > { %v5045_v21 = vadd.f32 %v5044_v20, %v5043_v18  ;;  %v5046_v22 = vpop.f32.mrb[22].mxu0  ;;  %v5107_v23 = vpop.f32.mrb[20].mxu1 }
 0x136   : > { %v5047_v24 = vpop.f32.mrb[23].mxu0  ;;  %v5108_v28 = vpop.f32.mrb[21].mxu1 }
 0x137   : > { %v1530_v25 = vadd.f32 %v5045_v21, %v6685_v57  ;;  %v5048_v27 = vadd.f32 %v5047_v24, %v5046_v22  ;;  %v5109_v30 = vadd.f32 %v5108_v28, %v5107_v23  ;;  %v5110_v31 = vpop.f32.mrb[22].mxu1 }
 0x138   : > { %v5111_v33 = vpop.f32.mrb[23].mxu1 }
 0x139   : > { %v1533_v32 = vadd.f32 %v5048_v27, %v6685_v57  ;;  %v6740_v34 = vadd.f32 %v5109_v30, %v1530_v25  ;;  %v5112_v35 = vadd.f32 %v5111_v33, %v5110_v31 }
 0x13b   : > { %v5049_v36 = vpop.f32.mrb[24].mxu0  ;;  %v6742_v37 = vadd.f32 %v5112_v35, %v1533_v32 }
 0x13c   : > { %v5050_v38 = vpop.f32.mrb[25].mxu0 }
 0x13d   : > { %v5051_v39 = vadd.f32 %v5050_v38, %v5049_v36  ;;  %v5052_v40 = vpop.f32.mrb[26].mxu0  ;;  %v5113_v41 = vpop.f32.mrb[24].mxu1 }
 0x13e   : > { %v5053_v42 = vpop.f32.mrb[27].mxu0  ;;  %v5114_v46 = vpop.f32.mrb[25].mxu1 }
 0x13f   : > { %v1538_v43 = vadd.f32 %v5051_v39, %v6685_v57  ;;  %v5054_v45 = vadd.f32 %v5053_v42, %v5052_v40  ;;  %v5115_v48 = vadd.f32 %v5114_v46, %v5113_v41  ;;  %v5116_v49 = vpop.f32.mrb[26].mxu1 }
 0x140   : > { %v5117_v51 = vpop.f32.mrb[27].mxu1 }
 0x141   : > { %v1541_v50 = vadd.f32 %v5054_v45, %v6685_v57  ;;  %v6746_v52 = vadd.f32 %v5115_v48, %v1538_v43  ;;  %v5118_v53 = vadd.f32 %v5117_v51, %v5116_v49 }
 0x143   : > { %v5055_v54 = vpop.f32.mrb[28].mxu0  ;;  %v6748_v55 = vadd.f32 %v5118_v53, %v1541_v50 }
 0x144   : > { %v5056_v56 = vpop.f32.mrb[29].mxu0 }
 0x145   : > { %v5057_v58 = vadd.f32 %v5056_v56, %v5055_v54  ;;  %v5058_v59 = vpop.f32.mrb[30].mxu0  ;;  %v5119_v60 = vpop.f32.mrb[28].mxu1 }
 0x146   : > { %v5059_v61 = vpop.f32.mrb[31].mxu0  ;;  %v5120_v2 = vpop.f32.mrb[29].mxu1 }
 0x147   : > { %v1546_v63 = vadd.f32 %v5057_v58, %v6685_v57  ;;  %v5060_v0 = vadd.f32 %v5059_v61, %v5058_v59  ;;  %v5121_v3 = vadd.f32 %v5120_v2, %v5119_v60  ;;  %v5122_v4 = vpop.f32.mrb[30].mxu1 }
 0x148   : > { %v5123_v6 = vpop.f32.mrb[31].mxu1 }
 0x149   : > { %v1549_v5 = vadd.f32 %v5060_v0, %v6685_v57  ;;  %v6752_v7 = vadd.f32 %v5121_v3, %v1546_v63  ;;  %v5124_v9 = vadd.f32 %v5123_v6, %v5122_v4 }
 0x14b   : > { %v5141_v10 = vpop.f32.mrb[32].mxu0  ;;  %v6754_v12 = vadd.f32 %v5124_v9, %v1549_v5 }
 0x14c   : > { %v5142_v13 = vpop.f32.mrb[33].mxu0 }
 0x14d   : > { %v5143_v14 = vadd.f32 %v5142_v13, %v5141_v10  ;;  %v5144_v15 = vpop.f32.mrb[34].mxu0  ;;  %v5329_v18 = vpop.f32.mrb[32].mxu1 }
 0x14e   : > { %v5145_v17 = vpop.f32.mrb[35].mxu0  ;;  %v1780_v22 = vpop.f32.mrb[33].mxu1 }
 0x14f   : > { %v5146_v20 = vadd.f32 %v5145_v17, %v5144_v15  ;;  %v1684_v21 = vadd.f32 %v5143_v14, %v6695_v8  ;;  %v5330_v23 = vpop.f32.mrb[34].mxu1 }
 0x150   : > { %v1783_v25 = vpop.f32.mrb[35].mxu1 }
 0x151   : > { %v1781_v24 = vadd.f32 %v1780_v22, %v1684_v21  ;;  %v1687_v57 = vadd.f32 %v5146_v20, %v6697_v11 }
 0x153   : > { %v1784_v27 = vadd.f32 %v1783_v25, %v1687_v57  ;;  %v5147_v28 = vpop.f32.mrb[36].mxu0  ;;  %v1843_v31 = vmax.f32 %v1781_v24, 0.0 }
 0x154   : > { %v5148_v30 = vpop.f32.mrb[37].mxu0 }
 0x155   : > { %v1844_v32 = vmax.f32 %v1784_v27, 0.0  ;;  %v5149_v33 = vadd.f32 %v5148_v30, %v5147_v28  ;;  %v5150_v35 = vpop.f32.mrb[38].mxu0  ;;  %v5333_v38 = vpop.f32.mrb[36].mxu1 }
 0x156   : > { %v5151_v36 = vpop.f32.mrb[39].mxu0  ;;  %v1796_v8 = vpop.f32.mrb[37].mxu1 }
 0x157   : > { %v1859_v39 = vpack.c.bf16 %v1844_v32, %v1843_v31  ;;  %v1692_v40 = vadd.f32 %v5149_v33, %v6707_v26  ;;  %v5152_v41 = vadd.f32 %v5151_v36, %v5150_v35  ;;  %v5334_v42 = vpop.f32.mrb[38].mxu1 }
 0x158   : > { %v1799_v11 = vpop.f32.mrb[39].mxu1 }
 0x159   : > { %v1789_v43 = vadd.f32 %v5329_v18, %v1692_v40  ;;  %v1695_v45 = vadd.f32 %v5152_v41, %v6709_v29  ;;  %5359 = vmatprep.mubr.bf16.mxu1 %v1859_v39 }
 0x15b   : > { %v1792_v46 = vadd.f32 %v5330_v23, %v1695_v45  ;;  %v5153_v48 = vpop.f32.mrb[40].mxu0  ;;  %v1845_v50 = vmax.f32 %v1789_v43, 0.0 }
 0x15c   : > { %v5154_v49 = vpop.f32.mrb[41].mxu0 }
 0x15d   : > { %v1846_v51 = vmax.f32 %v1792_v46, 0.0  ;;  %v5155_v53 = vadd.f32 %v5154_v49, %v5153_v48  ;;  %v5156_v54 = vpop.f32.mrb[42].mxu0  ;;  %v5337_v58 = vpop.f32.mrb[40].mxu1 }
 0x15e   : > { %v5157_v56 = vpop.f32.mrb[43].mxu0  ;;  %v1812_v61 = vpop.f32.mrb[41].mxu1 }
 0x15f   : > { %v1860_v59 = vpack.c.bf16 %v1846_v51, %v1845_v50  ;;  %v5158_v60 = vadd.f32 %v5157_v56, %v5156_v54  ;;  %v1700_v26 = vadd.f32 %v5155_v53, %v6719_v44  ;;  %v5338_v63 = vpop.f32.mrb[42].mxu1 }
 0x160   : > { %v1815_v2 = vpop.f32.mrb[43].mxu1 }
 0x161   : > { %v1797_v0 = vadd.f32 %v1796_v8, %v1700_v26  ;;  %5360 = vmatmul.mubr.bf16.vlgmr.msra.gmra.mrb[48].mxu1 %v1860_v59  ;;  %v1703_v29 = vadd.f32 %v5158_v60, %v6721_v47 }
 0x163   : > { %v1800_v3 = vadd.f32 %v1799_v11, %v1703_v29  ;;  %v5159_v4 = vpop.f32.mrb[44].mxu0  ;;  %v1847_v6 = vmax.f32 %v1797_v0, 0.0 }
 0x164   : > { %v5160_v5 = vpop.f32.mrb[45].mxu0 }
 0x165   : > { %v1848_v9 = vmax.f32 %v1800_v3, 0.0  ;;  %v5161_v10 = vadd.f32 %v5160_v5, %v5159_v4  ;;  %v5162_v13 = vpop.f32.mrb[46].mxu0  ;;  %v6762_v15 = vpop.f32.mrb[44].mxu1 }
 0x166   : > { %v5163_v14 = vpop.f32.mrb[47].mxu0  ;;  %v1828_v20 = vpop.f32.mrb[45].mxu1 }
 0x167   : > { %v1861_v17 = vpack.c.bf16 %v1848_v9, %v1847_v6  ;;  %v1708_v44 = vadd.f32 %v5161_v10, %v6728_v62  ;;  %v5164_v18 = vadd.f32 %v5163_v14, %v5162_v13  ;;  %v5342_v21 = vpop.f32.mrb[46].mxu1 }
 0x168   : > { %v1831_v23 = vpop.f32.mrb[47].mxu1 }
 0x169   : > { %v1805_v22 = vadd.f32 %v5333_v38, %v1708_v44  ;;  %v1711_v47 = vadd.f32 %v5164_v18, %v6730_v1  ;;  %5363 = vmatprep.mubr.bf16.mxu1 %v1861_v17 }
 0x16b   : > { %v1808_v24 = vadd.f32 %v5334_v42, %v1711_v47  ;;  %v5165_v57 = vpop.f32.mrb[48].mxu0  ;;  %v1849_v27 = vmax.f32 %v1805_v22, 0.0  ;;  %v5723_v22 = vld [vmem:[%s7850_s8 + $0x20] sm:$0xff]   ;;  %v5724_v47 = vld [vmem:[%s7850_s8 + $0x28] sm:$0xff]  }
 0x16c   : > { %v5166_v25 = vpop.f32.mrb[49].mxu0 }
 0x16d   : > { %v1850_v28 = vmax.f32 %v1808_v24, 0.0  ;;  %v5167_v30 = vadd.f32 %v5166_v25, %v5165_v57  ;;  %v5168_v31 = vpop.f32.mrb[50].mxu0 }
 0x16e   : > { %v5169_v32 = vpop.f32.mrb[51].mxu0 }
 0x16f   : > { %v5170_v33 = vadd.f32 %v5169_v32, %v5168_v31  ;;  %v1716_v35 = vadd.f32 %v5167_v30, %v6734_v16  ;;  %v1862_v62 = vpack.c.bf16 %v1850_v28, %v1849_v27 }
 0x171   : > { %v1813_v36 = vadd.f32 %v1812_v61, %v1716_v35  ;;  %5364 = vmatmul.mubr.bf16.gmra.mrb[52].mxu1 %v1862_v62  ;;  %v1719_v38 = vadd.f32 %v5170_v33, %v6736_v19 }
 0x173   : > { %v1816_v39 = vadd.f32 %v1815_v2, %v1719_v38  ;;  %v5171_v1 = vpop.f32.mrb[52].mxu0  ;;  %v1851_v41 = vmax.f32 %v1813_v36, 0.0 }
 0x174   : > { %v5172_v40 = vpop.f32.mrb[53].mxu0 }
 0x175   : > { %v1852_v8 = vmax.f32 %v1816_v39, 0.0  ;;  %v5173_v42 = vadd.f32 %v5172_v40, %v5171_v1  ;;  %v5174_v43 = vpop.f32.mrb[54].mxu0 }
 0x176   : > { %v5175_v45 = vpop.f32.mrb[55].mxu0 }
 0x177   : > { %v1863_v11 = vpack.c.bf16 %v1852_v8, %v1851_v41  ;;  %v1724_v46 = vadd.f32 %v5173_v42, %v6740_v34  ;;  %v5176_v48 = vadd.f32 %v5175_v45, %v5174_v43 }
 0x179   : > { %v1821_v49 = vadd.f32 %v5337_v58, %v1724_v46  ;;  %v1727_v16 = vadd.f32 %v5176_v48, %v6742_v37  ;;  %5367 = vmatprep.mubr.bf16.mxu1 %v1863_v11 }
 0x17b   : > { %v1824_v50 = vadd.f32 %v5338_v63, %v1727_v16  ;;  %v5177_v51 = vpop.f32.mrb[56].mxu0  ;;  %v1853_v19 = vmax.f32 %v1821_v49, 0.0 }
 0x17c   : > { %v5178_v53 = vpop.f32.mrb[57].mxu0 }
 0x17d   : > { %v1854_v54 = vmax.f32 %v1824_v50, 0.0  ;;  %v5179_v56 = vadd.f32 %v5178_v53, %v5177_v51  ;;  %v5180_v59 = vpop.f32.mrb[58].mxu0 }
 0x17e   : > { %v5181_v60 = vpop.f32.mrb[59].mxu0 }
 0x17f   : > { %v5182_v26 = vadd.f32 %v5181_v60, %v5180_v59  ;;  %v1732_v61 = vadd.f32 %v5179_v56, %v6746_v52  ;;  %v1864_v0 = vpack.c.bf16 %v1854_v54, %v1853_v19 }
 0x181   : > { %v1829_v29 = vadd.f32 %v1828_v20, %v1732_v61  ;;  %5368 = vmatmul.mubr.bf16.gmra.mrb[56].mxu1 %v1864_v0  ;;  %v1735_v34 = vadd.f32 %v5182_v26, %v6748_v55  ;;  %v5718_v20 = vld [vmem:[%s7848_s6 + $0x38] sm:$0xff]  }
 0x182   : > { %5389 = vmatprep.subr.bf16.mxu0 %v5718_v20 }
 0x183   : > { %v1832_v58 = vadd.f32 %v1831_v23, %v1735_v34  ;;  %v5183_v2 = vpop.f32.mrb[60].mxu0  ;;  %v1855_v3 = vmax.f32 %v1829_v29, 0.0  ;;  %5390 = vmatpush3.bf16.msra.mxu0 %v5718_v20  ;;  %v4883_v23 = vld [vmem:[%s7847_s5] ss:$0 sm:$0xff]  ;;  %v5725_v20 = vld [vmem:[%s7850_s8 + $0x30] sm:$0xff]  }
 0x184   : > { %v5184_v37 = vpop.f32.mrb[61].mxu0 }
 0x185   : > { %v1856_v63 = vmax.f32 %v1832_v58, 0.0  ;;  %v5185_v4 = vadd.f32 %v5184_v37, %v5183_v2  ;;  %v5186_v5 = vpop.f32.mrb[62].mxu0 }
 0x186   : > { %v5187_v6 = vpop.f32.mrb[63].mxu0 }
 0x187   : > { %v1865_v9 = vpack.c.bf16 %v1856_v63, %v1855_v3  ;;  %v1740_v10 = vadd.f32 %v5185_v4, %v6752_v7  ;;  %v5188_v13 = vadd.f32 %v5187_v6, %v5186_v5  ;;  %v5719_v7 = vld [vmem:[%s7850_s8] sm:$0xff]  }
 0x188   : > { %5407 = vmatprep.subr.bf16.mxu1 %v5719_v7 }
 0x189   : > { %v1837_v14 = vadd.f32 %v6762_v15, %v1740_v10  ;;  %v1743_v52 = vadd.f32 %v5188_v13, %v6754_v12  ;;  %5371 = vmatprep.mubr.bf16.mxu1 %v1865_v9  ;;  %v5720_v12 = vld [vmem:[%s7850_s8 + $0x8] sm:$0xff]   ;;  %5408 = vmatpush3.bf16.msra.mxu1 %v5719_v7  ;;  %v5721_v15 = vld [vmem:[%s7850_s8 + $0x10] sm:$0xff]   ;;  %v5726_v7 = vld [vmem:[%s7850_s8 + $0x38] sm:$0xff]  }
 0x18a   : > { %5409 = vmatprep.subr.bf16.mxu1 %v5720_v12 }
 0x18b   : > { %v1840_v17 = vadd.f32 %v5342_v21, %v1743_v52  ;;  %v1857_v44 = vmax.f32 %v1837_v14, 0.0  ;;  %v5722_v21 = vld [vmem:[%s7850_s8 + $0x18] sm:$0xff]  }
 0x18d   : > { %v1858_v55 = vmax.f32 %v1840_v17, 0.0  ;;  %5410 = vmatpush3.bf16.msra.mxu1 %v5720_v12  ;;  %v4892_v12 = vld [vmem:[%s7849_s7] ss:$0 sm:$0xff] }
 0x18e   : > { %5411 = vmatprep.subr.bf16.mxu1 %v5721_v15 }
 0x18f   : > { %v1866_v18 = vpack.c.bf16 %v1858_v55, %v1857_v44 }
 0x191   : > { %5372 = vmatmul.mubr.bf16.gmra.mrb[60].mxu1 %v1866_v18 }
 0x192   : > { %5412 = vmatpush3.bf16.msra.mxu1 %v5721_v15 }
 0x193   : > { %5413 = vmatprep.subr.bf16.mxu1 %v5722_v21 }
 0x196   : > { %5414 = vmatpush3.bf16.msra.mxu1 %v5722_v21 }
 0x197   : > { %5415 = vmatprep.subr.bf16.mxu1 %v5723_v22 }
 0x19a   : > { %5416 = vmatpush3.bf16.msra.mxu1 %v5723_v22 }
 0x19b   : > { %5417 = vmatprep.subr.bf16.mxu1 %v5724_v47 }
 0x19e   : > { %5418 = vmatpush3.bf16.msra.mxu1 %v5724_v47 }
 0x19f   : > { %5419 = vmatprep.subr.bf16.mxu1 %v5725_v20 }
 0x1a2   : > { %5420 = vmatpush3.bf16.msra.mxu1 %v5725_v20 }
 0x1a3   : > { %5421 = vmatprep.subr.bf16.mxu1 %v5726_v7 }
 0x1a6   : > { %5422 = vmatpush3.bf16.msra.mxu1 %v5726_v7 }
 0x234   : > { %v5361_v24 = vpop.f32.mrb[48].mxu1 }
 0x235   : > { %v1981_v57 = vadd.f32 %v5361_v24, %v4883_v23  ;;  %v1972_v25 = vpop.f32.mrb[49].mxu1 }
 0x236   : > { %v1973_v27 = vadd.f32 %v4883_v23, %v1972_v25  ;;  %v5362_v28 = vpop.f32.mrb[50].mxu1 }
 0x237   : > { %v1984_v30 = vadd.f32 %v5362_v28, %v4883_v23  ;;  %v1975_v31 = vpop.f32.mrb[51].mxu1  ;;  %v2037_v33 = vmax.f32 %v1981_v57, 0.0 }
 0x238   : > { %v1976_v32 = vadd.f32 %v4883_v23, %v1975_v31  ;;  %v2035_v62 = vmax.f32 %v1973_v27, 0.0 }
 0x239   : > { %v2038_v35 = vmax.f32 %v1984_v30, 0.0 }
 0x23a   : > { %v2036_v36 = vmax.f32 %v1976_v32, 0.0 }
 0x23b   : > { %v2052_v38 = vpack.c.bf16 %v2038_v35, %v2037_v33 }
 0x23c   : > { %v2051_v39 = vpack.c.bf16 %v2036_v36, %v2035_v62 }
 0x23e   : > { %5391 = vmatprep.mubr.bf16.mxu0 %v2051_v39 }
 0x23f   : > { %5392 = vmatmul.mubr.bf16.vlgmr.msra.gmra.mrb[64].mxu0 %v2052_v38 }
 0x244   : > { %v5365_v1 = vpop.f32.mrb[52].mxu1 }
 0x245   : > { %v1997_v40 = vadd.f32 %v5365_v1, %v4883_v23  ;;  %v1988_v41 = vpop.f32.mrb[53].mxu1 }
 0x246   : > { %v1989_v8 = vadd.f32 %v4883_v23, %v1988_v41  ;;  %v5366_v42 = vpop.f32.mrb[54].mxu1 }
 0x247   : > { %v2000_v43 = vadd.f32 %v5366_v42, %v4883_v23  ;;  %v1991_v45 = vpop.f32.mrb[55].mxu1  ;;  %v2041_v46 = vmax.f32 %v1997_v40, 0.0 }
 0x248   : > { %v1992_v11 = vadd.f32 %v4883_v23, %v1991_v45  ;;  %v2039_v49 = vmax.f32 %v1989_v8, 0.0 }
 0x249   : > { %v2042_v48 = vmax.f32 %v2000_v43, 0.0 }
 0x24a   : > { %v2040_v16 = vmax.f32 %v1992_v11, 0.0 }
 0x24b   : > { %v2054_v50 = vpack.c.bf16 %v2042_v48, %v2041_v46 }
 0x24c   : > { %v2053_v51 = vpack.c.bf16 %v2040_v16, %v2039_v49 }
 0x24e   : > { %5395 = vmatprep.mubr.bf16.mxu0 %v2053_v51 }
 0x24f   : > { %5396 = vmatmul.mubr.bf16.gmra.mrb[68].mxu0 %v2054_v50 }
 0x254   : > { %v5369_v53 = vpop.f32.mrb[56].mxu1 }
 0x255   : > { %v2013_v19 = vadd.f32 %v5369_v53, %v4883_v23  ;;  %v2004_v54 = vpop.f32.mrb[57].mxu1 }
 0x256   : > { %v2005_v56 = vadd.f32 %v4883_v23, %v2004_v54  ;;  %v5370_v59 = vpop.f32.mrb[58].mxu1 }
 0x257   : > { %v2016_v60 = vadd.f32 %v5370_v59, %v4883_v23  ;;  %v2007_v26 = vpop.f32.mrb[59].mxu1  ;;  %v2045_v0 = vmax.f32 %v2013_v19, 0.0 }
 0x258   : > { %v2008_v61 = vadd.f32 %v4883_v23, %v2007_v26  ;;  %v2043_v34 = vmax.f32 %v2005_v56, 0.0 }
 0x259   : > { %v2046_v29 = vmax.f32 %v2016_v60, 0.0 }
 0x25a   : > { %v2044_v58 = vmax.f32 %v2008_v61, 0.0 }
 0x25b   : > { %v2056_v2 = vpack.c.bf16 %v2046_v29, %v2045_v0 }
 0x25c   : > { %v2055_v37 = vpack.c.bf16 %v2044_v58, %v2043_v34 }
 0x25e   : > { %5399 = vmatprep.mubr.bf16.mxu0 %v2055_v37 }
 0x25f   : > { %5400 = vmatmul.mubr.bf16.gmra.mrb[72].mxu0 %v2056_v2 }
 0x264   : > { %v5373_v3 = vpop.f32.mrb[60].mxu1 }
 0x265   : > { %v2029_v63 = vadd.f32 %v5373_v3, %v4883_v23  ;;  %v2020_v4 = vpop.f32.mrb[61].mxu1 }
 0x266   : > { %v2021_v5 = vadd.f32 %v4883_v23, %v2020_v4  ;;  %v5374_v6 = vpop.f32.mrb[62].mxu1 }
 0x267   : > { %v2032_v9 = vadd.f32 %v5374_v6, %v4883_v23  ;;  %v2023_v10 = vpop.f32.mrb[63].mxu1  ;;  %v2049_v14 = vmax.f32 %v2029_v63, 0.0 }
 0x268   : > { %v2024_v13 = vadd.f32 %v4883_v23, %v2023_v10  ;;  %v2047_v17 = vmax.f32 %v2021_v5, 0.0 }
 0x269   : > { %v2050_v52 = vmax.f32 %v2032_v9, 0.0 }
 0x26a   : > { %v2048_v44 = vmax.f32 %v2024_v13, 0.0 }
 0x26b   : > { %v2058_v55 = vpack.c.bf16 %v2050_v52, %v2049_v14  ;;  %v5727_v52 = vld [vmem:[%s7852_s10] sm:$0xff]  }
 0x26c   : > { %v2057_v18 = vpack.c.bf16 %v2048_v44, %v2047_v17  ;;  %v5728_v17 = vld [vmem:[%s7852_s10 + $0x8] sm:$0xff]   ;;  %5439 = vmatprep.subr.bf16.mxu0 %v5727_v52  ;;  %v6818_v44 = vld [vmem:[%s7851_s9] ss:$0 sm:$0xff] }
 0x26d   : > { %5440 = vmatpush3.bf16.msra.mxu0 %v5727_v52 }
 0x26e   : > { %5403 = vmatprep.mubr.bf16.mxu0 %v2057_v18  ;;  %5441 = vmatprep.subr.bf16.mxu0 %v5728_v17 }
 0x26f   : > { %5404 = vmatmul.mubr.bf16.gmra.mrb[76].mxu0 %v2058_v55 }
 0x271   : > { %5442 = vmatpush3.bf16.msra.mxu0 %v5728_v17 }
 0x312   : > { %v5393_v15 = vpop.f32.mrb[64].mxu0 }
 0x313   : > { %v2173_v21 = vadd.f32 %v5393_v15, %v4892_v12  ;;  %v2164_v22 = vpop.f32.mrb[65].mxu0 }
 0x314   : > { %v2165_v47 = vadd.f32 %v4892_v12, %v2164_v22  ;;  %v5394_v23 = vpop.f32.mrb[66].mxu0 }
 0x315   : > { %v2176_v24 = vadd.f32 %v5394_v23, %v4892_v12  ;;  %v2167_v57 = vpop.f32.mrb[67].mxu0  ;;  %v2229_v27 = vmax.f32 %v2173_v21, 0.0 }
 0x316   : > { %v2168_v25 = vadd.f32 %v4892_v12, %v2167_v57  ;;  %v2227_v30 = vmax.f32 %v2165_v47, 0.0 }
 0x317   : > { %v2230_v28 = vmax.f32 %v2176_v24, 0.0 }
 0x318   : > { %v2228_v31 = vmax.f32 %v2168_v25, 0.0 }
 0x319   : > { %v2244_v32 = vpack.c.bf16 %v2230_v28, %v2229_v27 }
 0x31a   : > { %v2243_v33 = vpack.c.bf16 %v2228_v31, %v2227_v30 }
 0x31c   : > { %5423 = vmatprep.mubr.bf16.mxu1 %v2243_v33 }
 0x31d   : > { %5424 = vmatmul.mubr.bf16.vlgmr.msra.gmra.mrb[64].mxu1 %v2244_v32 }
 0x322   : > { %v5397_v35 = vpop.f32.mrb[68].mxu0 }
 0x323   : > { %v2189_v62 = vadd.f32 %v5397_v35, %v4892_v12  ;;  %v2180_v36 = vpop.f32.mrb[69].mxu0 }
 0x324   : > { %v2181_v38 = vadd.f32 %v4892_v12, %v2180_v36  ;;  %v5398_v39 = vpop.f32.mrb[70].mxu0 }
 0x325   : > { %v2192_v1 = vadd.f32 %v5398_v39, %v4892_v12  ;;  %v2183_v40 = vpop.f32.mrb[71].mxu0  ;;  %v2233_v8 = vmax.f32 %v2189_v62, 0.0 }
 0x326   : > { %v2184_v41 = vadd.f32 %v4892_v12, %v2183_v40  ;;  %v2231_v43 = vmax.f32 %v2181_v38, 0.0 }
 0x327   : > { %v2234_v42 = vmax.f32 %v2192_v1, 0.0 }
 0x328   : > { %v2232_v45 = vmax.f32 %v2184_v41, 0.0 }
 0x329   : > { %v2246_v11 = vpack.c.bf16 %v2234_v42, %v2233_v8 }
 0x32a   : > { %v2245_v46 = vpack.c.bf16 %v2232_v45, %v2231_v43 }
 0x32c   : > { %5427 = vmatprep.mubr.bf16.mxu1 %v2245_v46 }
 0x32d   : > { %5428 = vmatmul.mubr.bf16.gmra.mrb[68].mxu1 %v2246_v11 }
 0x332   : > { %v5401_v48 = vpop.f32.mrb[72].mxu0 }
 0x333   : > { %v2205_v49 = vadd.f32 %v5401_v48, %v4892_v12  ;;  %v2196_v16 = vpop.f32.mrb[73].mxu0 }
 0x334   : > { %v2197_v50 = vadd.f32 %v4892_v12, %v2196_v16  ;;  %v5402_v51 = vpop.f32.mrb[74].mxu0 }
 0x335   : > { %v2208_v53 = vadd.f32 %v5402_v51, %v4892_v12  ;;  %v2199_v19 = vpop.f32.mrb[75].mxu0  ;;  %v2237_v56 = vmax.f32 %v2205_v49, 0.0 }
 0x336   : > { %v2200_v54 = vadd.f32 %v4892_v12, %v2199_v19  ;;  %v2235_v60 = vmax.f32 %v2197_v50, 0.0 }
 0x337   : > { %v2238_v59 = vmax.f32 %v2208_v53, 0.0 }
 0x338   : > { %v2236_v26 = vmax.f32 %v2200_v54, 0.0 }
 0x339   : > { %v2248_v61 = vpack.c.bf16 %v2238_v59, %v2237_v56 }
 0x33a   : > { %v2247_v0 = vpack.c.bf16 %v2236_v26, %v2235_v60 }
 0x33c   : > { %5431 = vmatprep.mubr.bf16.mxu1 %v2247_v0 }
 0x33d   : > { %5432 = vmatmul.mubr.bf16.gmra.mrb[72].mxu1 %v2248_v61 }
 0x342   : > { %v5405_v29 = vpop.f32.mrb[76].mxu0 }
 0x343   : > { %v2221_v34 = vadd.f32 %v5405_v29, %v4892_v12  ;;  %v2212_v58 = vpop.f32.mrb[77].mxu0 }
 0x344   : > { %v2213_v2 = vadd.f32 %v4892_v12, %v2212_v58  ;;  %v5406_v37 = vpop.f32.mrb[78].mxu0 }
 0x345   : > { %v2224_v3 = vadd.f32 %v5406_v37, %v4892_v12  ;;  %v2215_v63 = vpop.f32.mrb[79].mxu0  ;;  %v2241_v5 = vmax.f32 %v2221_v34, 0.0 }
 0x346   : > { %v2216_v4 = vadd.f32 %v4892_v12, %v2215_v63  ;;  %v2239_v9 = vmax.f32 %v2213_v2, 0.0 }
 0x347   : > { %v2242_v6 = vmax.f32 %v2224_v3, 0.0 }
 0x348   : > { %v2240_v10 = vmax.f32 %v2216_v4, 0.0 }
 0x349   : > { %v2250_v13 = vpack.c.bf16 %v2242_v6, %v2241_v5 }
 0x34a   : > { %v2249_v14 = vpack.c.bf16 %v2240_v10, %v2239_v9 }
 0x34c   : > { %5435 = vmatprep.mubr.bf16.mxu1 %v2249_v14 }
 0x34d   : > { %5436 = vmatmul.mubr.bf16.gmra.mrb[76].mxu1 %v2250_v13 }
 0x3f0   : > { %v5425_v55 = vpop.f32.mrb[64].mxu1 }
 0x3f1   : > { %v6828_v18 = vadd.f32 %v5425_v55, %v6818_v44  ;;  %v2356_v20 = vpop.f32.mrb[65].mxu1 }
 0x3f2   : > { %v6831_v7 = vadd.f32 %v6818_v44, %v2356_v20  ;;  %v5426_v12 = vpop.f32.mrb[66].mxu1 }
 0x3f3   : > { %v2421_v15 = vmul.f32 0.5, %v6828_v18  ;;  %4639 = vst [vmem:[%s6825_s26 + $0x10] sm:$0xff] %v6828_v18  ;;  %v6837_v21 = vadd.f32 %v5426_v12, %v6818_v44  ;;  %v2359_v22 = vpop.f32.mrb[67].mxu1 }
 0x3f4   : > { %v2419_v47 = vmul.f32 0.5, %v6831_v7  ;;  %4637 = vst [vmem:[%s6825_s26] sm:$0xff] %v6831_v7  ;;  %v6843_v23 = vadd.f32 %v6818_v44, %v2359_v22 }
 0x3f5   : > { %v2439_v24 = vmul.f32 1.442695, %v2421_v15  ;;  %v2422_v57 = vmul.f32 0.5, %v6837_v21  ;;  %4640 = vst [vmem:[%s6825_s26 + $0x18] sm:$0xff] %v6837_v21 }
 0x3f6   : > { %v2435_v25 = vmul.f32 1.442695, %v2419_v47  ;;  %v2420_v27 = vmul.f32 0.5, %v6843_v23  ;;  %4638 = vst [vmem:[%s6825_s26 + $0x8] sm:$0xff] %v6843_v23 }
 0x3f7   : > { %5825 = vpow2.f32 %v2439_v24  ;;  %v2441_v28 = vmul.f32 1.442695, %v2422_v57 }
 0x3f8   : > { %5827 = vpow2.f32 %v2435_v25  ;;  %v2437_v30 = vmul.f32 1.442695, %v2420_v27 }
 0x3f9   : > { %5829 = vpow2.f32 %v2441_v28 }
 0x3fa   : > { %5831 = vpow2.f32 %v2437_v30 }
 0x400   : > { %v5429_v31 = vpop.f32.mrb[68].mxu1 }
 0x401   : > { %v5826_v32 = vpop.eup %5825  ;;  %v6852_v33 = vadd.f32 %v5429_v31, %v6818_v44  ;;  %v2372_v35 = vpop.f32.mrb[69].mxu1 }
 0x402   : > { %v5828_v62 = vpop.eup %5827  ;;  %v6855_v36 = vadd.f32 %v6818_v44, %v2372_v35  ;;  %2503 = vrot.lane.b32.xlu1 %v5826_v32, %s6314_s22  ;;  %v5430_v38 = vpop.f32.mrb[70].mxu1  ;;  %v5729_v32 = vld [vmem:[%s7854_s12] sm:$0xff]   ;;  %v5730_v35 = vld [vmem:[%s7854_s12 + $0x8] sm:$0xff]  }
 0x403   : > { %4643 = vst [vmem:[%s6825_s26 + $0x30] sm:$0xff] %v6852_v33  ;;  %v6861_v39 = vadd.f32 %v5430_v38, %v6818_v44  ;;  %v2375_v1 = vpop.f32.mrb[71].mxu1  ;;  %2499 = vrot.lane.b32.xlu0 %v5828_v62, %s6314_s22  ;;  %v2425_v40 = vmul.f32 0.5, %v6852_v33  ;;  %v5830_v42 = vpop.eup %5829  ;;  %5459 = vmatprep.subr.bf16.mxu1 %v5729_v32 }
 0x404   : > { %v2423_v41 = vmul.f32 0.5, %v6855_v36  ;;  %4641 = vst [vmem:[%s6825_s26 + $0x20] sm:$0xff] %v6855_v36  ;;  %v6869_v8 = vadd.f32 %v6818_v44, %v2375_v1  ;;  %v5832_v43 = vpop.eup %5831  ;;  %5460 = vmatpush3.bf16.msra.mxu1 %v5729_v32  ;;  %v5731_v1 = vld [vmem:[%s7854_s12 + $0x10] sm:$0xff]  }
 0x405   : > { %4644 = vst [vmem:[%s6825_s26 + $0x38] sm:$0xff] %v6861_v39  ;;  %v2426_v11 = vmul.f32 0.5, %v6861_v39  ;;  %v2447_v48 = vmul.f32 1.442695, %v2425_v40  ;;  %5461 = vmatprep.subr.bf16.mxu1 %v5730_v35 }
 0x406   : > { %v2443_v45 = vmul.f32 1.442695, %v2423_v41  ;;  %v2424_v46 = vmul.f32 0.5, %v6869_v8  ;;  %4642 = vst [vmem:[%s6825_s26 + $0x28] sm:$0xff] %v6869_v8  ;;  %2505 = vrot.lane.b32.xlu1 %v5830_v42, %s6314_s22  ;;  %v5732_v41 = vld [vmem:[%s7854_s12 + $0x18] sm:$0xff]   ;;  %v5733_v42 = vld [vmem:[%s7854_s12 + $0x20] sm:$0xff]  }
 0x407   : > { %2501 = vrot.lane.b32.xlu0 %v5832_v43, %s6314_s22  ;;  %v2449_v16 = vmul.f32 1.442695, %v2426_v11  ;;  %v5734_v43 = vld [vmem:[%s7854_s12 + $0x28] sm:$0xff]   ;;  %v2467_v11 = vld [vmem:[%s6962_s20] sm:$0xff] }
 0x408   : > { %5833 = vpow2.f32 %v2443_v45  ;;  %v2445_v49 = vmul.f32 1.442695, %v2424_v46  ;;  %5462 = vmatpush3.bf16.msra.mxu1 %v5730_v35 }
 0x409   : > { %5463 = vmatprep.subr.bf16.mxu1 %v5731_v1 }
 0x40a   : > { %5835 = vpow2.f32 %v2445_v49  ;;  %v2470_v49 = vld [vmem:[%s6962_s20 + $0x18] sm:$0xff] }
 0x40b   : > { %5837 = vpow2.f32 %v2447_v48  ;;  %v2469_v48 = vld [vmem:[%s6962_s20 + $0x10] sm:$0xff] }
 0x40c   : > { %5839 = vpow2.f32 %v2449_v16  ;;  %5464 = vmatpush3.bf16.msra.mxu1 %v5731_v1  ;;  %v2468_v16 = vld [vmem:[%s6962_s20 + $0x8] sm:$0xff] }
 0x40d   : > { %5465 = vmatprep.subr.bf16.mxu1 %v5732_v41 }
 0x410   : > { %v5433_v50 = vpop.f32.mrb[72].mxu1  ;;  %5466 = vmatpush3.bf16.msra.mxu1 %v5732_v41 }
 0x411   : > { %v6880_v51 = vadd.f32 %v5433_v50, %v6818_v44  ;;  %v2388_v53 = vpop.f32.mrb[73].mxu1  ;;  %5467 = vmatprep.subr.bf16.mxu1 %v5733_v42 }
 0x412   : > { %v5834_v19 = vpop.eup %5833  ;;  %v6883_v54 = vadd.f32 %v6818_v44, %v2388_v53  ;;  %v5434_v56 = vpop.f32.mrb[74].mxu1 }
 0x413   : > { %4647 = vst [vmem:[%s6825_s26 + $0x50] sm:$0xff] %v6880_v51  ;;  %v6888_v59 = vadd.f32 %v5434_v56, %v6818_v44  ;;  %v2391_v60 = vpop.f32.mrb[75].mxu1  ;;  %2507 = vrot.lane.b32.xlu0 %v5834_v19, %s6314_s22  ;;  %v2429_v61 = vmul.f32 0.5, %v6880_v51 }
 0x414   : > { %v5836_v26 = vpop.eup %5835  ;;  %v2427_v0 = vmul.f32 0.5, %v6883_v54  ;;  %4645 = vst [vmem:[%s6825_s26 + $0x40] sm:$0xff] %v6883_v54  ;;  %v6896_v29 = vadd.f32 %v6818_v44, %v2391_v60  ;;  %5468 = vmatpush3.bf16.msra.mxu1 %v5733_v42  ;;  %v2479_v42 = vld [vmem:[%s6962_s20 + $0x60] sm:$0xff] }
 0x415   : > { %4648 = vst [vmem:[%s6825_s26 + $0x58] sm:$0xff] %v6888_v59  ;;  %2509 = vrot.lane.b32.xlu1 %v5836_v26, %s6314_s22  ;;  %v5838_v34 = vpop.eup %5837  ;;  %v2430_v2 = vmul.f32 0.5, %v6888_v59  ;;  %v2455_v63 = vmul.f32 1.442695, %v2429_v61  ;;  %5469 = vmatprep.subr.bf16.mxu1 %v5734_v43 }
 0x416   : > { %v2451_v58 = vmul.f32 1.442695, %v2427_v0  ;;  %v2428_v37 = vmul.f32 0.5, %v6896_v29  ;;  %4646 = vst [vmem:[%s6825_s26 + $0x48] sm:$0xff] %v6896_v29  ;;  %v5840_v3 = vpop.eup %5839 }
 0x417   : > { %2511 = vrot.lane.b32.xlu0 %v5838_v34, %s6314_s22  ;;  %v2457_v5 = vmul.f32 1.442695, %v2430_v2 }
 0x418   : > { %5841 = vpow2.f32 %v2451_v58  ;;  %v2453_v4 = vmul.f32 1.442695, %v2428_v37  ;;  %5470 = vmatpush3.bf16.msra.mxu1 %v5734_v43 }
 0x419   : > { %2513 = vrot.lane.b32.xlu1 %v5840_v3, %s6314_s22  ;;  %v2471_v3 = vld [vmem:[%s6962_s20 + $0x20] sm:$0xff] }
 0x41a   : > { %5843 = vpow2.f32 %v2453_v4  ;;  %v2472_v4 = vld [vmem:[%s6962_s20 + $0x28] sm:$0xff] }
 0x41b   : > { %5845 = vpow2.f32 %v2455_v63 }
 0x41c   : > { %5847 = vpow2.f32 %v2457_v5 }
 0x420   : > { %v5437_v6 = vpop.f32.mrb[76].mxu1 }
 0x421   : > { %v6908_v9 = vadd.f32 %v5437_v6, %v6818_v44  ;;  %v2404_v10 = vpop.f32.mrb[77].mxu1 }
 0x422   : > { %v5842_v13 = vpop.eup %5841  ;;  %v6911_v14 = vadd.f32 %v6818_v44, %v2404_v10  ;;  %v5438_v52 = vpop.f32.mrb[78].mxu1 }
 0x423   : > { %4651 = vst [vmem:[%s6825_s26 + $0x70] sm:$0xff] %v6908_v9  ;;  %v6916_v17 = vadd.f32 %v5438_v52, %v6818_v44  ;;  %v2407_v55 = vpop.f32.mrb[79].mxu1  ;;  %2515 = vrot.lane.b32.xlu0 %v5842_v13, %s6314_s22  ;;  %v2433_v12 = vmul.f32 0.5, %v6908_v9 }
 0x424   : > { %v5844_v20 = vpop.eup %5843  ;;  %v2431_v15 = vmul.f32 0.5, %v6911_v14  ;;  %4649 = vst [vmem:[%s6825_s26 + $0x60] sm:$0xff] %v6911_v14  ;;  %v6924_v22 = vadd.f32 %v6818_v44, %v2407_v55 }
 0x425   : > { %4652 = vst [vmem:[%s6825_s26 + $0x78] sm:$0xff] %v6916_v17  ;;  %2517 = vrot.lane.b32.xlu1 %v5844_v20, %s6314_s22  ;;  %v5846_v47 = vpop.eup %5845  ;;  %v2434_v57 = vmul.f32 0.5, %v6916_v17  ;;  %v2463_v28 = vmul.f32 1.442695, %v2433_v12 }
 0x426   : > { %v2459_v24 = vmul.f32 1.442695, %v2431_v15  ;;  %v2432_v25 = vmul.f32 0.5, %v6924_v22  ;;  %4650 = vst [vmem:[%s6825_s26 + $0x68] sm:$0xff] %v6924_v22  ;;  %v5848_v27 = vpop.eup %5847 }
 0x427   : > { %2519 = vrot.lane.b32.xlu0 %v5846_v47, %s6314_s22  ;;  %v2465_v44 = vmul.f32 1.442695, %v2434_v57  ;;  %v2475_v57 = vld [vmem:[%s6962_s20 + $0x40] sm:$0xff] }
 0x428   : > { %5849 = vpow2.f32 %v2459_v24  ;;  %v2461_v30 = vmul.f32 1.442695, %v2432_v25 }
 0x429   : > { %2521 = vrot.lane.b32.xlu1 %v5848_v27, %s6314_s22 }
 0x42a   : > { %5851 = vpow2.f32 %v2461_v30 }
 0x42b   : > { %5853 = vpow2.f32 %v2463_v28 }
 0x42c   : > { %5855 = vpow2.f32 %v2465_v44 }
 0x432   : > { %v5850_v31 = vpop.eup %5849 }
 0x433   : > { %2523 = vrot.lane.b32.xlu0 %v5850_v31, %s6314_s22  ;;  %v2478_v31 = vld [vmem:[%s6962_s20 + $0x58] sm:$0xff] }
 0x434   : > { %v5852_v62 = vpop.eup %5851 }
 0x435   : > { %2525 = vrot.lane.b32.xlu1 %v5852_v62, %s6314_s22  ;;  %v5854_v38 = vpop.eup %5853 }
 0x436   : > { %v5856_v40 = vpop.eup %5855 }
 0x437   : > { %2527 = vrot.lane.b32.xlu0 %v5854_v38, %s6314_s22 }
 0x439   : > { %2529 = vrot.lane.b32.xlu1 %v5856_v40, %s6314_s22  ;;  %s5556_s22 = smul.u32 56, %s7888_s23 }
 0x43b   : > { %s7342_s29 = scalar_lea.vmem %s7860_s18, %s5556_s22 }
 0x474   : > { %v2504_v45 = vpop.permute.xlu1 %2503 }
 0x475   : > { %v2500_v46 = vpop.permute.xlu0 %2499  ;;  %v2549_v19 = vmul.f32 %v2504_v45, %v2469_v48 }
 0x476   : > { %v2547_v50 = vmul.f32 %v2500_v46, %v2467_v11 }
 0x477   : > { %v2565_v58 = vadd.f32 %v2549_v19, %v6828_v18 }
 0x478   : > { %v2506_v53 = vpop.permute.xlu1 %2505  ;;  %v2563_v0 = vadd.f32 %v2547_v50, %v6831_v7 }
 0x479   : > { %v2550_v56 = vmul.f32 %v2506_v53, %v2470_v49  ;;  %v2502_v60 = vpop.permute.xlu0 %2501  ;;  %v2482_v49 = vld [vmem:[%s6962_s20 + $0x78] sm:$0xff] }
 0x47a   : > { %v2548_v26 = vmul.f32 %v2502_v60, %v2468_v16 }
 0x47b   : > { %v2566_v61 = vadd.f32 %v2550_v56, %v6837_v21  ;;  %v2473_v21 = vld [vmem:[%s6962_s20 + $0x30] sm:$0xff] }
 0x47c   : > { %v2564_v34 = vadd.f32 %v2548_v26, %v6843_v23  ;;  %v2474_v23 = vld [vmem:[%s6962_s20 + $0x38] sm:$0xff] }
 0x47d   : > { %v2580_v37 = vpack.c.bf16 %v2566_v61, %v2565_v58  ;;  %v5735_v61 = vld [vmem:[%s7854_s12 + $0x30] sm:$0xff]   ;;  %v5742_v58 = vld [vmem:[%s7856_s14 + $0x28] sm:$0xff]  }
 0x47e   : > { %v2579_v2 = vpack.c.bf16 %v2564_v34, %v2563_v0  ;;  %5471 = vmatprep.subr.bf16.mxu1 %v5735_v61  ;;  %v5740_v0 = vld [vmem:[%s7856_s14 + $0x18] sm:$0xff]   ;;  %v5741_v34 = vld [vmem:[%s7856_s14 + $0x20] sm:$0xff]  }
 0x47f   : > { %5472 = vmatpush3.bf16.msra.mxu1 %v5735_v61 }
 0x480   : > { %5443 = vmatprep.mubr.msk.bf16.mxu0 %vm2610_vm0, %v2579_v2  ;;  %v4910_v2 = vld [vmem:[%s7853_s11] ss:$0 sm:$0xff] }
 0x481   : > { %5444 = vmatmul.mubr.msk.bf16.vlgmr.msra.gmra.mrb[80].mxu0 %vm2610_vm0, %v2580_v37 }
 0x485   : > { %v2508_v63 = vpop.permute.xlu0 %2507 }
 0x486   : > { %v2551_v5 = vmul.f32 %v2508_v63, %v2471_v3 }
 0x487   : > { %v2510_v6 = vpop.permute.xlu1 %2509 }
 0x488   : > { %v2552_v7 = vmul.f32 %v2510_v6, %v2472_v4  ;;  %v2567_v18 = vadd.f32 %v2551_v5, %v6855_v36  ;;  %v2476_v36 = vld [vmem:[%s6962_s20 + $0x48] sm:$0xff] }
 0x489   : > { %v2512_v10 = vpop.permute.xlu0 %2511 }
 0x48a   : > { %v2568_v13 = vadd.f32 %v2552_v7, %v6869_v8  ;;  %v2553_v52 = vmul.f32 %v2512_v10, %v2473_v21  ;;  %v2477_v8 = vld [vmem:[%s6962_s20 + $0x50] sm:$0xff] }
 0x48b   : > { %v2514_v55 = vpop.permute.xlu1 %2513 }
 0x48c   : > { %v2581_v20 = vpack.c.bf16 %v2568_v13, %v2567_v18  ;;  %v2554_v12 = vmul.f32 %v2514_v55, %v2474_v23  ;;  %v2569_v15 = vadd.f32 %v2553_v52, %v6852_v33 }
 0x48e   : > { %v2570_v47 = vadd.f32 %v2554_v12, %v6861_v39  ;;  %5447 = vmatprep.mubr.msk.bf16.mxu0 %vm2610_vm0, %v2581_v20 }
 0x490   : > { %v2582_v24 = vpack.c.bf16 %v2570_v47, %v2569_v15 }
 0x492   : > { %5448 = vmatmul.mubr.msk.bf16.gmra.mrb[84].mxu0 %vm2610_vm0, %v2582_v24 }
 0x495   : > { %v2516_v25 = vpop.permute.xlu0 %2515 }
 0x496   : > { %v2555_v27 = vmul.f32 %v2516_v25, %v2475_v57 }
 0x497   : > { %v2518_v28 = vpop.permute.xlu1 %2517 }
 0x498   : > { %v2556_v30 = vmul.f32 %v2518_v28, %v2476_v36  ;;  %v2571_v33 = vadd.f32 %v2555_v27, %v6883_v54  ;;  %v2480_v54 = vld [vmem:[%s6962_s20 + $0x68] sm:$0xff] }
 0x499   : > { %v2520_v44 = vpop.permute.xlu0 %2519 }
 0x49a   : > { %v2572_v39 = vadd.f32 %v2556_v30, %v6896_v29  ;;  %v2557_v32 = vmul.f32 %v2520_v44, %v2477_v8  ;;  %v2481_v29 = vld [vmem:[%s6962_s20 + $0x70] sm:$0xff] }
 0x49b   : > { %v2522_v35 = vpop.permute.xlu1 %2521 }
 0x49c   : > { %v2583_v62 = vpack.c.bf16 %v2572_v39, %v2571_v33  ;;  %v2558_v38 = vmul.f32 %v2522_v35, %v2478_v31  ;;  %v2573_v1 = vadd.f32 %v2557_v32, %v6880_v51 }
 0x49e   : > { %v2574_v40 = vadd.f32 %v2558_v38, %v6888_v59  ;;  %5451 = vmatprep.mubr.msk.bf16.mxu0 %vm2610_vm0, %v2583_v62 }
 0x4a0   : > { %v2584_v41 = vpack.c.bf16 %v2574_v40, %v2573_v1 }
 0x4a2   : > { %5452 = vmatmul.mubr.msk.bf16.gmra.mrb[88].mxu0 %vm2610_vm0, %v2584_v41 }
 0x4a5   : > { %v2524_v43 = vpop.permute.xlu0 %2523 }
 0x4a6   : > { %v2559_v45 = vmul.f32 %v2524_v43, %v2479_v42 }
 0x4a7   : > { %v2526_v11 = vpop.permute.xlu1 %2525 }
 0x4a8   : > { %v2560_v46 = vmul.f32 %v2526_v11, %v2480_v54  ;;  %v2575_v16 = vadd.f32 %v2559_v45, %v6911_v14  ;;  %v5736_v14 = vld [vmem:[%s7854_s12 + $0x38] sm:$0xff]  }
 0x4a9   : > { %v2528_v48 = vpop.permute.xlu0 %2527  ;;  %5473 = vmatprep.subr.bf16.mxu1 %v5736_v14 }
 0x4aa   : > { %v2576_v51 = vadd.f32 %v2560_v46, %v6924_v22  ;;  %v2561_v50 = vmul.f32 %v2528_v48, %v2481_v29  ;;  %5474 = vmatpush3.bf16.msra.mxu1 %v5736_v14  ;;  %v5739_v22 = vld [vmem:[%s7856_s14 + $0x10] sm:$0xff]  }
 0x4ab   : > { %v2530_v59 = vpop.permute.xlu1 %2529  ;;  %v5743_v14 = vld [vmem:[%s7856_s14 + $0x30] sm:$0xff]  }
 0x4ac   : > { %v2585_v53 = vpack.c.bf16 %v2576_v51, %v2575_v16  ;;  %v2562_v19 = vmul.f32 %v2530_v59, %v2482_v49  ;;  %v2577_v56 = vadd.f32 %v2561_v50, %v6908_v9  ;;  %v5737_v9 = vld [vmem:[%s7856_s14] sm:$0xff]  }
 0x4ad   : > { %5491 = vmatprep.subr.bf16.mxu0 %v5737_v9 }
 0x4ae   : > { %v2578_v60 = vadd.f32 %v2562_v19, %v6916_v17  ;;  %5455 = vmatprep.mubr.msk.bf16.mxu0 %vm2610_vm0, %v2585_v53  ;;  %v5738_v17 = vld [vmem:[%s7856_s14 + $0x8] sm:$0xff]   ;;  %5492 = vmatpush3.bf16.msra.mxu0 %v5737_v9  ;;  %v5744_v9 = vld [vmem:[%s7856_s14 + $0x38] sm:$0xff]  }
 0x4af   : > { %5493 = vmatprep.subr.bf16.mxu0 %v5738_v17 }
 0x4b0   : > { %v2586_v26 = vpack.c.bf16 %v2578_v60, %v2577_v56 }
 0x4b2   : > { %5456 = vmatmul.mubr.msk.bf16.gmra.mrb[92].mxu0 %vm2610_vm0, %v2586_v26 }
 0x4b3   : > { %5494 = vmatpush3.bf16.msra.mxu0 %v5738_v17  ;;  %v5745_v17 = vld [vmem:[%s7858_s16] ss:$28 sps:$4 sm:$0xff]  }
 0x4b4   : > { %5495 = vmatprep.subr.bf16.mxu0 %v5739_v22 }
 0x4b7   : > { %5496 = vmatpush3.bf16.msra.mxu0 %v5739_v22  ;;  %v5747_v22 = vld [vmem:[%s7858_s16 + $0x4] ss:$28 sps:$4 sm:$0xff]  }
 0x4b8   : > { %5497 = vmatprep.subr.bf16.mxu0 %v5740_v0  ;;  %3529 = vmatprep.subr.bf16.mxu1 %v5747_v22 }
 0x4bb   : > { %5498 = vmatpush3.bf16.msra.mxu0 %v5740_v0  ;;  %v5750_v0 = vld [vmem:[%s7858_s16 + $0xc] ss:$28 sps:$4 sm:$0xff]  }
 0x4bc   : > { %5499 = vmatprep.subr.bf16.mxu0 %v5741_v34 }
 0x4bf   : > { %5500 = vmatpush3.bf16.msra.mxu0 %v5741_v34  ;;  %v5753_v34 = vld [vmem:[%s7858_s16 + $0x3c] ss:$28 sps:$4 sm:$0xff]  }
 0x4c0   : > { %5501 = vmatprep.subr.bf16.mxu0 %v5742_v58 }
 0x4c3   : > { %5502 = vmatpush3.bf16.msra.mxu0 %v5742_v58  ;;  %v5751_v58 = vld [vmem:[%s7858_s16 + $0x38] ss:$28 sps:$4 sm:$0xff]  }
 0x4c4   : > { %5503 = vmatprep.subr.bf16.mxu0 %v5743_v14 }
 0x4c7   : > { %5504 = vmatpush3.bf16.msra.mxu0 %v5743_v14 }
 0x4c8   : > { %5505 = vmatprep.subr.bf16.mxu0 %v5744_v9 }
 0x4cb   : > { %5506 = vmatpush3.bf16.msra.mxu0 %v5744_v9 }
 0x4cc   : > { %3642 = vmatprep.subr.bf16.mxu0 %v5750_v0 }
 0x554   : > { %v5445_v37 = vpop.f32.mrb[80].mxu0 }
 0x555   : > { %v2678_v3 = vadd.f32 %v5445_v37, %v4910_v2  ;;  %v2669_v63 = vpop.f32.mrb[81].mxu0  ;;  %v5757_v37 = vld [vmem:[%s7858_s16 + $0x70] ss:$28 sps:$4 sm:$0xff]  }
 0x556   : > { %v2670_v4 = vadd.f32 %v4910_v2, %v2669_v63  ;;  %v5446_v5 = vpop.f32.mrb[82].mxu0  ;;  %v5763_v63 = vld [vmem:[%s7858_s16 + $0xa8] ss:$28 sps:$4 sm:$0xff]  }
 0x557   : > { %v2681_v6 = vadd.f32 %v5446_v5, %v4910_v2  ;;  %v2672_v21 = vpop.f32.mrb[83].mxu0  ;;  %v2734_v10 = vmax.f32 %v2678_v3, 0.0  ;;  %v5765_v3 = vld [vmem:[%s7858_s16 + $0xac] ss:$28 sps:$4 sm:$0xff]   ;;  %v5769_v5 = vld [vmem:[%s7858_s16 + $0xe0] ss:$28 sps:$4 sm:$0xff]  }
 0x558   : > { %v2673_v7 = vadd.f32 %v4910_v2, %v2672_v21  ;;  %v2732_v18 = vmax.f32 %v2670_v4, 0.0  ;;  %v5771_v4 = vld [vmem:[%s7858_s16 + $0xe4] ss:$28 sps:$4 sm:$0xff]   ;;  %v5775_v21 = vld [vmem:[%s7858_s16 + $0x118] ss:$28 sps:$4 sm:$0xff]  }
 0x559   : > { %v2735_v23 = vmax.f32 %v2681_v6, 0.0  ;;  %v5777_v6 = vld [vmem:[%s7858_s16 + $0x11c] ss:$28 sps:$4 sm:$0xff]  }
 0x55a   : > { %v2733_v13 = vmax.f32 %v2673_v7, 0.0  ;;  %v7079_v7 = vld [vmem:[%s7855_s13] ss:$0 sm:$0xff] }
 0x55b   : > { %v2749_v52 = vpack.c.bf16 %v2735_v23, %v2734_v10 }
 0x55c   : > { %v2748_v55 = vpack.c.bf16 %v2733_v13, %v2732_v18 }
 0x55e   : > { %5475 = vmatprep.mubr.bf16.mxu1 %v2748_v55 }
 0x55f   : > { %5476 = vmatmul.mubr.bf16.vlgmr.msra.gmra.mrb[80].mxu1 %v2749_v52 }
 0x560   : > { %3530 = vmatpush1.bf16.msra.mxu1 %v5745_v17 }
 0x561   : > { %3531 = vmatprep.subr.bf16.mxu1 %v5753_v34 }
 0x564   : > { %3532 = vmatpush1.bf16.msra.mxu1 %v5751_v58 }
 0x565   : > { %v5449_v20 = vpop.f32.mrb[84].mxu0 }
 0x566   : > { %v2694_v12 = vadd.f32 %v5449_v20, %v4910_v2  ;;  %v2685_v15 = vpop.f32.mrb[85].mxu0 }
 0x567   : > { %v2686_v47 = vadd.f32 %v4910_v2, %v2685_v15  ;;  %v5450_v24 = vpop.f32.mrb[86].mxu0 }
 0x568   : > { %v2697_v57 = vadd.f32 %v5450_v24, %v4910_v2  ;;  %v2688_v25 = vpop.f32.mrb[87].mxu0  ;;  %v2738_v27 = vmax.f32 %v2694_v12, 0.0 }
 0x569   : > { %v2689_v36 = vadd.f32 %v4910_v2, %v2688_v25  ;;  %v2736_v8 = vmax.f32 %v2686_v47, 0.0 }
 0x56a   : > { %v2739_v28 = vmax.f32 %v2697_v57, 0.0 }
 0x56b   : > { %v2737_v30 = vmax.f32 %v2689_v36, 0.0 }
 0x56c   : > { %v2751_v44 = vpack.c.bf16 %v2739_v28, %v2738_v27  ;;  %v5748_v27 = vld [vmem:[%s7858_s16 + $0x8] ss:$28 sps:$4 sm:$0xff]  }
 0x56d   : > { %v2750_v31 = vpack.c.bf16 %v2737_v30, %v2736_v8  ;;  %v5756_v28 = vld [vmem:[%s7858_s16 + $0x44] ss:$28 sps:$4 sm:$0xff]   ;;  %v5762_v30 = vld [vmem:[%s7858_s16 + $0x7c] ss:$28 sps:$4 sm:$0xff]  }
 0x56e   : > { %v5754_v8 = vld [vmem:[%s7858_s16 + $0x40] ss:$28 sps:$4 sm:$0xff]  }
 0x56f   : > { %5479 = vmatprep.mubr.bf16.mxu1 %v2750_v31 }
 0x570   : > { %5480 = vmatmul.mubr.bf16.gmra.mrb[84].mxu1 %v2751_v44  ;;  %v5760_v44 = vld [vmem:[%s7858_s16 + $0x78] ss:$28 sps:$4 sm:$0xff]  }
 0x575   : > { %v5453_v33 = vpop.f32.mrb[88].mxu0 }
 0x576   : > { %v2710_v39 = vadd.f32 %v5453_v33, %v4910_v2  ;;  %v2701_v32 = vpop.f32.mrb[89].mxu0  ;;  %v5768_v33 = vld [vmem:[%s7858_s16 + $0xb4] ss:$28 sps:$4 sm:$0xff]  }
 0x577   : > { %v2702_v35 = vadd.f32 %v4910_v2, %v2701_v32  ;;  %v5454_v62 = vpop.f32.mrb[90].mxu0 }
 0x578   : > { %v2713_v38 = vadd.f32 %v5454_v62, %v4910_v2  ;;  %v2704_v1 = vpop.f32.mrb[91].mxu0  ;;  %v2742_v41 = vmax.f32 %v2710_v39, 0.0 }
 0x579   : > { %v2705_v40 = vadd.f32 %v4910_v2, %v2704_v1  ;;  %v2740_v43 = vmax.f32 %v2702_v35, 0.0 }
 0x57a   : > { %v2743_v42 = vmax.f32 %v2713_v38, 0.0 }
 0x57b   : > { %v2741_v54 = vmax.f32 %v2705_v40, 0.0  ;;  %v5766_v40 = vld [vmem:[%s7858_s16 + $0xb0] ss:$28 sps:$4 sm:$0xff]  }
 0x57c   : > { %v2753_v45 = vpack.c.bf16 %v2743_v42, %v2742_v41  ;;  %v5774_v42 = vld [vmem:[%s7858_s16 + $0xec] ss:$28 sps:$4 sm:$0xff]  }
 0x57d   : > { %v2752_v11 = vpack.c.bf16 %v2741_v54, %v2740_v43 }
 0x57f   : > { %5483 = vmatprep.mubr.bf16.mxu1 %v2752_v11 }
 0x580   : > { %5484 = vmatmul.mubr.bf16.gmra.mrb[88].mxu1 %v2753_v45 }
 0x585   : > { %v5457_v29 = vpop.f32.mrb[92].mxu0 }
 0x586   : > { %v2726_v46 = vadd.f32 %v5457_v29, %v4910_v2  ;;  %v2717_v48 = vpop.f32.mrb[93].mxu0 }
 0x587   : > { %v2718_v49 = vadd.f32 %v4910_v2, %v2717_v48  ;;  %v5458_v16 = vpop.f32.mrb[94].mxu0  ;;  %v5772_v48 = vld [vmem:[%s7858_s16 + $0xe8] ss:$28 sps:$4 sm:$0xff]  }
 0x588   : > { %v2729_v51 = vadd.f32 %v5458_v16, %v4910_v2  ;;  %v2720_v50 = vpop.f32.mrb[95].mxu0  ;;  %v2746_v53 = vmax.f32 %v2726_v46, 0.0  ;;  %v5778_v16 = vld [vmem:[%s7858_s16 + $0x120] ss:$28 sps:$4 sm:$0xff]  }
 0x589   : > { %v2721_v59 = vadd.f32 %v4910_v2, %v2720_v50  ;;  %v2744_v56 = vmax.f32 %v2718_v49, 0.0  ;;  %v5759_v2 = vld [vmem:[%s7858_s16 + $0x74] ss:$28 sps:$4 sm:$0xff]   ;;  %v5780_v49 = vld [vmem:[%s7858_s16 + $0x124] ss:$28 sps:$4 sm:$0xff]  }
 0x58a   : > { %v2747_v19 = vmax.f32 %v2729_v51, 0.0  ;;  %3533 = vmatprep.subr.bf16.mxu1 %v5759_v2 }
 0x58b   : > { %v2745_v60 = vmax.f32 %v2721_v59, 0.0  ;;  %3534 = vmatpush1.bf16.msra.mxu1 %v5757_v37 }
 0x58c   : > { %v2755_v26 = vpack.c.bf16 %v2747_v19, %v2746_v53  ;;  %3535 = vmatprep.subr.bf16.mxu1 %v5765_v3 }
 0x58d   : > { %v2754_v61 = vpack.c.bf16 %v2745_v60, %v2744_v56 }
 0x58f   : > { %5487 = vmatprep.mubr.bf16.mxu1 %v2754_v61  ;;  %3536 = vmatpush1.bf16.msra.mxu1 %v5763_v63 }
 0x590   : > { %5488 = vmatmul.mubr.bf16.gmra.mrb[92].mxu1 %v2755_v26  ;;  %3537 = vmatprep.subr.bf16.mxu1 %v5771_v4 }
 0x593   : > { %3538 = vmatpush1.bf16.msra.mxu1 %v5769_v5 }
 0x594   : > { %3539 = vmatprep.subr.bf16.mxu1 %v5777_v6 }
 0x597   : > { %3540 = vmatpush1.bf16.msra.mxu1 %v5775_v21 }
 0x632   : > { %v5477_v10 = vpop.f32.mrb[80].mxu1 }
 0x633   : > { %v2870_v23 = vadd.f32 %v5477_v10, %v7079_v7  ;;  %v2861_v18 = vpop.f32.mrb[81].mxu1 }
 0x634   : > { %v2862_v13 = vadd.f32 %v7079_v7, %v2861_v18  ;;  %v5478_v52 = vpop.f32.mrb[82].mxu1 }
 0x635   : > { %v2873_v55 = vadd.f32 %v5478_v52, %v7079_v7  ;;  %v2864_v20 = vpop.f32.mrb[83].mxu1  ;;  %v2926_v15 = vmax.f32 %v2870_v23, 0.0  ;;  %v5783_v52 = vld [vmem:[%s7858_s16 + $0x154] ss:$28 sps:$4 sm:$0xff]  }
 0x636   : > { %v2865_v12 = vadd.f32 %v7079_v7, %v2864_v20  ;;  %v2924_v24 = vmax.f32 %v2862_v13, 0.0  ;;  %v5784_v20 = vld [vmem:[%s7858_s16 + $0x158] ss:$28 sps:$4 sm:$0xff]   ;;  %3541 = vmatprep.subr.bf16.mxu1 %v5783_v52 }
 0x637   : > { %v2927_v47 = vmax.f32 %v2873_v55, 0.0  ;;  %v5786_v55 = vld [vmem:[%s7858_s16 + $0x15c] ss:$28 sps:$4 sm:$0xff]  }
 0x638   : > { %v2925_v57 = vmax.f32 %v2865_v12, 0.0  ;;  %v5789_v12 = vld [vmem:[%s7858_s16 + $0x18c] ss:$28 sps:$4 sm:$0xff]  }
 0x639   : > { %v2941_v25 = vpack.c.bf16 %v2927_v47, %v2926_v15  ;;  %v5792_v15 = vld [vmem:[%s7858_s16 + $0x194] ss:$28 sps:$4 sm:$0xff]   ;;  %v5787_v47 = vld [vmem:[%s7858_s16 + $0x188] ss:$28 sps:$4 sm:$0xff]  }
 0x63a   : > { %v2940_v36 = vpack.c.bf16 %v2925_v57, %v2924_v24  ;;  %v5790_v24 = vld [vmem:[%s7858_s16 + $0x190] ss:$28 sps:$4 sm:$0xff]   ;;  %v6315_v57 = vmov 0  }
 0x63b   : > { %3561 = vmatprep.mubr.bf16.mxu1 %v6315_v57 }
 0x63c   : > { %5507 = vmatprep.mubr.bf16.mxu0 %v2940_v36  ;;  %v5808_v36 = vld [vmem:[%s7858_s16 + $0x18] ss:$28 sps:$4 sm:$0xff]  }
 0x63d   : > { %5508 = vmatmul.mubr.bf16.vlgmr.msra.gmra.mrb[96].mxu0 %v2941_v25  ;;  %v5795_v25 = vld [vmem:[%s7858_s16 + $0x14] ss:$28 sps:$4 sm:$0xff]  }
 0x63e   : > { %3643 = vmatpush1.bf16.msra.mxu0 %v5748_v27  ;;  %v7165_v27 = vld [vmem:[%s7857_s15] ss:$0 sm:$0xff] }
 0x63f   : > { %3644 = vmatprep.subr.bf16.mxu0 %v5756_v28 }
 0x642   : > { %3645 = vmatpush1.bf16.msra.mxu0 %v5754_v8 }
 0x643   : > { %v5481_v31 = vpop.f32.mrb[84].mxu1  ;;  %3646 = vmatprep.subr.bf16.mxu0 %v5762_v30 }
 0x644   : > { %v2886_v39 = vadd.f32 %v5481_v31, %v7079_v7  ;;  %v2877_v32 = vpop.f32.mrb[85].mxu1 }
 0x645   : > { %v2878_v35 = vadd.f32 %v7079_v7, %v2877_v32  ;;  %v5482_v62 = vpop.f32.mrb[86].mxu1 }
 0x646   : > { %v2889_v38 = vadd.f32 %v5482_v62, %v7079_v7  ;;  %v2880_v1 = vpop.f32.mrb[87].mxu1  ;;  %3647 = vmatpush1.bf16.msra.mxu0 %v5760_v44  ;;  %v2930_v43 = vmax.f32 %v2886_v39, 0.0 }
 0x647   : > { %v2881_v41 = vadd.f32 %v7079_v7, %v2880_v1  ;;  %3648 = vmatprep.subr.bf16.mxu0 %v5768_v33  ;;  %v2928_v45 = vmax.f32 %v2878_v35, 0.0 }
 0x648   : > { %v2931_v54 = vmax.f32 %v2889_v38, 0.0 }
 0x649   : > { %v2929_v11 = vmax.f32 %v2881_v41, 0.0  ;;  %v5793_v41 = vld [vmem:[%s7858_s16 + $0x10] ss:$28 sps:$4 sm:$0xff]  }
 0x64a   : > { %v2943_v29 = vpack.c.bf16 %v2931_v54, %v2930_v43  ;;  %3649 = vmatpush1.bf16.msra.mxu0 %v5766_v40  ;;  %v5798_v43 = vld [vmem:[%s7858_s16 + $0x4c] ss:$28 sps:$4 sm:$0xff]  }
 0x64b   : > { %v2942_v46 = vpack.c.bf16 %v2929_v11, %v2928_v45  ;;  %3650 = vmatprep.subr.bf16.mxu0 %v5774_v42  ;;  %v5809_v54 = vld [vmem:[%s7858_s16 + $0x50] ss:$28 sps:$4 sm:$0xff]   ;;  %v5796_v45 = vld [vmem:[%s7858_s16 + $0x48] ss:$28 sps:$4 sm:$0xff]  }
 0x64c   : > { %v5801_v11 = vld [vmem:[%s7858_s16 + $0x84] ss:$28 sps:$4 sm:$0xff]  }
 0x64d   : > { %5511 = vmatprep.mubr.bf16.mxu0 %v2942_v46  ;;  %v5813_v46 = vld [vmem:[%s7858_s16 + $0x88] ss:$28 sps:$4 sm:$0xff]  }
 0x64e   : > { %5512 = vmatmul.mubr.bf16.gmra.mrb[100].mxu0 %v2943_v29  ;;  %v5799_v29 = vld [vmem:[%s7858_s16 + $0x80] ss:$28 sps:$4 sm:$0xff]  }
 0x64f   : > { %3651 = vmatpush1.bf16.msra.mxu0 %v5772_v48 }
 0x650   : > { %3652 = vmatprep.subr.bf16.mxu0 %v5780_v49  ;;  %v5804_v49 = vld [vmem:[%s7858_s16 + $0xbc] ss:$28 sps:$4 sm:$0xff]  }
 0x653   : > { %v5485_v51 = vpop.f32.mrb[88].mxu1  ;;  %3653 = vmatpush1.bf16.msra.mxu0 %v5778_v16 }
 0x654   : > { %v2902_v50 = vadd.f32 %v5485_v51, %v7079_v7  ;;  %v2893_v59 = vpop.f32.mrb[89].mxu1  ;;  %3654 = vmatprep.subr.bf16.mxu0 %v5786_v55 }
 0x655   : > { %v2894_v53 = vadd.f32 %v7079_v7, %v2893_v59  ;;  %v5486_v19 = vpop.f32.mrb[90].mxu1 }
 0x656   : > { %v2905_v56 = vadd.f32 %v5486_v19, %v7079_v7  ;;  %v2896_v60 = vpop.f32.mrb[91].mxu1  ;;  %v2934_v61 = vmax.f32 %v2902_v50, 0.0  ;;  %v5814_v50 = vld [vmem:[%s7858_s16 + $0xc0] ss:$28 sps:$4 sm:$0xff]  }
 0x657   : > { %v2897_v26 = vadd.f32 %v7079_v7, %v2896_v60  ;;  %v2932_v9 = vmax.f32 %v2894_v53, 0.0  ;;  %3655 = vmatpush1.bf16.msra.mxu0 %v5784_v20  ;;  %v5802_v60 = vld [vmem:[%s7858_s16 + $0xb8] ss:$28 sps:$4 sm:$0xff]  }
 0x658   : > { %v2935_v14 = vmax.f32 %v2905_v56, 0.0  ;;  %3656 = vmatprep.subr.bf16.mxu0 %v5792_v15  ;;  %v5820_v15 = vld [vmem:[%s7858_s16 + $0x198] ss:$28 sps:$4 sm:$0xff]  }
 0x659   : > { %v2933_v17 = vmax.f32 %v2897_v26, 0.0 }
 0x65a   : > { %v2945_v22 = vpack.c.bf16 %v2935_v14, %v2934_v61  ;;  %v5807_v61 = vld [vmem:[%s7858_s16 + $0xf4] ss:$28 sps:$4 sm:$0xff]  }
 0x65b   : > { %v2944_v0 = vpack.c.bf16 %v2933_v17, %v2932_v9  ;;  %3657 = vmatpush1.bf16.msra.mxu0 %v5790_v24  ;;  %v5818_v17 = vld [vmem:[%s7858_s16 + $0xf8] ss:$28 sps:$4 sm:$0xff]  }
 0x65c   : > { %5523 = vmatprep.subr.bf16.mxu0 %v5808_v36 }
 0x65d   : > { %5515 = vmatprep.mubr.bf16.mxu0 %v2944_v0 }
 0x65e   : > { %5516 = vmatmul.mubr.bf16.gmra.mrb[104].mxu0 %v2945_v22 }
 0x663   : > { %v5489_v34 = vpop.f32.mrb[92].mxu1 }
 0x664   : > { %v2918_v58 = vadd.f32 %v5489_v34, %v7079_v7  ;;  %v2909_v2 = vpop.f32.mrb[93].mxu1 }
 0x665   : > { %v2910_v37 = vadd.f32 %v7079_v7, %v2909_v2  ;;  %v5490_v3 = vpop.f32.mrb[94].mxu1  ;;  %v5805_v2 = vld [vmem:[%s7858_s16 + $0xf0] ss:$28 sps:$4 sm:$0xff]  }
 0x666   : > { %v2921_v63 = vadd.f32 %v5490_v3, %v7079_v7  ;;  %v2912_v4 = vpop.f32.mrb[95].mxu1  ;;  %v2938_v6 = vmax.f32 %v2918_v58, 0.0  ;;  %v5819_v3 = vld [vmem:[%s7858_s16 + $0x130] ss:$28 sps:$4 sm:$0xff]  }
 0x667   : > { %v2913_v5 = vadd.f32 %v7079_v7, %v2912_v4  ;;  %v2936_v10 = vmax.f32 %v2910_v37, 0.0  ;;  %v5781_v7 = vld [vmem:[%s7858_s16 + $0x150] ss:$28 sps:$4 sm:$0xff]   ;;  %v5817_v4 = vld [vmem:[%s7858_s16 + $0x164] ss:$28 sps:$4 sm:$0xff]  }
 0x668   : > { %v2939_v21 = vmax.f32 %v2921_v63, 0.0  ;;  %3542 = vmatpush1.bf16.msra.mxu1 %v5781_v7  ;;  %v5812_v37 = vld [vmem:[%s7858_s16 + $0x12c] ss:$28 sps:$4 sm:$0xff]  }
 0x669   : > { %v2937_v23 = vmax.f32 %v2913_v5, 0.0  ;;  %3543 = vmatprep.subr.bf16.mxu1 %v5789_v12  ;;  %v5810_v63 = vld [vmem:[%s7858_s16 + $0x128] ss:$28 sps:$4 sm:$0xff]  }
 0x66a   : > { %v2947_v18 = vpack.c.bf16 %v2939_v21, %v2938_v6  ;;  %v5823_v5 = vld [vmem:[%s7858_s16 + $0x168] ss:$28 sps:$4 sm:$0xff]   ;;  %v5815_v21 = vld [vmem:[%s7858_s16 + $0x160] ss:$28 sps:$4 sm:$0xff]  }
 0x66b   : > { %v2946_v13 = vpack.c.bf16 %v2937_v23, %v2936_v10 }
 0x66c   : > { %3544 = vmatpush1.bf16.msra.mxu1 %v5787_v47 }
 0x66d   : > { %5519 = vmatprep.mubr.bf16.mxu0 %v2946_v13  ;;  %3755 = vmatprep.subr.bf16.mxu1 %v5795_v25  ;;  %v5824_v13 = vld [vmem:[%s7858_s16 + $0x1a0] ss:$28 sps:$4 sm:$0xff]  }
 0x66e   : > { %5520 = vmatmul.mubr.bf16.gmra.mrb[108].mxu0 %v2947_v18  ;;  %v5822_v18 = vld [vmem:[%s7858_s16 + $0x19c] ss:$28 sps:$4 sm:$0xff]  }
 0x66f   : > { %3674 = vmatprep.mubr.bf16.mxu0 %v6315_v57 }
 0x710   : > { %v5509_v28 = vpop.f32.mrb[96].mxu0 }
 0x711   : > { %v3062_v8 = vadd.f32 %v5509_v28, %v7165_v27  ;;  %v3053_v30 = vpop.f32.mrb[97].mxu0 }
 0x712   : > { %v3054_v44 = vadd.f32 %v7165_v27, %v3053_v30  ;;  %v5510_v31 = vpop.f32.mrb[98].mxu0 }
 0x713   : > { %v3065_v33 = vadd.f32 %v5510_v31, %v7165_v27  ;;  %v3056_v39 = vpop.f32.mrb[99].mxu0  ;;  %v3118_v35 = vmax.f32 %v3062_v8, 0.0 }
 0x714   : > { %v3057_v32 = vadd.f32 %v7165_v27, %v3056_v39  ;;  %v3116_v38 = vmax.f32 %v3054_v44, 0.0 }
 0x715   : > { %v3119_v62 = vmax.f32 %v3065_v33, 0.0 }
 0x716   : > { %v3117_v1 = vmax.f32 %v3057_v32, 0.0 }
 0x717   : > { %v7171_v40 = vpack.c.bf16 %v3119_v62, %v3118_v35 }
 0x718   : > { %v7176_v42 = vpack.c.bf16 %v3117_v1, %v3116_v38 }
 0x71a   : > { %3562 = vmatmul.mubr.bf16.vlgmr.msra.gmra.mrb[96].mxu1 %v7176_v42  ;;  %3675 = vmatmul.mubr.bf16.vlgmr.msra.gmra.mrb[112].mxu0 %v7176_v42 }
 0x71b   : > { %3756 = vmatpush1.bf16.msra.mxu1 %v5793_v41  ;;  %3571 = vmatprep.mubr.bf16.mxu1 %v6315_v57 }
 0x71c   : > { %3684 = vmatprep.mubr.bf16.mxu0 %v6315_v57  ;;  %3757 = vmatprep.subr.bf16.mxu1 %v5798_v43 }
 0x71d   : > { %5524 = vmatpush3.bf16.msra.mxu0 %v5808_v36 }
 0x71e   : > { %5525 = vmatprep.subr.bf16.mxu0 %v5809_v54 }
 0x71f   : > { %3758 = vmatpush1.bf16.msra.mxu1 %v5796_v45 }
 0x720   : > { %3759 = vmatprep.subr.bf16.mxu1 %v5801_v11 }
 0x721   : > { %v5513_v48 = vpop.f32.mrb[100].mxu0  ;;  %5526 = vmatpush3.bf16.msra.mxu0 %v5809_v54 }
 0x722   : > { %v3078_v16 = vadd.f32 %v5513_v48, %v7165_v27  ;;  %v3069_v51 = vpop.f32.mrb[101].mxu0  ;;  %3572 = vmatmul.mubr.bf16.gmra.mrb[100].mxu1 %v7171_v40  ;;  %3685 = vmatmul.mubr.bf16.gmra.mrb[116].mxu0 %v7171_v40 }
 0x723   : > { %v3070_v59 = vadd.f32 %v7165_v27, %v3069_v51  ;;  %v5514_v53 = vpop.f32.mrb[102].mxu0  ;;  %3581 = vmatprep.mubr.bf16.mxu1 %v6315_v57  ;;  %3694 = vmatprep.mubr.bf16.mxu0 %v6315_v57 }
 0x724   : > { %v3081_v19 = vadd.f32 %v5514_v53, %v7165_v27  ;;  %v3072_v56 = vpop.f32.mrb[103].mxu0  ;;  %3760 = vmatpush1.bf16.msra.mxu1 %v5799_v29  ;;  %5527 = vmatprep.subr.bf16.mxu0 %v5813_v46  ;;  %v3122_v14 = vmax.f32 %v3078_v16, 0.0  ;;  %v3204_v29 = vld [vmem:[%s7859_s17] sm:$0xff] }
 0x725   : > { %v3073_v26 = vadd.f32 %v7165_v27, %v3072_v56  ;;  %3761 = vmatprep.subr.bf16.mxu1 %v5804_v49  ;;  %5528 = vmatpush3.bf16.msra.mxu0 %v5813_v46  ;;  %v3120_v22 = vmax.f32 %v3070_v59, 0.0 }
 0x726   : > { %v3123_v9 = vmax.f32 %v3081_v19, 0.0  ;;  %5529 = vmatprep.subr.bf16.mxu0 %v5814_v50 }
 0x727   : > { %v3121_v0 = vmax.f32 %v3073_v26, 0.0 }
 0x728   : > { %v7223_v34 = vpack.c.bf16 %v3123_v9, %v3122_v14  ;;  %3762 = vmatpush1.bf16.msra.mxu1 %v5802_v60 }
 0x729   : > { %v7225_v58 = vpack.c.bf16 %v3121_v0, %v3120_v22  ;;  %3763 = vmatprep.subr.bf16.mxu1 %v5807_v61  ;;  %5530 = vmatpush3.bf16.msra.mxu0 %v5814_v50 }
 0x72a   : > { %5531 = vmatprep.subr.bf16.mxu0 %v5818_v17 }
 0x72b   : > { %3582 = vmatmul.mubr.bf16.gmra.mrb[104].mxu1 %v7225_v58  ;;  %3695 = vmatmul.mubr.bf16.gmra.mrb[120].mxu0 %v7225_v58 }
 0x72c   : > { %3591 = vmatprep.mubr.bf16.mxu1 %v6315_v57  ;;  %3704 = vmatprep.mubr.bf16.mxu0 %v6315_v57 }
 0x72d   : > { %3764 = vmatpush1.bf16.msra.mxu1 %v5805_v2  ;;  %5532 = vmatpush3.bf16.msra.mxu0 %v5818_v17 }
 0x72e   : > { %3765 = vmatprep.subr.bf16.mxu1 %v5812_v37  ;;  %5533 = vmatprep.subr.bf16.mxu0 %v5819_v3 }
 0x731   : > { %v5517_v6 = vpop.f32.mrb[104].mxu0  ;;  %3766 = vmatpush1.bf16.msra.mxu1 %v5810_v63  ;;  %5534 = vmatpush3.bf16.msra.mxu0 %v5819_v3 }
 0x732   : > { %v3094_v10 = vadd.f32 %v5517_v6, %v7165_v27  ;;  %v3085_v23 = vpop.f32.mrb[105].mxu0  ;;  %3767 = vmatprep.subr.bf16.mxu1 %v5817_v4  ;;  %5535 = vmatprep.subr.bf16.mxu0 %v5823_v5 }
 0x733   : > { %v3086_v52 = vadd.f32 %v7165_v27, %v3085_v23  ;;  %v5518_v55 = vpop.f32.mrb[106].mxu0  ;;  %3592 = vmatmul.mubr.bf16.gmra.mrb[108].mxu1 %v7223_v34  ;;  %3705 = vmatmul.mubr.bf16.gmra.mrb[124].mxu0 %v7223_v34 }
 0x734   : > { %v3097_v7 = vadd.f32 %v5518_v55, %v7165_v27  ;;  %v3088_v20 = vpop.f32.mrb[107].mxu0  ;;  %3601 = vmatprep.mubr.bf16.mxu1 %v6315_v57  ;;  %3714 = vmatprep.mubr.bf16.mxu0 %v6315_v57  ;;  %v3126_v47 = vmax.f32 %v3094_v10, 0.0 }
 0x735   : > { %v3089_v12 = vadd.f32 %v7165_v27, %v3088_v20  ;;  %3768 = vmatpush1.bf16.msra.mxu1 %v5815_v21  ;;  %5536 = vmatpush3.bf16.msra.mxu0 %v5823_v5  ;;  %v3124_v25 = vmax.f32 %v3086_v52, 0.0 }
 0x736   : > { %v3127_v24 = vmax.f32 %v3097_v7, 0.0  ;;  %3769 = vmatprep.subr.bf16.mxu1 %v5822_v18  ;;  %5537 = vmatprep.subr.bf16.mxu0 %v5824_v13 }
 0x737   : > { %v3125_v36 = vmax.f32 %v3089_v12, 0.0 }
 0x738   : > { %v3137_v28 = vpack.c.bf16 %v3127_v24, %v3126_v47 }
 0x739   : > { %v3136_v8 = vpack.c.bf16 %v3125_v36, %v3124_v25  ;;  %3770 = vmatpush1.bf16.msra.mxu1 %v5820_v15  ;;  %5538 = vmatpush3.bf16.msra.mxu0 %v5824_v13 }
 0x73b   : > { %3602 = vmatmul.mubr.bf16.gmra.mrb[112].mxu1 %v3136_v8  ;;  %3715 = vmatmul.mubr.bf16.gmra.mrb[128].mxu0 %v3136_v8 }
 0x73c   : > { %3611 = vmatprep.mubr.bf16.mxu1 %v6315_v57  ;;  %3724 = vmatprep.mubr.bf16.mxu0 %v6315_v57 }
 0x741   : > { %v5521_v30 = vpop.f32.mrb[108].mxu0 }
 0x742   : > { %v3110_v44 = vadd.f32 %v5521_v30, %v7165_v27  ;;  %v3101_v31 = vpop.f32.mrb[109].mxu0 }
 0x743   : > { %v3102_v33 = vadd.f32 %v7165_v27, %v3101_v31  ;;  %v5522_v39 = vpop.f32.mrb[110].mxu0  ;;  %3612 = vmatmul.mubr.bf16.gmra.mrb[116].mxu1 %v3137_v28  ;;  %3725 = vmatmul.mubr.bf16.gmra.mrb[132].mxu0 %v3137_v28 }
 0x744   : > { %v3113_v32 = vadd.f32 %v5522_v39, %v7165_v27  ;;  %v3104_v35 = vpop.f32.mrb[111].mxu0  ;;  %3621 = vmatprep.mubr.bf16.mxu1 %v6315_v57  ;;  %3734 = vmatprep.mubr.bf16.mxu0 %v6315_v57  ;;  %v3130_v38 = vmax.f32 %v3110_v44, 0.0 }
 0x745   : > { %v3105_v62 = vadd.f32 %v7165_v27, %v3104_v35  ;;  %v3128_v41 = vmax.f32 %v3102_v33, 0.0  ;;  %v3206_v27 = vlaneseq }
 0x746   : > { %v3131_v1 = vmax.f32 %v3113_v32, 0.0 }
 0x747   : > { %v3129_v43 = vmax.f32 %v3105_v62, 0.0 }
 0x748   : > { %v3139_v54 = vpack.c.bf16 %v3131_v1, %v3130_v38 }
 0x749   : > { %v3138_v45 = vpack.c.bf16 %v3129_v43, %v3128_v41 }
 0x74b   : > { %3622 = vmatmul.mubr.bf16.gmra.mrb[120].mxu1 %v3138_v45  ;;  %3735 = vmatmul.mubr.bf16.gmra.mrb[136].mxu0 %v3138_v45 }
 0x74c   : > { %3631 = vmatprep.mubr.bf16.mxu1 %v6315_v57  ;;  %3744 = vmatprep.mubr.bf16.mxu0 %v6315_v57 }
 0x753   : > { %3632 = vmatmul.mubr.bf16.gmra.mrb[124].mxu1 %v3139_v54  ;;  %3745 = vmatmul.mubr.bf16.gmra.mrb[140].mxu0 %v3139_v54 }
 0x754   : > { %5539 = vmatprep.mubr.bf16.mxu0 %v7176_v42  ;;  %3787 = vmatprep.mubr.bf16.mxu1 %v6315_v57 }
 0x75b   : > { %3788 = vmatmul.mubr.bf16.vlgmr.msra.gmra.mrb[128].mxu1 %v7176_v42  ;;  %5540 = vmatmul.mubr.bf16.vlgmr.msra.gmra.mrb[144].mxu0 %v7171_v40 }
 0x75c   : > { %5543 = vmatprep.mubr.bf16.mxu0 %v7225_v58  ;;  %3797 = vmatprep.mubr.bf16.mxu1 %v6315_v57 }
 0x763   : > { %3798 = vmatmul.mubr.bf16.gmra.mrb[132].mxu1 %v7171_v40  ;;  %5544 = vmatmul.mubr.bf16.gmra.mrb[148].mxu0 %v7223_v34  ;;  %v7295_v40 = vshrl.u32 %v3206_v27, 7 }
 0x764   : > { %5547 = vmatprep.mubr.bf16.mxu0 %v3136_v8  ;;  %3807 = vmatprep.mubr.bf16.mxu1 %v6315_v57 }
 0x765   : > { %v3208_v42 = vsub.s32 0, %v7295_v40  ;;  %v3216_v11 = vsub.s32 2, %v7295_v40  ;;  %v3212_v46 = vsub.s32 1, %v7295_v40  ;;  %v3220_v48 = vsub.s32 3, %v7295_v40 }
 0x767   : > { %v7304_v49 = vrot.slane %v3204_v29, %v3208_v42  ;;  %v7306_v16 = vrot.slane %v3204_v29, %v3216_v11  ;;  %v7310_v51 = vrot.slane %v3204_v29, %v3220_v48 }
 0x76b   : > { %3808 = vmatmul.mubr.bf16.gmra.mrb[136].mxu1 %v7225_v58  ;;  %5548 = vmatmul.mubr.bf16.gmra.mrb[152].mxu0 %v3137_v28 }
 0x76c   : > { %5551 = vmatprep.mubr.bf16.mxu0 %v3138_v45  ;;  %3817 = vmatprep.mubr.bf16.mxu1 %v6315_v57 }
 0x773   : > { %3818 = vmatmul.mubr.bf16.gmra.mrb[140].mxu1 %v7223_v34  ;;  %5552 = vmatmul.mubr.bf16.gmra.mrb[156].mxu0 %v3139_v54 }
 0x774   : > { %3827 = vmatprep.mubr.bf16.mxu1 %v6315_v57 }
 0x77b   : > { %3828 = vmatmul.mubr.bf16.gmra.mrb[144].mxu1 %v3136_v8 }
 0x77c   : > { %3837 = vmatprep.mubr.bf16.mxu1 %v6315_v57 }
 0x783   : > { %3838 = vmatmul.mubr.bf16.gmra.mrb[148].mxu1 %v3137_v28 }
 0x784   : > { %3847 = vmatprep.mubr.bf16.mxu1 %v6315_v57 }
 0x78b   : > { %3848 = vmatmul.mubr.bf16.gmra.mrb[152].mxu1 %v3138_v45 }
 0x78c   : > { %3857 = vmatprep.mubr.bf16.mxu1 %v6315_v57  ;;  %v7308_v57 = vrot.slane %v3204_v29, %v3212_v46 }
 0x793   : > { %3858 = vmatmul.mubr.bf16.gmra.mrb[156].mxu1 %v3139_v54 }
 0x7ed   : > { %v3563_v50 = vpop.f32.mrb[96].mxu1  ;;  %v3676_v59 = vpop.f32.mrb[112].mxu0 }
 0x7ee   : > { %v3564_v53 = vadd.f32 %v3563_v50, %v7304_v49  ;;  %v3677_v19 = vadd.f32 %v3676_v59, %v7306_v16  ;;  %v3565_v56 = vpop.f32.mrb[97].mxu1  ;;  %v3678_v60 = vpop.f32.mrb[113].mxu0 }
 0x7ef   : > { %v3566_v26 = vadd.f32 %v3565_v56, %v7308_v57  ;;  %v3679_v61 = vadd.f32 %v3678_v60, %v7310_v51  ;;  %v3567_v14 = vpop.f32.mrb[98].mxu1  ;;  %v3680_v9 = vpop.f32.mrb[114].mxu0 }
 0x7f0   : > { %v3965_v17 = vsub.f32 0.0, %v3564_v53  ;;  %v3967_v22 = vsub.f32 0.0, %v3677_v19  ;;  %v3568_v0 = vadd.f32 %v3567_v14, %v7304_v49  ;;  %v3681_v34 = vadd.f32 %v3680_v9, %v7306_v16  ;;  %v3569_v58 = vpop.f32.mrb[99].mxu1  ;;  %v3682_v2 = vpop.f32.mrb[115].mxu0 }
 0x7f1   : > { %v3966_v37 = vsub.f32 0.0, %v3566_v26  ;;  %v3968_v3 = vsub.f32 0.0, %v3679_v61  ;;  %v3570_v63 = vadd.f32 %v3569_v58, %v7308_v57  ;;  %v3683_v4 = vadd.f32 %v3682_v2, %v7310_v51 }
 0x7f2   : > { %v4077_v5 = vmul.f32 1.442695, %v3965_v17  ;;  %v4081_v6 = vmul.f32 1.442695, %v3967_v22  ;;  %v3972_v21 = vsub.f32 0.0, %v3568_v0  ;;  %v3974_v10 = vsub.f32 0.0, %v3681_v34 }
 0x7f3   : > { %v4079_v23 = vmul.f32 1.442695, %v3966_v37  ;;  %v4083_v18 = vmul.f32 1.442695, %v3968_v3  ;;  %v3973_v13 = vsub.f32 0.0, %v3570_v63  ;;  %v3975_v52 = vsub.f32 0.0, %v3683_v4 }
 0x7f4   : > { %5857 = vpow2.f32 %v4077_v5  ;;  %v4091_v55 = vmul.f32 1.442695, %v3972_v21  ;;  %v4095_v7 = vmul.f32 1.442695, %v3974_v10 }
 0x7f5   : > { %5859 = vpow2.f32 %v4081_v6  ;;  %v3573_v20 = vpop.f32.mrb[100].mxu1  ;;  %v3686_v12 = vpop.f32.mrb[116].mxu0  ;;  %v4093_v15 = vmul.f32 1.442695, %v3973_v13  ;;  %v4097_v28 = vmul.f32 1.442695, %v3975_v52 }
 0x7f6   : > { %5861 = vpow2.f32 %v4079_v23  ;;  %v3574_v47 = vadd.f32 %v3573_v20, %v7304_v49  ;;  %v3687_v24 = vadd.f32 %v3686_v12, %v7306_v16  ;;  %v3575_v25 = vpop.f32.mrb[101].mxu1  ;;  %v3688_v36 = vpop.f32.mrb[117].mxu0 }
 0x7f7   : > { %5863 = vpow2.f32 %v4083_v18  ;;  %v3576_v8 = vadd.f32 %v3575_v25, %v7308_v57  ;;  %v3689_v30 = vadd.f32 %v3688_v36, %v7310_v51  ;;  %v3577_v44 = vpop.f32.mrb[102].mxu1  ;;  %v3690_v31 = vpop.f32.mrb[118].mxu0 }
 0x7f8   : > { %5865 = vpow2.f32 %v4091_v55  ;;  %v3979_v33 = vsub.f32 0.0, %v3574_v47  ;;  %v3981_v39 = vsub.f32 0.0, %v3687_v24  ;;  %v3578_v32 = vadd.f32 %v3577_v44, %v7304_v49  ;;  %v3579_v35 = vpop.f32.mrb[103].mxu1  ;;  %v3692_v62 = vpop.f32.mrb[119].mxu0 }
 0x7f9   : > { %5867 = vpow2.f32 %v4095_v7  ;;  %v3980_v38 = vsub.f32 0.0, %v3576_v8  ;;  %v3982_v1 = vsub.f32 0.0, %v3689_v30  ;;  %v3691_v29 = vadd.f32 %v3690_v31, %v7306_v16 }
 0x7fa   : > { %5869 = vpow2.f32 %v4093_v15  ;;  %v4105_v41 = vmul.f32 1.442695, %v3979_v33  ;;  %v4109_v43 = vmul.f32 1.442695, %v3981_v39  ;;  %v3986_v54 = vsub.f32 0.0, %v3578_v32 }
 0x7fb   : > { %5871 = vpow2.f32 %v4097_v28  ;;  %v4107_v45 = vmul.f32 1.442695, %v3980_v38  ;;  %v4111_v27 = vmul.f32 1.442695, %v3982_v1  ;;  %v3580_v26 = vadd.f32 %v3579_v35, %v7308_v57 }
 0x7fc   : > { %5873 = vpow2.f32 %v4105_v41  ;;  %v4119_v42 = vmul.f32 1.442695, %v3986_v54  ;;  %v3988_v58 = vsub.f32 0.0, %v3691_v29  ;;  %v3693_v63 = vadd.f32 %v3692_v62, %v7310_v51 }
 0x7fd   : > { %5875 = vpow2.f32 %v4109_v43  ;;  %v3987_v6 = vsub.f32 0.0, %v3580_v26 }
 0x7fe   : > { %v5858_v11 = vpop.eup %5857  ;;  %5877 = vpow2.f32 %v4107_v45  ;;  %v3583_v46 = vpop.f32.mrb[104].mxu1  ;;  %v4123_v52 = vmul.f32 1.442695, %v3988_v58  ;;  %v3989_v15 = vsub.f32 0.0, %v3693_v63 }
 0x7ff   : > { %v3696_v48 = vpop.f32.mrb[120].mxu0  ;;  %v5860_v50 = vpop.eup %5859  ;;  %v4301_v59 = vadd.f32 1.0, %v5858_v11  ;;  %5879 = vpow2.f32 %v4111_v27  ;;  %v3584_v23 = vadd.f32 %v3583_v46, %v7304_v49  ;;  %v4121_v8 = vmul.f32 1.442695, %v3987_v6 }
 0x800   : > { %v3585_v53 = vpop.f32.mrb[105].mxu1  ;;  %v3698_v19 = vpop.f32.mrb[121].mxu0  ;;  %v4303_v60 = vadd.f32 1.0, %v5860_v50  ;;  %5881 = vpow2.f32 %v4119_v42  ;;  %v3697_v55 = vadd.f32 %v3696_v48, %v7306_v16  ;;  %v4125_v48 = vmul.f32 1.442695, %v3989_v15 }
 0x801   : > { %v5862_v56 = vpop.eup %5861  ;;  %v3587_v61 = vpop.f32.mrb[106].mxu1  ;;  %5883 = vrcp.f32 %v4301_v59  ;;  %v3586_v47 = vadd.f32 %v3585_v53, %v7308_v57  ;;  %v3699_v30 = vadd.f32 %v3698_v19, %v7310_v51  ;;  %v3993_v32 = vsub.f32 0.0, %v3584_v23 }
 0x802   : > { %v5864_v14 = vpop.eup %5863  ;;  %v4302_v9 = vadd.f32 1.0, %v5862_v56  ;;  %v3700_v17 = vpop.f32.mrb[122].mxu0  ;;  %5885 = vrcp.f32 %v4303_v60  ;;  %v3588_v35 = vadd.f32 %v3587_v61, %v7304_v49  ;;  %v3995_v41 = vsub.f32 0.0, %v3697_v55 }
 0x803   : > { %v3589_v22 = vpop.f32.mrb[107].mxu1  ;;  %v5866_v0 = vpop.eup %5865  ;;  %v4304_v34 = vadd.f32 1.0, %v5864_v14  ;;  %v3701_v43 = vadd.f32 %v3700_v17, %v7306_v16  ;;  %v3994_v11 = vsub.f32 0.0, %v3586_v47  ;;  %v3996_v50 = vsub.f32 0.0, %v3699_v30 }
 0x804   : > { %v3702_v2 = vpop.f32.mrb[123].mxu0  ;;  %v5868_v37 = vpop.eup %5867  ;;  %5887 = vrcp.f32 %v4302_v9  ;;  %v4308_v3 = vadd.f32 1.0, %v5866_v0  ;;  %v3590_v29 = vadd.f32 %v3589_v22, %v7308_v57  ;;  %v4133_v19 = vmul.f32 1.442695, %v3993_v32 }
 0x805   : > { %v5870_v4 = vpop.eup %5869  ;;  %5889 = vrcp.f32 %v4304_v34  ;;  %v4310_v5 = vadd.f32 1.0, %v5868_v37  ;;  %v3703_v59 = vadd.f32 %v3702_v2, %v7310_v51  ;;  %v4000_v56 = vsub.f32 0.0, %v3588_v35 }
 0x806   : > { %v5872_v21 = vpop.eup %5871  ;;  %5891 = vrcp.f32 %v4308_v3  ;;  %v4309_v10 = vadd.f32 1.0, %v5870_v4  ;;  %v3593_v7 = vpop.f32.mrb[108].mxu1  ;;  %v4137_v61 = vmul.f32 1.442695, %v3995_v41  ;;  %v4002_v14 = vsub.f32 0.0, %v3701_v43 }
 0x807   : > { %v5874_v18 = vpop.eup %5873  ;;  %5893 = vrcp.f32 %v4310_v5  ;;  %v4311_v13 = vadd.f32 1.0, %v5872_v21  ;;  %v3706_v24 = vpop.f32.mrb[124].mxu0  ;;  %v3594_v60 = vadd.f32 %v3593_v7, %v7304_v49  ;;  %v4135_v34 = vmul.f32 1.442695, %v3994_v11 }
 0x808   : > { %v5876_v20 = vpop.eup %5875  ;;  %5895 = vrcp.f32 %v4309_v10  ;;  %v4315_v12 = vadd.f32 1.0, %v5874_v18  ;;  %v7332_v25 = vpop.f32.mrb[109].mxu1  ;;  %v3707_v9 = vadd.f32 %v3706_v24, %v7306_v16  ;;  %v4001_v58 = vsub.f32 0.0, %v3590_v29 }
 0x809   : > { %v5878_v36 = vpop.eup %5877  ;;  %5897 = vrcp.f32 %v4311_v13  ;;  %v4317_v28 = vadd.f32 1.0, %v5876_v20  ;;  %v7335_v44 = vpop.f32.mrb[125].mxu0  ;;  %v4139_v3 = vmul.f32 1.442695, %v3996_v50  ;;  %v4003_v63 = vsub.f32 0.0, %v3703_v59 }
 0x80a   : > { %v7337_v31 = vpop.f32.mrb[110].mxu1  ;;  %v5880_v33 = vpop.eup %5879  ;;  %5899 = vrcp.f32 %v4315_v12  ;;  %v4316_v39 = vadd.f32 1.0, %v5878_v36  ;;  %v4147_v21 = vmul.f32 1.442695, %v4000_v56  ;;  %v4007_v10 = vsub.f32 0.0, %v3594_v60 }
 0x80b   : > { %v7345_v62 = vpop.f32.mrb[126].mxu0  ;;  %v5882_v38 = vpop.eup %5881  ;;  %5901 = vrcp.f32 %v4317_v28  ;;  %v4318_v1 = vadd.f32 1.0, %v5880_v33  ;;  %v4009_v55 = vsub.f32 0.0, %v3707_v9  ;;  %v4149_v12 = vmul.f32 1.442695, %v4001_v58 }
 0x80c   : > { %v7348_v54 = vpop.f32.mrb[111].mxu1  ;;  %v7350_v45 = vpop.f32.mrb[127].mxu0  ;;  %5903 = vrcp.f32 %v4316_v39  ;;  %v4322_v42 = vadd.f32 1.0, %v5882_v38  ;;  %v4153_v47 = vmul.f32 1.442695, %v4003_v63 }
 0x80d   : > { %v5884_v27 = vpop.eup %5883  ;;  %5905 = vrcp.f32 %v4318_v1  ;;  %v4161_v36 = vmul.f32 1.442695, %v4007_v10  ;;  %v3596_v1 = vadd.f32 %v7332_v25, %v7308_v57  ;;  %v3709_v25 = vadd.f32 %v7335_v44, %v7310_v51 }
 0x80e   : > { %v5886_v46 = vpop.eup %5885  ;;  %4525 = vst [vmem:[%s7342_s29] sm:$0xff] %v5884_v27  ;;  %5907 = vrcp.f32 %v4322_v42  ;;  %v7359_v17 = vpop.f32.mrb[112].mxu1 }
 0x80f   : > { %v5888_v53 = vpop.eup %5887  ;;  %4527 = vst [vmem:[%s7342_s29 + $0x10] sm:$0xff] %v5886_v46  ;;  %5909 = vpow2.f32 %v4123_v52  ;;  %v7361_v22 = vpop.f32.mrb[128].mxu0  ;;  %v4151_v52 = vmul.f32 1.442695, %v4002_v14  ;;  %v4008_v56 = vsub.f32 0.0, %v3596_v1 }
 0x810   : > { %v5890_v26 = vpop.eup %5889  ;;  %4526 = vst [vmem:[%s7342_s29 + $0x8] sm:$0xff] %v5888_v53  ;;  %5911 = vpow2.f32 %v4121_v8  ;;  %v7364_v2 = vpop.f32.mrb[113].mxu1  ;;  %v4165_v8 = vmul.f32 1.442695, %v4009_v55 }
 0x811   : > { %v5892_v0 = vpop.eup %5891  ;;  %4528 = vst [vmem:[%s7342_s29 + $0x18] sm:$0xff] %v5890_v26  ;;  %5913 = vpow2.f32 %v4125_v48  ;;  %v7367_v4 = vpop.f32.mrb[129].mxu0  ;;  %v4163_v10 = vmul.f32 1.442695, %v4008_v56 }
 0x812   : > { %v5894_v37 = vpop.eup %5893  ;;  %4532 = vst [vmem:[%s7342_s29 + $0x38] sm:$0xff] %v5892_v0  ;;  %v7369_v5 = vpop.f32.mrb[114].mxu1  ;;  %5915 = vpow2.f32 %v4133_v19  ;;  %v3711_v0 = vadd.f32 %v7345_v62, %v7306_v16 }
 0x813   : > { %v5896_v6 = vpop.eup %5895  ;;  %4534 = vst [vmem:[%s7342_s29 + $0x48] sm:$0xff] %v5894_v37  ;;  %v7372_v23 = vpop.f32.mrb[130].mxu0  ;;  %5917 = vpow2.f32 %v4137_v61  ;;  %v3598_v61 = vadd.f32 %v7337_v31, %v7304_v49  ;;  %v3608_v56 = vadd.f32 %v7369_v5, %v7304_v49 }
 0x814   : > { %v7374_v18 = vpop.f32.mrb[115].mxu1  ;;  %v5898_v13 = vpop.eup %5897  ;;  %4533 = vst [vmem:[%s7342_s29 + $0x40] sm:$0xff] %v5896_v6  ;;  %5919 = vpow2.f32 %v4135_v34 }
 0x815   : > { %v7377_v7 = vpop.f32.mrb[131].mxu0  ;;  %v5900_v20 = vpop.eup %5899  ;;  %4535 = vst [vmem:[%s7342_s29 + $0x50] sm:$0xff] %v5898_v13  ;;  %5921 = vpow2.f32 %v4139_v3  ;;  %v4010_v3 = vsub.f32 0.0, %v3709_v25  ;;  %v3600_v13 = vadd.f32 %v7348_v54, %v7308_v57  ;;  %v3604_v54 = vadd.f32 %v7359_v17, %v7304_v49 }
 0x816   : > { %v5902_v15 = vpop.eup %5901  ;;  %4539 = vst [vmem:[%s7342_s29 + $0x70] sm:$0xff] %v5900_v20  ;;  %5923 = vpow2.f32 %v4147_v21  ;;  %v7383_v30 = vpop.f32.mrb[116].mxu1  ;;  %v3719_v25 = vadd.f32 %v7367_v4, %v7310_v51  ;;  %v3721_v4 = vadd.f32 %v7372_v23, %v7306_v16 }
 0x817   : > { %v5904_v24 = vpop.eup %5903  ;;  %4541 = vst [vmem:[%s7342_s29 + $0x80] sm:$0xff] %v5902_v15  ;;  %5925 = vpow2.f32 %v4151_v52  ;;  %v7385_v33 = vpop.f32.mrb[132].mxu0  ;;  %v3713_v15 = vadd.f32 %v7350_v45, %v7310_v51  ;;  %v4167_v1 = vmul.f32 1.442695, %v4010_v3  ;;  %v3610_v3 = vadd.f32 %v7374_v18, %v7308_v57 }
 0x818   : > { %v5906_v28 = vpop.eup %5905  ;;  %4540 = vst [vmem:[%s7342_s29 + $0x78] sm:$0xff] %v5904_v24  ;;  %5927 = vpow2.f32 %v4149_v12  ;;  %v7388_v32 = vpop.f32.mrb[117].mxu1  ;;  %v4014_v12 = vsub.f32 0.0, %v3598_v61 }
 0x819   : > { %v5908_v39 = vpop.eup %5907  ;;  %4542 = vst [vmem:[%s7342_s29 + $0x88] sm:$0xff] %v5906_v28  ;;  %v7390_v35 = vpop.f32.mrb[133].mxu0  ;;  %5929 = vpow2.f32 %v4153_v47  ;;  %v4016_v28 = vsub.f32 0.0, %v3711_v0 }
 0x81a   : > { %v5910_v38 = vpop.eup %5909  ;;  %4546 = vst [vmem:[%s7342_s29 + $0xa8] sm:$0xff] %v5908_v39  ;;  %v7395_v41 = vpop.f32.mrb[118].mxu1  ;;  %5931 = vpow2.f32 %v4161_v36 }
 0x81b   : > { %v7397_v43 = vpop.f32.mrb[134].mxu0  ;;  %v5912_v27 = vpop.eup %5911  ;;  %v4324_v42 = vadd.f32 1.0, %v5910_v38  ;;  %5933 = vpow2.f32 %v4165_v8  ;;  %v4179_v61 = vmul.f32 1.442695, %v4016_v28  ;;  %v4030_v28 = vsub.f32 0.0, %v3721_v4 }
 0x81c   : > { %v7399_v11 = vpop.f32.mrb[119].mxu1  ;;  %v7401_v29 = vpop.f32.mrb[135].mxu0  ;;  %v4323_v48 = vadd.f32 1.0, %v5912_v27  ;;  %v3717_v27 = vadd.f32 %v7361_v22, %v7306_v16  ;;  %v4175_v22 = vmul.f32 1.442695, %v4014_v12 }
 0x81d   : > { %v5914_v46 = vpop.eup %5913  ;;  %5935 = vrcp.f32 %v4324_v42 }
 0x81e   : > { %v5916_v50 = vpop.eup %5915  ;;  %v4325_v59 = vadd.f32 1.0, %v5914_v46  ;;  %5937 = vrcp.f32 %v4323_v48  ;;  %v7409_v34 = vpop.f32.mrb[120].mxu1  ;;  %v4015_v46 = vsub.f32 0.0, %v3600_v13  ;;  %v3606_v48 = vadd.f32 %v7364_v2, %v7308_v57 }
 0x81f   : > { %v5918_v53 = vpop.eup %5917  ;;  %v4329_v19 = vadd.f32 1.0, %v5916_v50  ;;  %v7411_v58 = vpop.f32.mrb[136].mxu0 }
 0x820   : > { %v5920_v60 = vpop.eup %5919  ;;  %5939 = vrcp.f32 %v4325_v59  ;;  %v4331_v26 = vadd.f32 1.0, %v5918_v53  ;;  %v7413_v63 = vpop.f32.mrb[121].mxu1  ;;  %v4017_v59 = vsub.f32 0.0, %v3713_v15  ;;  %v4177_v5 = vmul.f32 1.442695, %v4015_v46 }
 0x821   : > { %v5922_v14 = vpop.eup %5921  ;;  %5941 = vrcp.f32 %v4329_v19  ;;  %v4330_v9 = vadd.f32 1.0, %v5920_v60  ;;  %v7415_v6 = vpop.f32.mrb[137].mxu0  ;;  %v4021_v19 = vsub.f32 0.0, %v3604_v54  ;;  %v4028_v15 = vsub.f32 0.0, %v3608_v56 }
 0x822   : > { %v5924_v44 = vpop.eup %5923  ;;  %5943 = vrcp.f32 %v4331_v26  ;;  %v4332_v37 = vadd.f32 1.0, %v5922_v14  ;;  %v7419_v62 = vpop.f32.mrb[122].mxu1  ;;  %v4023_v14 = vsub.f32 0.0, %v3717_v27  ;;  %v4181_v23 = vmul.f32 1.442695, %v4017_v59 }
 0x823   : > { %v5926_v21 = vpop.eup %5925  ;;  %5945 = vrcp.f32 %v4330_v9  ;;  %v4336_v31 = vadd.f32 1.0, %v5924_v44  ;;  %v7421_v52 = vpop.f32.mrb[138].mxu0  ;;  %v4189_v18 = vmul.f32 1.442695, %v4021_v19 }
 0x824   : > { %v5928_v55 = vpop.eup %5927  ;;  %5947 = vrcp.f32 %v4332_v37  ;;  %v4338_v20 = vadd.f32 1.0, %v5926_v21  ;;  %v7425_v47 = vpop.f32.mrb[123].mxu1  ;;  %v4022_v37 = vsub.f32 0.0, %v3606_v48 }
 0x825   : > { %v5930_v24 = vpop.eup %5929  ;;  %5949 = vrcp.f32 %v4336_v31  ;;  %v4337_v36 = vadd.f32 1.0, %v5928_v55  ;;  %v7429_v8 = vpop.f32.mrb[139].mxu0  ;;  %v4024_v55 = vsub.f32 0.0, %v3719_v25 }
 0x826   : > { %v5932_v39 = vpop.eup %5931  ;;  %5951 = vrcp.f32 %v4338_v20  ;;  %v4339_v38 = vadd.f32 1.0, %v5930_v24  ;;  %v7440_v60 = vpop.f32.mrb[124].mxu1 }
 0x827   : > { %v5934_v45 = vpop.eup %5933  ;;  %5953 = vrcp.f32 %v4337_v36  ;;  %v4343_v42 = vadd.f32 1.0, %v5932_v39  ;;  %v7442_v26 = vpop.f32.mrb[140].mxu0  ;;  %v4193_v36 = vmul.f32 1.442695, %v4023_v14  ;;  %v4191_v39 = vmul.f32 1.442695, %v4022_v37 }
 0x828   : > { %v5936_v50 = vpop.eup %5935  ;;  %5955 = vrcp.f32 %v4339_v38  ;;  %v4345_v17 = vadd.f32 1.0, %v5934_v45  ;;  %v7447_v9 = vpop.f32.mrb[125].mxu1  ;;  %v4029_v38 = vsub.f32 0.0, %v3610_v3  ;;  %v4195_v27 = vmul.f32 1.442695, %v4024_v55 }
 0x829   : > { %v5938_v53 = vpop.eup %5937  ;;  %4548 = vst [vmem:[%s7342_s29 + $0xb8] sm:$0xff] %v5936_v50  ;;  %5957 = vrcp.f32 %v4343_v42  ;;  %v7449_v0 = vpop.f32.mrb[141].mxu0  ;;  %v4203_v42 = vmul.f32 1.442695, %v4028_v15 }
 0x82a   : > { %v5940_v2 = vpop.eup %5939  ;;  %4547 = vst [vmem:[%s7342_s29 + $0xb0] sm:$0xff] %v5938_v53  ;;  %5959 = vrcp.f32 %v4345_v17  ;;  %v7454_v21 = vpop.f32.mrb[126].mxu1  ;;  %v4207_v17 = vmul.f32 1.442695, %v4030_v28 }
 0x82b   : > { %v5942_v44 = vpop.eup %5941  ;;  %4549 = vst [vmem:[%s7342_s29 + $0xc0] sm:$0xff] %v5940_v2  ;;  %5961 = vpow2.f32 %v4163_v10  ;;  %v7456_v31 = vpop.f32.mrb[142].mxu0 }
 0x82c   : > { %v5944_v13 = vpop.eup %5943  ;;  %4553 = vst [vmem:[%s7342_s29 + $0xe0] sm:$0xff] %v5942_v44  ;;  %5963 = vpow2.f32 %v4167_v1  ;;  %v7459_v20 = vpop.f32.mrb[127].mxu1  ;;  %v3723_v44 = vadd.f32 %v7377_v7, %v7310_v51 }
 0x82d   : > { %v7461_v12 = vpop.f32.mrb[143].mxu0  ;;  %v5946_v10 = vpop.eup %5945  ;;  %4555 = vst [vmem:[%s7342_s29 + $0xf0] sm:$0xff] %v5944_v13  ;;  %5965 = vpow2.f32 %v4175_v22  ;;  %v4205_v22 = vmul.f32 1.442695, %v4029_v38 }
 0x82e   : > { %v5948_v24 = vpop.eup %5947  ;;  %4554 = vst [vmem:[%s7342_s29 + $0xe8] sm:$0xff] %v5946_v10  ;;  %5967 = vpow2.f32 %v4179_v61  ;;  %v7468_v46 = vpop.f32.mrb[128].mxu1  ;;  %v3614_v10 = vadd.f32 %v7383_v30, %v7304_v49 }
 0x82f   : > { %v5950_v54 = vpop.eup %5949  ;;  %4556 = vst [vmem:[%s7342_s29 + $0xf8] sm:$0xff] %v5948_v24  ;;  %5969 = vpow2.f32 %v4177_v5  ;;  %v7470_v48 = vpop.f32.mrb[144].mxu0  ;;  %v4031_v24 = vsub.f32 0.0, %v3723_v44 }
 0x830   : > { %v5952_v1 = vpop.eup %5951  ;;  %4560 = vst [vmem:[%s7342_s29 + $0x118] sm:$0xff] %v5950_v54  ;;  %5971 = vpow2.f32 %v4181_v23  ;;  %v7473_v59 = vpop.f32.mrb[129].mxu1 }
 0x831   : > { %v5954_v45 = vpop.eup %5953  ;;  %4562 = vst [vmem:[%s7342_s29 + $0x128] sm:$0xff] %v5952_v1  ;;  %5973 = vpow2.f32 %v4189_v18  ;;  %v7475_v25 = vpop.f32.mrb[145].mxu0 }
 0x832   : > { %v5956_v50 = vpop.eup %5955  ;;  %4561 = vst [vmem:[%s7342_s29 + $0x120] sm:$0xff] %v5954_v45  ;;  %5975 = vpow2.f32 %v4193_v36  ;;  %v7478_v19 = vpop.f32.mrb[130].mxu1  ;;  %v3616_v45 = vadd.f32 %v7388_v32, %v7308_v57 }
 0x833   : > { %v5958_v53 = vpop.eup %5957  ;;  %4563 = vst [vmem:[%s7342_s29 + $0x130] sm:$0xff] %v5956_v50  ;;  %5977 = vpow2.f32 %v4191_v39  ;;  %v7480_v56 = vpop.f32.mrb[146].mxu0  ;;  %v3727_v39 = vadd.f32 %v7385_v33, %v7306_v16 }
 0x834   : > { %v5960_v2 = vpop.eup %5959  ;;  %4567 = vst [vmem:[%s7342_s29 + $0x150] sm:$0xff] %v5958_v53  ;;  %5979 = vpow2.f32 %v4195_v27  ;;  %v7483_v61 = vpop.f32.mrb[131].mxu1 }
 0x835   : > { %v7485_v14 = vpop.f32.mrb[147].mxu0  ;;  %v5962_v4 = vpop.eup %5961  ;;  %4569 = vst [vmem:[%s7342_s29 + $0x160] sm:$0xff] %v5960_v2  ;;  %5981 = vpow2.f32 %v4203_v42 }
 0x836   : > { %v5964_v5 = vpop.eup %5963  ;;  %v4344_v37 = vadd.f32 1.0, %v5962_v4  ;;  %5983 = vpow2.f32 %v4207_v17  ;;  %v7492_v36 = vpop.f32.mrb[132].mxu1 }
 0x837   : > { %v5966_v3 = vpop.eup %5965  ;;  %v4346_v13 = vadd.f32 1.0, %v5964_v5  ;;  %5985 = vpow2.f32 %v4205_v22  ;;  %v7494_v28 = vpop.f32.mrb[148].mxu0  ;;  %v4035_v22 = vsub.f32 0.0, %v3614_v10  ;;  %v4209_v5 = vmul.f32 1.442695, %v4031_v24 }
 0x838   : > { %v5968_v23 = vpop.eup %5967  ;;  %5987 = vrcp.f32 %v4344_v37  ;;  %v4350_v55 = vadd.f32 1.0, %v5966_v3  ;;  %v7498_v38 = vpop.f32.mrb[133].mxu1  ;;  %v3729_v37 = vadd.f32 %v7390_v35, %v7310_v51  ;;  %v3620_v35 = vadd.f32 %v7399_v11, %v7308_v57 }
 0x839   : > { %v5970_v18 = vpop.eup %5969  ;;  %5989 = vrcp.f32 %v4346_v13  ;;  %v4352_v15 = vadd.f32 1.0, %v5968_v23  ;;  %v7500_v1 = vpop.f32.mrb[149].mxu0  ;;  %v4037_v13 = vsub.f32 0.0, %v3727_v39  ;;  %v3618_v23 = vadd.f32 %v7395_v41, %v7304_v49 }
 0x83a   : > { %v5972_v7 = vpop.eup %5971  ;;  %5991 = vrcp.f32 %v4350_v55  ;;  %v4351_v54 = vadd.f32 1.0, %v5970_v18  ;;  %v7504_v42 = vpop.f32.mrb[134].mxu1  ;;  %v4036_v18 = vsub.f32 0.0, %v3616_v45  ;;  %v3733_v41 = vadd.f32 %v7401_v29, %v7310_v51 }
 0x83b   : > { %v5974_v27 = vpop.eup %5973  ;;  %5993 = vrcp.f32 %v4352_v15  ;;  %v4353_v30 = vadd.f32 1.0, %v5972_v7  ;;  %v7506_v50 = vpop.f32.mrb[150].mxu0  ;;  %v3731_v15 = vadd.f32 %v7397_v43, %v7306_v16  ;;  %v3624_v11 = vadd.f32 %v7409_v34, %v7304_v49 }
 0x83c   : > { %v5976_v17 = vpop.eup %5975  ;;  %5995 = vrcp.f32 %v4351_v54  ;;  %v4357_v53 = vadd.f32 1.0, %v5974_v27  ;;  %v7508_v2 = vpop.f32.mrb[135].mxu1  ;;  %v4217_v54 = vmul.f32 1.442695, %v4035_v22  ;;  %v4042_v22 = vsub.f32 0.0, %v3618_v23 }
 0x83d   : > { %v7510_v33 = vpop.f32.mrb[151].mxu0  ;;  %v5978_v4 = vpop.eup %5977  ;;  %5997 = vrcp.f32 %v4353_v30  ;;  %v4359_v44 = vadd.f32 1.0, %v5976_v17  ;;  %v4038_v30 = vsub.f32 0.0, %v3729_v37  ;;  %v4221_v29 = vmul.f32 1.442695, %v4037_v13 }
 0x83e   : > { %v5980_v32 = vpop.eup %5979  ;;  %5999 = vrcp.f32 %v4357_v53  ;;  %v4358_v3 = vadd.f32 1.0, %v5978_v4  ;;  %v7522_v17 = vpop.f32.mrb[136].mxu1  ;;  %v4219_v34 = vmul.f32 1.442695, %v4036_v18  ;;  %v4231_v18 = vmul.f32 1.442695, %v4042_v22 }
 0x83f   : > { %v5982_v55 = vpop.eup %5981  ;;  %6001 = vrcp.f32 %v4359_v44  ;;  %v4360_v10 = vadd.f32 1.0, %v5980_v32  ;;  %v7524_v45 = vpop.f32.mrb[152].mxu0  ;;  %v4044_v32 = vsub.f32 0.0, %v3731_v15 }
 0x840   : > { %v5984_v7 = vpop.eup %5983  ;;  %6003 = vrcp.f32 %v4358_v3  ;;  %v4364_v24 = vadd.f32 1.0, %v5982_v55  ;;  %v7528_v4 = vpop.f32.mrb[137].mxu1  ;;  %v3737_v3 = vadd.f32 %v7411_v58, %v7306_v16  ;;  %v4223_v58 = vmul.f32 1.442695, %v4038_v30 }
 0x841   : > { %v5986_v27 = vpop.eup %5985  ;;  %6005 = vrcp.f32 %v4360_v10  ;;  %v4366_v39 = vadd.f32 1.0, %v5984_v7  ;;  %v7530_v44 = vpop.f32.mrb[153].mxu0  ;;  %v4043_v7 = vsub.f32 0.0, %v3620_v35  ;;  %v4049_v35 = vsub.f32 0.0, %v3624_v11 }
 0x842   : > { %v5988_v43 = vpop.eup %5987  ;;  %6007 = vrcp.f32 %v4364_v24  ;;  %v4365_v53 = vadd.f32 1.0, %v5986_v27  ;;  %v7535_v55 = vpop.f32.mrb[138].mxu1  ;;  %v3626_v24 = vadd.f32 %v7413_v63, %v7308_v57 }
 0x843   : > { %v5990_v37 = vpop.eup %5989  ;;  %4568 = vst [vmem:[%s7342_s29 + $0x158] sm:$0xff] %v5988_v43  ;;  %6009 = vrcp.f32 %v4366_v39  ;;  %v7537_v10 = vpop.f32.mrb[154].mxu0  ;;  %v4045_v39 = vsub.f32 0.0, %v3733_v41  ;;  %v3739_v43 = vadd.f32 %v7415_v6, %v7310_v51 }
 0x844   : > { %v5992_v23 = vpop.eup %5991  ;;  %4570 = vst [vmem:[%s7342_s29 + $0x168] sm:$0xff] %v5990_v37  ;;  %6011 = vrcp.f32 %v4365_v53  ;;  %v7542_v27 = vpop.f32.mrb[139].mxu1  ;;  %v4235_v37 = vmul.f32 1.442695, %v4044_v32  ;;  %v4050_v30 = vsub.f32 0.0, %v3626_v24 }
 0x845   : > { %v7544_v13 = vpop.f32.mrb[155].mxu0  ;;  %v5994_v15 = vpop.eup %5993  ;;  %4574 = vst [vmem:[%s7342_s29 + $0x188] sm:$0xff] %v5992_v23  ;;  %6013 = vpow2.f32 %v4209_v5  ;;  %v4233_v5 = vmul.f32 1.442695, %v4043_v7  ;;  %v4237_v6 = vmul.f32 1.442695, %v4045_v39 }
 0x846   : > { %7871 = vst [vmem:[#allocation2_spill] sm:$0xff] %v7544_v13  ;;  %v5996_v53 = vpop.eup %5995  ;;  %4576 = vst [vmem:[%s7342_s29 + $0x198] sm:$0xff] %v5994_v15  ;;  %6015 = vpow2.f32 %v4217_v54  ;;  %v4051_v13 = vsub.f32 0.0, %v3737_v3  ;;  %v4052_v15 = vsub.f32 0.0, %v3739_v43  ;;  %v7553_v54 = vpop.f32.mrb[140].mxu1 }
 0x847   : > { %v5998_v63 = vpop.eup %5997  ;;  %4575 = vst [vmem:[%s7342_s29 + $0x190] sm:$0xff] %v5996_v53  ;;  %6017 = vpow2.f32 %v4221_v29  ;;  %v7555_v22 = vpop.f32.mrb[156].mxu0  ;;  %v4245_v29 = vmul.f32 1.442695, %v4049_v35  ;;  %v4247_v43 = vmul.f32 1.442695, %v4050_v30 }
 0x848   : > { %v6000_v23 = vpop.eup %5999  ;;  %4577 = vst [vmem:[%s7342_s29 + $0x1a0] sm:$0xff] %v5998_v63  ;;  %6019 = vpow2.f32 %v4219_v34  ;;  %v7558_v32 = vpop.f32.mrb[141].mxu1  ;;  %v4249_v7 = vmul.f32 1.442695, %v4051_v13  ;;  %v4251_v63 = vmul.f32 1.442695, %v4052_v15 }
 0x849   : > { %v6002_v41 = vpop.eup %6001  ;;  %4581 = vst [vmem:[%s7342_s29 + $0x1c0] sm:$0xff] %v6000_v23  ;;  %6021 = vpow2.f32 %v4223_v58  ;;  %v7560_v3 = vpop.f32.mrb[157].mxu0 }
 0x84a   : > { %v6004_v11 = vpop.eup %6003  ;;  %4583 = vst [vmem:[%s7342_s29 + $0x1d0] sm:$0xff] %v6002_v41  ;;  %6023 = vpow2.f32 %v4231_v18  ;;  %7872 = vst [vmem:[#allocation3_spill] sm:$0xff] %v7560_v3  ;;  %v7563_v24 = vpop.f32.mrb[142].mxu1 }
 0x84b   : > { %v6006_v34 = vpop.eup %6005  ;;  %4582 = vst [vmem:[%s7342_s29 + $0x1c8] sm:$0xff] %v6004_v11  ;;  %6025 = vpow2.f32 %v4235_v37  ;;  %v7565_v58 = vpop.f32.mrb[158].mxu0  ;;  %v3628_v37 = vadd.f32 %v7419_v62, %v7304_v49 }
 0x84c   : > { %7873 = vst [vmem:[#allocation4_spill] sm:$0xff] %v7565_v58  ;;  %v6008_v39 = vpop.eup %6007  ;;  %4584 = vst [vmem:[%s7342_s29 + $0x1d8] sm:$0xff] %v6006_v34  ;;  %6027 = vpow2.f32 %v4233_v5  ;;  %v7568_v53 = vpop.f32.mrb[143].mxu1  ;;  %v3741_v34 = vadd.f32 %v7421_v52, %v7306_v16 }
 0x84d   : > { %7874 = vst [vmem:[#allocation5_spill] sm:$0xff] %v7568_v53  ;;  %v7570_v18 = vpop.f32.mrb[159].mxu0  ;;  %v6010_v35 = vpop.eup %6009  ;;  %4588 = vst [vmem:[%s7342_s29 + $0x1f8] sm:$0xff] %v6008_v39  ;;  %6029 = vpow2.f32 %v4237_v6  ;;  %v3224_v6 = vsub.s32 4, %v7295_v40 }
 0x84e   : > { %7875 = vst [vmem:[#allocation6_spill] sm:$0xff] %v7570_v18  ;;  %v6012_v23 = vpop.eup %6011  ;;  %4590 = vst [vmem:[%s7342_s29 + $0x208] sm:$0xff] %v6010_v35  ;;  %6031 = vpow2.f32 %v4245_v29  ;;  %v7580_v15 = vpop.f32.mrb[144].mxu1 }
 0x84f   : > { %v6014_v13 = vpop.eup %6013  ;;  %4589 = vst [vmem:[%s7342_s29 + $0x200] sm:$0xff] %v6012_v23  ;;  %6033 = vpow2.f32 %v4249_v7  ;;  %v3630_v7 = vadd.f32 %v7425_v47, %v7308_v57  ;;  %v7584_v62 = vpop.f32.mrb[145].mxu1  ;;  %v4056_v23 = vsub.f32 0.0, %v3628_v37  ;;  %v7596_v37 = vld [vmem:[%s7859_s17] sm:$0xff] }
 0x850   : > { %v6016_v41 = vpop.eup %6015  ;;  %v4367_v5 = vadd.f32 1.0, %v6014_v13  ;;  %6035 = vpow2.f32 %v4247_v43  ;;  %7876 = vst [vmem:[#allocation7_spill] sm:$0xff] %v7584_v62  ;;  %v4058_v62 = vsub.f32 0.0, %v3741_v34  ;;  %v3634_v34 = vadd.f32 %v7440_v60, %v7304_v49 }
 0x851   : > { %v6018_v30 = vpop.eup %6017  ;;  %v4371_v11 = vadd.f32 1.0, %v6016_v41  ;;  %6037 = vpow2.f32 %v4251_v63  ;;  %v7586_v63 = vpop.f32.mrb[146].mxu1  ;;  %v3743_v41 = vadd.f32 %v7429_v8, %v7310_v51  ;;  %v4057_v8 = vsub.f32 0.0, %v3630_v7 }
 0x852   : > { %v6020_v29 = vpop.eup %6019  ;;  %6039 = vrcp.f32 %v4367_v5  ;;  %v4373_v39 = vadd.f32 1.0, %v6018_v30  ;;  %v7591_v30 = vpop.f32.mrb[147].mxu1  ;;  %v4263_v7 = vmul.f32 1.442695, %v4058_v62 }
 0x853   : > { %v6022_v35 = vpop.eup %6021  ;;  %6041 = vrcp.f32 %v4371_v11  ;;  %v4372_v43 = vadd.f32 1.0, %v6020_v29  ;;  %7877 = vst [vmem:[#allocation8_spill] sm:$0xff] %v7591_v30  ;;  %v7599_v11 = vrot.slane %v7596_v37, %v3224_v6  ;;  %v4059_v58 = vsub.f32 0.0, %v3743_v41 }
 0x854   : > { %v6024_v13 = vpop.eup %6023  ;;  %6043 = vrcp.f32 %v4373_v39  ;;  %v4374_v52 = vadd.f32 1.0, %v6022_v35  ;;  %v3747_v6 = vadd.f32 %v7442_v26, %v7306_v16  ;;  %v4261_v60 = vmul.f32 1.442695, %v4057_v8 }
 0x855   : > { %v6026_v18 = vpop.eup %6025  ;;  %6045 = vrcp.f32 %v4372_v43  ;;  %v4378_v47 = vadd.f32 1.0, %v6024_v13  ;;  %v4259_v43 = vmul.f32 1.442695, %v4056_v23  ;;  %v3749_v41 = vadd.f32 %v7449_v0, %v7310_v51 }
 0x856   : > { %v6028_v29 = vpop.eup %6027  ;;  %6047 = vrcp.f32 %v4374_v52  ;;  %v4380_v39 = vadd.f32 1.0, %v6026_v18  ;;  %v3636_v52 = vadd.f32 %v7447_v9, %v7308_v57  ;;  %v3638_v9 = vadd.f32 %v7454_v21, %v7304_v49 }
 0x857   : > { %v6030_v5 = vpop.eup %6029  ;;  %6049 = vrcp.f32 %v4378_v47  ;;  %v4379_v30 = vadd.f32 1.0, %v6028_v29  ;;  %v7608_v47 = vpop.f32.mrb[148].mxu1  ;;  %v3751_v0 = vadd.f32 %v7456_v31, %v7306_v16  ;;  %v3640_v49 = vadd.f32 %v7459_v20, %v7308_v57 }
 0x858   : > { %v6032_v13 = vpop.eup %6031  ;;  %6051 = vrcp.f32 %v4380_v39  ;;  %v4381_v53 = vadd.f32 1.0, %v6030_v5  ;;  %v7612_v5 = vpop.f32.mrb[149].mxu1  ;;  %v4063_v39 = vsub.f32 0.0, %v3634_v34  ;;  %v4265_v34 = vmul.f32 1.442695, %v4059_v58 }
 0x859   : > { %v6034_v3 = vpop.eup %6033  ;;  %6053 = vrcp.f32 %v4379_v30  ;;  %v4385_v18 = vadd.f32 1.0, %v6032_v13  ;;  %v7616_v62 = vpop.f32.mrb[150].mxu1  ;;  %v7630_v16 = vadd.f32 %v7563_v24, %v7599_v11  ;;  %v3790_v57 = vadd.f32 %v7468_v46, %v7599_v11 }
 0x85a   : > { %v6036_v23 = vpop.eup %6035  ;;  %6055 = vrcp.f32 %v4381_v53  ;;  %v4387_v29 = vadd.f32 1.0, %v6034_v3  ;;  %v4065_v53 = vsub.f32 0.0, %v3747_v6  ;;  %v7620_v8 = vpop.f32.mrb[151].mxu1  ;;  %v4066_v6 = vsub.f32 0.0, %v3749_v41 }
 0x85b   : > { %v6038_v26 = vpop.eup %6037  ;;  %6057 = vrcp.f32 %v4385_v18  ;;  %v4386_v30 = vadd.f32 1.0, %v6036_v23  ;;  %v4064_v18 = vsub.f32 0.0, %v3636_v52  ;;  %v3753_v23 = vadd.f32 %v7461_v12, %v7310_v51 }
 0x85c   : > { %v6040_v13 = vpop.eup %6039  ;;  %6059 = vrcp.f32 %v4387_v29  ;;  %v4388_v3 = vadd.f32 1.0, %v6038_v26  ;;  %v4273_v58 = vmul.f32 1.442695, %v4063_v39  ;;  %v4070_v52 = vsub.f32 0.0, %v3638_v9 }
 0x85d   : > { %v6042_v35 = vpop.eup %6041  ;;  %4591 = vst [vmem:[%s7342_s29 + $0x210] sm:$0xff] %v6040_v13  ;;  %6061 = vrcp.f32 %v4386_v30  ;;  %v4072_v29 = vsub.f32 0.0, %v3751_v0  ;;  %v4275_v12 = vmul.f32 1.442695, %v4064_v18  ;;  %v4071_v24 = vsub.f32 0.0, %v3640_v49 }
 0x85e   : > { %v6044_v21 = vpop.eup %6043  ;;  %4595 = vst [vmem:[%s7342_s29 + $0x230] sm:$0xff] %v6042_v35  ;;  %6063 = vrcp.f32 %v4388_v3  ;;  %v4277_v35 = vmul.f32 1.442695, %v4065_v53  ;;  %v7878_v41 = vsub.s32 6, %v7295_v40  ;;  %v3849_v26 = vpop.f32.mrb[152].mxu1  ;;  %v7645_v39 = vadd.f32 %v7580_v15, %v7599_v11 }
 0x85f   : > { %v6046_v31 = vpop.eup %6045  ;;  %4597 = vst [vmem:[%s7342_s29 + $0x240] sm:$0xff] %v6044_v21  ;;  %6065 = vpow2.f32 %v4259_v43  ;;  %v4279_v46 = vmul.f32 1.442695, %v4066_v6  ;;  %v4287_v13 = vmul.f32 1.442695, %v4070_v52  ;;  %v3969_v3 = vsub.f32 0.0, %v3790_v57 }
 0x860   : > { %v6048_v20 = vpop.eup %6047  ;;  %4596 = vst [vmem:[%s7342_s29 + $0x238] sm:$0xff] %v6046_v31  ;;  %6067 = vpow2.f32 %v4263_v7  ;;  %v7640_v43 = vrot.slane %v7596_v37, %v7878_v41  ;;  %v4073_v7 = vsub.f32 0.0, %v3753_v23  ;;  %v7879_v53 = vsub.s32 5, %v7295_v40 }
 0x861   : > { %v6050_v51 = vpop.eup %6049  ;;  %4598 = vst [vmem:[%s7342_s29 + $0x248] sm:$0xff] %v6048_v20  ;;  %6069 = vpow2.f32 %v4261_v60  ;;  %v3851_v60 = vpop.f32.mrb[153].mxu1  ;;  %v4291_v15 = vmul.f32 1.442695, %v4072_v29  ;;  %v7656_v49 = vadd.f32 %v7586_v63, %v7599_v11  ;;  %v4289_v23 = vmul.f32 1.442695, %v4071_v24 }
 0x862   : > { %v6052_v30 = vpop.eup %6051  ;;  %4602 = vst [vmem:[%s7342_s29 + $0x268] sm:$0xff] %v6050_v51  ;;  %6071 = vpow2.f32 %v4265_v34  ;;  %v7651_v0 = vrot.slane %v7596_v37, %v7879_v53  ;;  %v3853_v34 = vpop.f32.mrb[154].mxu1  ;;  %v4293_v37 = vmul.f32 1.442695, %v4073_v7  ;;  %v3911_v31 = vadd.f32 %v7470_v48, %v7640_v43 }
 0x863   : > { %v6054_v9 = vpop.eup %6053  ;;  %4604 = vst [vmem:[%s7342_s29 + $0x278] sm:$0xff] %v6052_v30  ;;  %6073 = vpow2.f32 %v4273_v58  ;;  %v3855_v21 = vpop.f32.mrb[155].mxu1  ;;  %v7664_v58 = vadd.f32 %v7608_v47, %v7599_v11  ;;  %v4085_v52 = vmul.f32 1.442695, %v3969_v3 }
 0x864   : > { %v6056_v18 = vpop.eup %6055  ;;  %4603 = vst [vmem:[%s7342_s29 + $0x270] sm:$0xff] %v6054_v9  ;;  %6075 = vpow2.f32 %v4277_v35  ;;  %v3792_v57 = vadd.f32 %v7473_v59, %v7651_v0  ;;  %v7672_v35 = vadd.f32 %v7616_v62, %v7599_v11  ;;  %v7677_v48 = vadd.f32 %v7620_v8, %v7651_v0 }
 0x865   : > { %v6058_v6 = vpop.eup %6057  ;;  %4605 = vst [vmem:[%s7342_s29 + $0x280] sm:$0xff] %v6056_v18  ;;  %6077 = vpow2.f32 %v4275_v12  ;;  %v3985_v24 = vsub.f32 0.0, %v3911_v31  ;;  %v7682_v8 = vadd.f32 %v3849_v26, %v7599_v11  ;;  %v7690_v31 = vadd.f32 %v3853_v34, %v7599_v11 }
 0x866   : > { %v6060_v40 = vpop.eup %6059  ;;  %4609 = vst [vmem:[%s7342_s29 + $0x2a0] sm:$0xff] %v6058_v6  ;;  %6079 = vpow2.f32 %v4279_v46  ;;  %v3859_v47 = vpop.f32.mrb[156].mxu1  ;;  %v3970_v46 = vsub.f32 0.0, %v3792_v57  ;;  %v7687_v6 = vadd.f32 %v3851_v60, %v7651_v0  ;;  %v3796_v34 = vadd.f32 %v7483_v61, %v7651_v0 }
 0x867   : > { %v6062_v63 = vpop.eup %6061  ;;  %4611 = vst [vmem:[%s7342_s29 + $0x2b0] sm:$0xff] %v6060_v40  ;;  %6081 = vpow2.f32 %v4287_v13  ;;  %v3861_v59 = vpop.f32.mrb[157].mxu1  ;;  %v3903_v13 = vadd.f32 %v7475_v25, %v7640_v43 }
 0x868   : > { %v6064_v20 = vpop.eup %6063  ;;  %4610 = vst [vmem:[%s7342_s29 + $0x2a8] sm:$0xff] %v6062_v63  ;;  %6083 = vpow2.f32 %v4291_v15  ;;  %v3863_v7 = vpop.f32.mrb[158].mxu1  ;;  %v3794_v15 = vadd.f32 %v7478_v19, %v7599_v11  ;;  %v3914_v63 = vadd.f32 %v7480_v56, %v7640_v43  ;;  %v4087_v57 = vmul.f32 1.442695, %v3970_v46 }
 0x869   : > { %v6066_v29 = vpop.eup %6065  ;;  %4612 = vst [vmem:[%s7342_s29 + $0x2b8] sm:$0xff] %v6064_v20  ;;  %6085 = vpow2.f32 %v4289_v23  ;;  %v3865_v3 = vpop.f32.mrb[159].mxu1  ;;  %v3971_v20 = vsub.f32 0.0, %v3903_v13  ;;  %v3906_v56 = vadd.f32 %v7485_v14, %v7640_v43 }
 0x86a   : > { %v6068_v51 = vpop.eup %6067  ;;  %v4392_v12 = vadd.f32 1.0, %v6066_v29  ;;  %6087 = vpow2.f32 %v4293_v37  ;;  %v4117_v37 = vmul.f32 1.442695, %v3985_v24 }
 0x86b   : > { %v6070_v41 = vpop.eup %6069  ;;  %v4394_v30 = vadd.f32 1.0, %v6068_v51  ;;  %6089 = vpow2.f32 %v4085_v52  ;;  %v7695_v52 = vadd.f32 %v3855_v21, %v7651_v0  ;;  %v7702_v21 = vadd.f32 %v3859_v47, %v7599_v11 }
 0x86c   : > { %v6072_v62 = vpop.eup %6071  ;;  %6091 = vrcp.f32 %v4392_v12  ;;  %v4393_v9 = vadd.f32 1.0, %v6070_v41  ;;  %v3976_v12 = vsub.f32 0.0, %v3794_v15  ;;  %v3927_v15 = vadd.f32 %v7494_v28, %v7640_v43 }
 0x86d   : > { %v6074_v53 = vpop.eup %6073  ;;  %6093 = vrcp.f32 %v4394_v30  ;;  %v4395_v18 = vadd.f32 1.0, %v6072_v62  ;;  %v3992_v62 = vsub.f32 0.0, %v3914_v63  ;;  %v3978_v63 = vsub.f32 0.0, %v3906_v56 }
 0x86e   : > { %v6076_v23 = vpop.eup %6075  ;;  %6095 = vrcp.f32 %v4393_v9  ;;  %v4399_v40 = vadd.f32 1.0, %v6074_v53  ;;  %v7705_v9 = vadd.f32 %v3861_v59, %v7651_v0  ;;  %v3800_v53 = vadd.f32 %v7492_v36, %v7599_v11 }
 0x86f   : > { %v6078_v25 = vpop.eup %6077  ;;  %6097 = vrcp.f32 %v4395_v18  ;;  %v4401_v26 = vadd.f32 1.0, %v6076_v23  ;;  %v7710_v18 = vadd.f32 %v3863_v7, %v7599_v11  ;;  %v7715_v59 = vadd.f32 %v3865_v3, %v7651_v0 }
 0x870   : > { %v6080_v19 = vpop.eup %6079  ;;  %6099 = vrcp.f32 %v4399_v40  ;;  %v4400_v60 = vadd.f32 1.0, %v6078_v25  ;;  %v3977_v25 = vsub.f32 0.0, %v3796_v34  ;;  %v3802_v36 = vadd.f32 %v7498_v38, %v7651_v0 }
 0x871   : > { %v6082_v29 = vpop.eup %6081  ;;  %6101 = vrcp.f32 %v4401_v26  ;;  %v4402_v51 = vadd.f32 1.0, %v6080_v19  ;;  %v4089_v26 = vmul.f32 1.442695, %v3971_v20  ;;  %v3919_v28 = vadd.f32 %v7500_v1, %v7640_v43 }
 0x872   : > { %v6084_v24 = vpop.eup %6083  ;;  %6103 = vrcp.f32 %v4400_v60  ;;  %v4406_v41 = vadd.f32 1.0, %v6082_v29  ;;  %v4099_v3 = vmul.f32 1.442695, %v3976_v12  ;;  %v3983_v60 = vsub.f32 0.0, %v3800_v53 }
 0x873   : > { %v6086_v30 = vpop.eup %6085  ;;  %6105 = vrcp.f32 %v4402_v51  ;;  %v4408_v46 = vadd.f32 1.0, %v6084_v24  ;;  %v3804_v29 = vadd.f32 %v7504_v42, %v7599_v11  ;;  %v4131_v38 = vmul.f32 1.442695, %v3992_v62 }
 0x874   : > { %v6088_v13 = vpop.eup %6087  ;;  %6107 = vrcp.f32 %v4406_v41  ;;  %v4407_v61 = vadd.f32 1.0, %v6086_v30  ;;  %v4013_v20 = vsub.f32 0.0, %v3927_v15  ;;  %v3930_v34 = vadd.f32 %v7506_v50, %v7640_v43 }
 0x875   : > { %v6090_v14 = vpop.eup %6089  ;;  %6109 = vrcp.f32 %v4408_v46  ;;  %v4409_v47 = vadd.f32 1.0, %v6088_v13  ;;  %v4101_v1 = vmul.f32 1.442695, %v3977_v25  ;;  %v3984_v41 = vsub.f32 0.0, %v3802_v36 }
 0x876   : > { %v6092_v23 = vpop.eup %6091  ;;  %6111 = vrcp.f32 %v4407_v61  ;;  %v4305_v40 = vadd.f32 1.0, %v6090_v14  ;;  %v4103_v42 = vmul.f32 1.442695, %v3978_v63  ;;  %v3999_v56 = vsub.f32 0.0, %v3919_v28 }
 0x877   : > { %v6094_v7 = vpop.eup %6093  ;;  %4616 = vst [vmem:[%s7342_s29 + $0x2d8] sm:$0xff] %v6092_v23  ;;  %6113 = vrcp.f32 %v4409_v47  ;;  %v3990_v46 = vsub.f32 0.0, %v3804_v29  ;;  %v4020_v62 = vsub.f32 0.0, %v3930_v34  ;;  %v4115_v61 = vmul.f32 1.442695, %v3984_v41 }
 0x878   : > { %v6096_v19 = vpop.eup %6095  ;;  %4618 = vst [vmem:[%s7342_s29 + $0x2e8] sm:$0xff] %v6094_v7  ;;  %6115 = vrcp.f32 %v4305_v40  ;;  %v4145_v14 = vmul.f32 1.442695, %v3999_v56  ;;  %v3806_v7 = vadd.f32 %v7508_v2, %v7651_v0  ;;  %v3810_v2 = vadd.f32 %v7522_v17, %v7599_v11 }
 0x879   : > { %v6098_v51 = vpop.eup %6097  ;;  %4617 = vst [vmem:[%s7342_s29 + $0x2e0] sm:$0xff] %v6096_v19  ;;  %6117 = vpow2.f32 %v4117_v37  ;;  %v4113_v37 = vmul.f32 1.442695, %v3983_v60  ;;  %v4127_v15 = vmul.f32 1.442695, %v3990_v46  ;;  %v3943_v56 = vadd.f32 %v7524_v45, %v7640_v43 }
 0x87a   : > { %v6100_v24 = vpop.eup %6099  ;;  %4619 = vst [vmem:[%s7342_s29 + $0x2f0] sm:$0xff] %v6098_v51  ;;  %6119 = vpow2.f32 %v4087_v57  ;;  %v4173_v57 = vmul.f32 1.442695, %v4013_v20  ;;  %v4187_v40 = vmul.f32 1.442695, %v4020_v62  ;;  %v3991_v20 = vsub.f32 0.0, %v3806_v7 }
 0x87b   : > { %v6102_v12 = vpop.eup %6101  ;;  %4623 = vst [vmem:[%s7342_s29 + $0x310] sm:$0xff] %v6100_v24  ;;  %6121 = vpow2.f32 %v4089_v26  ;;  %v3997_v62 = vsub.f32 0.0, %v3810_v2  ;;  %v3814_v45 = vadd.f32 %v7535_v55, %v7599_v11  ;;  %v3822_v2 = vadd.f32 %v7558_v32, %v7651_v0 }
 0x87c   : > { %v6104_v30 = vpop.eup %6103  ;;  %4625 = vst [vmem:[%s7342_s29 + $0x320] sm:$0xff] %v6102_v12  ;;  %6123 = vpow2.f32 %v4099_v3  ;;  %v3922_v3 = vadd.f32 %v7510_v33, %v7640_v43  ;;  %v4129_v46 = vmul.f32 1.442695, %v3991_v20 }
 0x87d   : > { %v6106_v50 = vpop.eup %6105  ;;  %4624 = vst [vmem:[%s7342_s29 + $0x318] sm:$0xff] %v6104_v30  ;;  %6125 = vpow2.f32 %v4131_v38 }
 0x87e   : > { %v6108_v13 = vpop.eup %6107  ;;  %4626 = vst [vmem:[%s7342_s29 + $0x328] sm:$0xff] %v6106_v50  ;;  %6127 = vpow2.f32 %v4101_v1  ;;  %v4006_v12 = vsub.f32 0.0, %v3922_v3  ;;  %v3812_v50 = vadd.f32 %v7528_v4, %v7651_v0  ;;  %v3946_v4 = vadd.f32 %v7537_v10, %v7640_v43 }
 0x87f   : > { %v6110_v53 = vpop.eup %6109  ;;  %4630 = vst [vmem:[%s7342_s29 + $0x348] sm:$0xff] %v6108_v13  ;;  %6129 = vpow2.f32 %v4103_v42  ;;  %v3935_v13 = vadd.f32 %v7530_v44, %v7640_v43  ;;  %v4141_v10 = vmul.f32 1.442695, %v3997_v62  ;;  %v4004_v3 = vsub.f32 0.0, %v3814_v45 }
 0x880   : > { %v6112_v47 = vpop.eup %6111  ;;  %4632 = vst [vmem:[%s7342_s29 + $0x358] sm:$0xff] %v6110_v53  ;;  %6131 = vpow2.f32 %v4113_v37  ;;  %v3998_v44 = vsub.f32 0.0, %v3812_v50 }
 0x881   : > { %v6114_v23 = vpop.eup %6113  ;;  %4631 = vst [vmem:[%s7342_s29 + $0x350] sm:$0xff] %v6112_v47  ;;  %6133 = vpow2.f32 %v4173_v57  ;;  %v4027_v55 = vsub.f32 0.0, %v3935_v13 }
 0x882   : > { %v6116_v25 = vpop.eup %6115  ;;  %4633 = vst [vmem:[%s7342_s29 + $0x360] sm:$0xff] %v6114_v23  ;;  %6135 = vpow2.f32 %v4115_v61  ;;  %v4041_v23 = vsub.f32 0.0, %v3943_v56 }
 0x883   : > { %v6118_v36 = vpop.eup %6117  ;;  %4529 = vst [vmem:[%s7342_s29 + $0x20] sm:$0xff] %v6116_v25  ;;  %6137 = vpow2.f32 %v4145_v14  ;;  %v4159_v14 = vmul.f32 1.442695, %v4006_v12 }
 0x884   : > { %v6120_v26 = vpop.eup %6119  ;;  %v4321_v63 = vadd.f32 1.0, %v6118_v36  ;;  %6139 = vpow2.f32 %v4127_v15  ;;  %v3816_v36 = vadd.f32 %v7542_v27, %v7651_v0  ;;  %v4229_v27 = vmul.f32 1.442695, %v4041_v23 }
 0x885   : > { %v6122_v28 = vpop.eup %6121  ;;  %v4306_v19 = vadd.f32 1.0, %v6120_v26  ;;  %6141 = vpow2.f32 %v4187_v40 }
 0x886   : > { %v6124_v60 = vpop.eup %6123  ;;  %6143 = vrcp.f32 %v4321_v63  ;;  %v4307_v29 = vadd.f32 1.0, %v6122_v28  ;;  %v7880_v63 = vld [vmem:[#allocation2_spill] sm:$0xff] }
 0x887   : > { %v6126_v51 = vpop.eup %6125  ;;  %6145 = vrcp.f32 %v4306_v19  ;;  %v4312_v38 = vadd.f32 1.0, %v6124_v60  ;;  %v3938_v28 = vadd.f32 %v7880_v63, %v7640_v43  ;;  %v3820_v60 = vadd.f32 %v7553_v54, %v7599_v11 }
 0x888   : > { %v6128_v34 = vpop.eup %6127  ;;  %6147 = vrcp.f32 %v4307_v29  ;;  %v4328_v24 = vadd.f32 1.0, %v6126_v51  ;;  %v4048_v51 = vsub.f32 0.0, %v3946_v4  ;;  %v4201_v54 = vmul.f32 1.442695, %v4027_v55 }
 0x889   : > { %v6130_v1 = vpop.eup %6129  ;;  %6149 = vrcp.f32 %v4312_v38  ;;  %v4313_v41 = vadd.f32 1.0, %v6128_v34  ;;  %v3959_v38 = vadd.f32 %v7555_v22, %v7640_v43  ;;  %v4143_v34 = vmul.f32 1.442695, %v3998_v44  ;;  %v7881_v44 = vld [vmem:[#allocation3_spill] sm:$0xff] }
 0x88a   : > { %v6132_v42 = vpop.eup %6131  ;;  %6151 = vrcp.f32 %v4328_v24  ;;  %v4314_v33 = vadd.f32 1.0, %v6130_v1  ;;  %v4005_v24 = vsub.f32 0.0, %v3816_v36  ;;  %v4034_v11 = vsub.f32 0.0, %v3938_v28 }
 0x88b   : > { %v6134_v30 = vpop.eup %6133  ;;  %6153 = vrcp.f32 %v4313_v41  ;;  %v4319_v37 = vadd.f32 1.0, %v6132_v42  ;;  %v4155_v22 = vmul.f32 1.442695, %v4004_v3  ;;  %v4011_v12 = vsub.f32 0.0, %v3820_v60 }
 0x88c   : > { %v6136_v57 = vpop.eup %6135  ;;  %6155 = vrcp.f32 %v4314_v33  ;;  %v4349_v17 = vadd.f32 1.0, %v6134_v30  ;;  %v4243_v33 = vmul.f32 1.442695, %v4048_v51  ;;  %v4069_v56 = vsub.f32 0.0, %v3959_v38  ;;  %v7883_v51 = vld [vmem:[#allocation5_spill] sm:$0xff] }
 0x88d   : > { %v6138_v61 = vpop.eup %6137  ;;  %6157 = vrcp.f32 %v4319_v37  ;;  %v4320_v53 = vadd.f32 1.0, %v6136_v57  ;;  %v4157_v30 = vmul.f32 1.442695, %v4005_v24  ;;  %v4012_v37 = vsub.f32 0.0, %v3822_v2  ;;  %v7884_v24 = vld [vmem:[#allocation6_spill] sm:$0xff] }
 0x88e   : > { %v6140_v47 = vpop.eup %6139  ;;  %6159 = vrcp.f32 %v4349_v17  ;;  %v4335_v15 = vadd.f32 1.0, %v6138_v61  ;;  %v4215_v50 = vmul.f32 1.442695, %v4034_v11  ;;  %v4169_v17 = vmul.f32 1.442695, %v4011_v12 }
 0x88f   : > { %v6142_v40 = vpop.eup %6141  ;;  %6161 = vrcp.f32 %v4320_v53  ;;  %v4326_v25 = vadd.f32 1.0, %v6140_v47  ;;  %v4285_v13 = vmul.f32 1.442695, %v4069_v56  ;;  %v4171_v53 = vmul.f32 1.442695, %v4012_v37 }
 0x890   : > { %v6144_v7 = vpop.eup %6143  ;;  %6163 = vrcp.f32 %v4335_v15  ;;  %v4356_v26 = vadd.f32 1.0, %v6142_v40  ;;  %v3951_v36 = vadd.f32 %v7881_v44, %v7640_v43  ;;  %v3826_v38 = vadd.f32 %v7883_v51, %v7651_v0 }
 0x891   : > { %v6146_v19 = vpop.eup %6145  ;;  %4545 = vst [vmem:[%s7342_s29 + $0xa0] sm:$0xff] %v6144_v7  ;;  %6165 = vrcp.f32 %v4326_v25  ;;  %v3954_v2 = vadd.f32 %v7884_v24, %v7640_v43  ;;  %v4018_v11 = vsub.f32 0.0, %v7630_v16  ;;  %v7886_v16 = vld [vmem:[#allocation8_spill] sm:$0xff] }
 0x892   : > { %v6148_v29 = vpop.eup %6147  ;;  %4530 = vst [vmem:[%s7342_s29 + $0x28] sm:$0xff] %v6146_v19  ;;  %6167 = vrcp.f32 %v4356_v26  ;;  %v4019_v37 = vsub.f32 0.0, %v3826_v38 }
 0x893   : > { %v6150_v20 = vpop.eup %6149  ;;  %4531 = vst [vmem:[%s7342_s29 + $0x30] sm:$0xff] %v6148_v29  ;;  %6169 = vpow2.f32 %v4129_v46 }
 0x894   : > { %v6152_v1 = vpop.eup %6151  ;;  %4536 = vst [vmem:[%s7342_s29 + $0x58] sm:$0xff] %v6150_v20  ;;  %6171 = vpow2.f32 %v4159_v14 }
 0x895   : > { %v6154_v41 = vpop.eup %6153  ;;  %4552 = vst [vmem:[%s7342_s29 + $0xd8] sm:$0xff] %v6152_v1  ;;  %6173 = vpow2.f32 %v4141_v10  ;;  %v7882_v10 = vld [vmem:[#allocation4_spill] sm:$0xff] }
 0x896   : > { %v6156_v42 = vpop.eup %6155  ;;  %4537 = vst [vmem:[%s7342_s29 + $0x60] sm:$0xff] %v6154_v41  ;;  %6175 = vpow2.f32 %v4229_v27  ;;  %v3962_v3 = vadd.f32 %v7882_v10, %v7640_v43  ;;  %v4055_v27 = vsub.f32 0.0, %v3951_v36 }
 0x897   : > { %v6158_v32 = vpop.eup %6157  ;;  %4538 = vst [vmem:[%s7342_s29 + $0x68] sm:$0xff] %v6156_v42  ;;  %6177 = vpow2.f32 %v4143_v34  ;;  %v7885_v42 = vld [vmem:[#allocation7_spill] sm:$0xff] }
 0x898   : > { %v6160_v46 = vpop.eup %6159  ;;  %4543 = vst [vmem:[%s7342_s29 + $0x90] sm:$0xff] %v6158_v32  ;;  %6179 = vpow2.f32 %v4201_v54  ;;  %v4076_v12 = vsub.f32 0.0, %v3962_v3 }
 0x899   : > { %v6162_v57 = vpop.eup %6161  ;;  %4573 = vst [vmem:[%s7342_s29 + $0x180] sm:$0xff] %v6160_v46  ;;  %6181 = vpow2.f32 %v4155_v22 }
 0x89a   : > { %v6164_v62 = vpop.eup %6163  ;;  %4544 = vst [vmem:[%s7342_s29 + $0x98] sm:$0xff] %v6162_v57  ;;  %6183 = vpow2.f32 %v4243_v33  ;;  %v3832_v33 = vadd.f32 %v7885_v42, %v7651_v0  ;;  %v3836_v57 = vadd.f32 %v7886_v16, %v7651_v0 }
 0x89b   : > { %v6166_v61 = vpop.eup %6165  ;;  %4559 = vst [vmem:[%s7342_s29 + $0x110] sm:$0xff] %v6164_v62  ;;  %6185 = vpow2.f32 %v4157_v30  ;;  %v4257_v30 = vmul.f32 1.442695, %v4055_v27 }
 0x89c   : > { %v6168_v14 = vpop.eup %6167  ;;  %4550 = vst [vmem:[%s7342_s29 + $0xc8] sm:$0xff] %v6166_v61  ;;  %6187 = vpow2.f32 %v4215_v50  ;;  %v4062_v50 = vsub.f32 0.0, %v3954_v2  ;;  %v4025_v61 = vsub.f32 0.0, %v7645_v39 }
 0x89d   : > { %v6170_v45 = vpop.eup %6169  ;;  %4580 = vst [vmem:[%s7342_s29 + $0x1b8] sm:$0xff] %v6168_v14  ;;  %6189 = vpow2.f32 %v4169_v17  ;;  %v4299_v14 = vmul.f32 1.442695, %v4076_v12 }
 0x89e   : > { %v6172_v47 = vpop.eup %6171  ;;  %v4327_v15 = vadd.f32 1.0, %v6170_v45  ;;  %6191 = vpow2.f32 %v4285_v13  ;;  %v4183_v13 = vmul.f32 1.442695, %v4018_v11  ;;  %v4026_v45 = vsub.f32 0.0, %v3832_v33 }
 0x89f   : > { %v6174_v23 = vpop.eup %6173  ;;  %v4342_v4 = vadd.f32 1.0, %v6172_v47  ;;  %6193 = vpow2.f32 %v4171_v53  ;;  %v3842_v47 = vadd.f32 %v7612_v5, %v7651_v0  ;;  %v4271_v39 = vmul.f32 1.442695, %v4062_v50 }
 0x8a0   : > { %v6176_v40 = vpop.eup %6175  ;;  %6195 = vrcp.f32 %v4327_v15  ;;  %v4333_v25 = vadd.f32 1.0, %v6174_v23  ;;  %v4185_v23 = vmul.f32 1.442695, %v4019_v37  ;;  %v4197_v36 = vmul.f32 1.442695, %v4025_v61 }
 0x8a1   : > { %v6178_v7 = vpop.eup %6177  ;;  %6197 = vrcp.f32 %v4342_v4  ;;  %v4377_v26 = vadd.f32 1.0, %v6176_v40  ;;  %v4032_v4 = vsub.f32 0.0, %v7656_v49  ;;  %v4039_v5 = vsub.f32 0.0, %v7664_v58 }
 0x8a2   : > { %v6180_v55 = vpop.eup %6179  ;;  %6199 = vrcp.f32 %v4333_v25  ;;  %v4334_v63 = vadd.f32 1.0, %v6178_v7  ;;  %v4033_v25 = vsub.f32 0.0, %v3836_v57  ;;  %v4199_v7 = vmul.f32 1.442695, %v4026_v45 }
 0x8a3   : > { %v6182_v28 = vpop.eup %6181  ;;  %6201 = vrcp.f32 %v4377_v26  ;;  %v4363_v19 = vadd.f32 1.0, %v6180_v55  ;;  %v4040_v26 = vsub.f32 0.0, %v3842_v47  ;;  %v4211_v55 = vmul.f32 1.442695, %v4032_v4 }
 0x8a4   : > { %v6184_v60 = vpop.eup %6183  ;;  %6203 = vrcp.f32 %v4334_v63  ;;  %v4340_v29 = vadd.f32 1.0, %v6182_v28  ;;  %v4046_v63 = vsub.f32 0.0, %v7672_v35  ;;  %v4047_v58 = vsub.f32 0.0, %v7677_v48 }
 0x8a5   : > { %v6186_v20 = vpop.eup %6185  ;;  %6205 = vrcp.f32 %v4363_v19  ;;  %v4384_v34 = vadd.f32 1.0, %v6184_v60  ;;  %v4213_v19 = vmul.f32 1.442695, %v4033_v25  ;;  %v4225_v3 = vmul.f32 1.442695, %v4039_v5 }
 0x8a6   : > { %v6188_v1 = vpop.eup %6187  ;;  %6207 = vrcp.f32 %v4340_v29  ;;  %v4341_v54 = vadd.f32 1.0, %v6186_v20  ;;  %v4227_v29 = vmul.f32 1.442695, %v4040_v26  ;;  %v4239_v35 = vmul.f32 1.442695, %v4046_v63 }
 0x8a7   : > { %v6190_v41 = vpop.eup %6189  ;;  %6209 = vrcp.f32 %v4384_v34  ;;  %v4370_v22 = vadd.f32 1.0, %v6188_v1  ;;  %v4241_v38 = vmul.f32 1.442695, %v4047_v58  ;;  %v4054_v57 = vsub.f32 0.0, %v7687_v6 }
 0x8a8   : > { %v6192_v56 = vpop.eup %6191  ;;  %6211 = vrcp.f32 %v4341_v54  ;;  %v4347_v32 = vadd.f32 1.0, %v6190_v41 }
 0x8a9   : > { %v6194_v46 = vpop.eup %6193  ;;  %6213 = vrcp.f32 %v4370_v22  ;;  %v4405_v43 = vadd.f32 1.0, %v6192_v56  ;;  %v4255_v4 = vmul.f32 1.442695, %v4054_v57 }
 0x8aa   : > { %v6196_v17 = vpop.eup %6195  ;;  %6215 = vrcp.f32 %v4347_v32  ;;  %v4348_v62 = vadd.f32 1.0, %v6194_v46 }
 0x8ab   : > { %v6198_v53 = vpop.eup %6197  ;;  %4551 = vst [vmem:[%s7342_s29 + $0xd0] sm:$0xff] %v6196_v17  ;;  %6217 = vrcp.f32 %v4405_v43  ;;  %v4053_v43 = vsub.f32 0.0, %v7682_v8 }
 0x8ac   : > { %v6200_v15 = vpop.eup %6199  ;;  %4566 = vst [vmem:[%s7342_s29 + $0x148] sm:$0xff] %v6198_v53  ;;  %6219 = vrcp.f32 %v4348_v62 }
 0x8ad   : > { %v6202_v40 = vpop.eup %6201  ;;  %4557 = vst [vmem:[%s7342_s29 + $0x100] sm:$0xff] %v6200_v15  ;;  %6221 = vpow2.f32 %v4257_v30  ;;  %v4253_v47 = vmul.f32 1.442695, %v4053_v43  ;;  %v4067_v15 = vsub.f32 0.0, %v7702_v21 }
 0x8ae   : > { %v6204_v44 = vpop.eup %6203  ;;  %4601 = vst [vmem:[%s7342_s29 + $0x260] sm:$0xff] %v6202_v40  ;;  %6223 = vpow2.f32 %v4183_v13  ;;  %v4060_v13 = vsub.f32 0.0, %v7690_v31  ;;  %v4068_v31 = vsub.f32 0.0, %v7705_v9 }
 0x8af   : > { %v6206_v0 = vpop.eup %6205  ;;  %4558 = vst [vmem:[%s7342_s29 + $0x108] sm:$0xff] %v6204_v44  ;;  %6225 = vpow2.f32 %v4299_v14  ;;  %v4061_v14 = vsub.f32 0.0, %v7695_v52  ;;  %v4074_v52 = vsub.f32 0.0, %v7710_v18  ;;  %v4075_v44 = vsub.f32 0.0, %v7715_v59 }
 0x8b0   : > { %v6208_v49 = vpop.eup %6207  ;;  %4587 = vst [vmem:[%s7342_s29 + $0x1f0] sm:$0xff] %v6206_v0  ;;  %6227 = vpow2.f32 %v4185_v23  ;;  %v4281_v9 = vmul.f32 1.442695, %v4067_v15  ;;  %v4283_v0 = vmul.f32 1.442695, %v4068_v31 }
 0x8b1   : > { %v6210_v28 = vpop.eup %6209  ;;  %4564 = vst [vmem:[%s7342_s29 + $0x138] sm:$0xff] %v6208_v49  ;;  %6229 = vpow2.f32 %v4271_v39  ;;  %v4267_v39 = vmul.f32 1.442695, %v4060_v13  ;;  %v4269_v21 = vmul.f32 1.442695, %v4061_v14 }
 0x8b2   : > { %v6212_v10 = vpop.eup %6211  ;;  %4608 = vst [vmem:[%s7342_s29 + $0x298] sm:$0xff] %v6210_v28  ;;  %6231 = vpow2.f32 %v4197_v36  ;;  %v4295_v18 = vmul.f32 1.442695, %v4074_v52  ;;  %v4297_v59 = vmul.f32 1.442695, %v4075_v44 }
 0x8b3   : > { %v6214_v60 = vpop.eup %6213  ;;  %4565 = vst [vmem:[%s7342_s29 + $0x140] sm:$0xff] %v6212_v10  ;;  %6233 = vpow2.f32 %v4199_v7 }
 0x8b4   : > { %v6216_v27 = vpop.eup %6215  ;;  %4594 = vst [vmem:[%s7342_s29 + $0x228] sm:$0xff] %v6214_v60  ;;  %6235 = vpow2.f32 %v4211_v55 }
 0x8b5   : > { %v6218_v51 = vpop.eup %6217  ;;  %4571 = vst [vmem:[%s7342_s29 + $0x170] sm:$0xff] %v6216_v27  ;;  %6237 = vpow2.f32 %v4213_v19 }
 0x8b6   : > { %v6220_v20 = vpop.eup %6219  ;;  %4629 = vst [vmem:[%s7342_s29 + $0x340] sm:$0xff] %v6218_v51  ;;  %6239 = vpow2.f32 %v4225_v3 }
 0x8b7   : > { %v6222_v48 = vpop.eup %6221  ;;  %4572 = vst [vmem:[%s7342_s29 + $0x178] sm:$0xff] %v6220_v20  ;;  %6241 = vpow2.f32 %v4227_v29 }
 0x8b8   : > { %v6224_v34 = vpop.eup %6223  ;;  %v4391_v24 = vadd.f32 1.0, %v6222_v48  ;;  %6243 = vpow2.f32 %v4239_v35 }
 0x8b9   : > { %v6226_v2 = vpop.eup %6225  ;;  %v4354_v1 = vadd.f32 1.0, %v6224_v34  ;;  %6245 = vpow2.f32 %v4241_v38 }
 0x8ba   : > { %v6228_v54 = vpop.eup %6227  ;;  %6247 = vrcp.f32 %v4391_v24  ;;  %v4412_v11 = vadd.f32 1.0, %v6226_v2 }
 0x8bb   : > { %v6230_v41 = vpop.eup %6229  ;;  %6249 = vrcp.f32 %v4354_v1  ;;  %v4355_v22 = vadd.f32 1.0, %v6228_v54 }
 0x8bc   : > { %v6232_v12 = vpop.eup %6231  ;;  %6251 = vrcp.f32 %v4412_v11  ;;  %v4398_v42 = vadd.f32 1.0, %v6230_v41 }
 0x8bd   : > { %v6234_v33 = vpop.eup %6233  ;;  %6253 = vrcp.f32 %v4355_v22  ;;  %v4361_v56 = vadd.f32 1.0, %v6232_v12 }
 0x8be   : > { %v6236_v32 = vpop.eup %6235  ;;  %6255 = vrcp.f32 %v4398_v42  ;;  %v4362_v30 = vadd.f32 1.0, %v6234_v33 }
 0x8bf   : > { %v6238_v37 = vpop.eup %6237  ;;  %6257 = vrcp.f32 %v4361_v56  ;;  %v4368_v46 = vadd.f32 1.0, %v6236_v32 }
 0x8c0   : > { %v6240_v50 = vpop.eup %6239  ;;  %6259 = vrcp.f32 %v4362_v30  ;;  %v4369_v16 = vadd.f32 1.0, %v6238_v37 }
 0x8c1   : > { %v6242_v17 = vpop.eup %6241  ;;  %6261 = vrcp.f32 %v4368_v46  ;;  %v4375_v62 = vadd.f32 1.0, %v6240_v50 }
 0x8c2   : > { %v6244_v61 = vpop.eup %6243  ;;  %6263 = vrcp.f32 %v4369_v16  ;;  %v4376_v53 = vadd.f32 1.0, %v6242_v17 }
 0x8c3   : > { %v6246_v45 = vpop.eup %6245  ;;  %6265 = vrcp.f32 %v4375_v62  ;;  %v4382_v8 = vadd.f32 1.0, %v6244_v61 }
 0x8c4   : > { %v6248_v23 = vpop.eup %6247  ;;  %6267 = vrcp.f32 %v4376_v53  ;;  %v4383_v6 = vadd.f32 1.0, %v6246_v45 }
 0x8c5   : > { %v6250_v40 = vpop.eup %6249  ;;  %4615 = vst [vmem:[%s7342_s29 + $0x2d0] sm:$0xff] %v6248_v23  ;;  %6269 = vrcp.f32 %v4382_v8 }
 0x8c6   : > { %v6252_v25 = vpop.eup %6251  ;;  %4578 = vst [vmem:[%s7342_s29 + $0x1a8] sm:$0xff] %v6250_v40  ;;  %6271 = vrcp.f32 %v4383_v6 }
 0x8c7   : > { %v6254_v36 = vpop.eup %6253  ;;  %4636 = vst [vmem:[%s7342_s29 + $0x378] sm:$0xff] %v6252_v25  ;;  %6273 = vpow2.f32 %v4253_v47 }
 0x8c8   : > { %v6256_v5 = vpop.eup %6255  ;;  %4579 = vst [vmem:[%s7342_s29 + $0x1b0] sm:$0xff] %v6254_v36  ;;  %6275 = vpow2.f32 %v4255_v4 }
 0x8c9   : > { %v6258_v7 = vpop.eup %6257  ;;  %4622 = vst [vmem:[%s7342_s29 + $0x308] sm:$0xff] %v6256_v5  ;;  %6277 = vpow2.f32 %v4267_v39 }
 0x8ca   : > { %v6260_v26 = vpop.eup %6259  ;;  %4585 = vst [vmem:[%s7342_s29 + $0x1e0] sm:$0xff] %v6258_v7  ;;  %6279 = vpow2.f32 %v4269_v21 }
 0x8cb   : > { %v6262_v49 = vpop.eup %6261  ;;  %4586 = vst [vmem:[%s7342_s29 + $0x1e8] sm:$0xff] %v6260_v26  ;;  %6281 = vpow2.f32 %v4281_v9 }
 0x8cc   : > { %v6264_v55 = vpop.eup %6263  ;;  %4592 = vst [vmem:[%s7342_s29 + $0x218] sm:$0xff] %v6262_v49  ;;  %6283 = vpow2.f32 %v4283_v0 }
 0x8cd   : > { %v6266_v63 = vpop.eup %6265  ;;  %4593 = vst [vmem:[%s7342_s29 + $0x220] sm:$0xff] %v6264_v55  ;;  %6285 = vpow2.f32 %v4295_v18 }
 0x8ce   : > { %v6268_v28 = vpop.eup %6267  ;;  %4599 = vst [vmem:[%s7342_s29 + $0x250] sm:$0xff] %v6266_v63  ;;  %6287 = vpow2.f32 %v4297_v59 }
 0x8cf   : > { %v6270_v19 = vpop.eup %6269  ;;  %4600 = vst [vmem:[%s7342_s29 + $0x258] sm:$0xff] %v6268_v28 }
 0x8d0   : > { %v6272_v58 = vpop.eup %6271  ;;  %4606 = vst [vmem:[%s7342_s29 + $0x288] sm:$0xff] %v6270_v19 }
 0x8d1   : > { %v6274_v10 = vpop.eup %6273  ;;  %4607 = vst [vmem:[%s7342_s29 + $0x290] sm:$0xff] %v6272_v58 }
 0x8d2   : > { %v6276_v3 = vpop.eup %6275  ;;  %v4389_v60 = vadd.f32 1.0, %v6274_v10 }
 0x8d3   : > { %v6278_v29 = vpop.eup %6277  ;;  %v4390_v27 = vadd.f32 1.0, %v6276_v3 }
 0x8d4   : > { %v6280_v35 = vpop.eup %6279  ;;  %6289 = vrcp.f32 %v4389_v60  ;;  %v4396_v51 = vadd.f32 1.0, %v6278_v29 }
 0x8d5   : > { %v6282_v38 = vpop.eup %6281  ;;  %6291 = vrcp.f32 %v4390_v27  ;;  %v4397_v20 = vadd.f32 1.0, %v6280_v35 }
 0x8d6   : > { %v6284_v48 = vpop.eup %6283  ;;  %6293 = vrcp.f32 %v4396_v51  ;;  %v4403_v34 = vadd.f32 1.0, %v6282_v38 }
 0x8d7   : > { %v6286_v24 = vpop.eup %6285  ;;  %6295 = vrcp.f32 %v4397_v20  ;;  %v4404_v2 = vadd.f32 1.0, %v6284_v48 }
 0x8d8   : > { %v6288_v1 = vpop.eup %6287  ;;  %6297 = vrcp.f32 %v4403_v34  ;;  %v4410_v54 = vadd.f32 1.0, %v6286_v24 }
 0x8d9   : > { %6299 = vrcp.f32 %v4404_v2  ;;  %v4411_v11 = vadd.f32 1.0, %v6288_v1 }
 0x8da   : > { %6301 = vrcp.f32 %v4410_v54 }
 0x8db   : > { %6303 = vrcp.f32 %v4411_v11 }
 0x8de   : > { %v6290_v41 = vpop.eup %6289 }
 0x8df   : > { %v6292_v22 = vpop.eup %6291  ;;  %4613 = vst [vmem:[%s7342_s29 + $0x2c0] sm:$0xff] %v6290_v41 }
 0x8e0   : > { %v6294_v12 = vpop.eup %6293  ;;  %4614 = vst [vmem:[%s7342_s29 + $0x2c8] sm:$0xff] %v6292_v22 }
 0x8e1   : > { %v6296_v42 = vpop.eup %6295  ;;  %4620 = vst [vmem:[%s7342_s29 + $0x2f8] sm:$0xff] %v6294_v12 }
 0x8e2   : > { %v6298_v33 = vpop.eup %6297  ;;  %4621 = vst [vmem:[%s7342_s29 + $0x300] sm:$0xff] %v6296_v42 }
 0x8e3   : > { %v6300_v56 = vpop.eup %6299  ;;  %4627 = vst [vmem:[%s7342_s29 + $0x330] sm:$0xff] %v6298_v33 }
 0x8e4   : > { %v6302_v32 = vpop.eup %6301  ;;  %4628 = vst [vmem:[%s7342_s29 + $0x338] sm:$0xff] %v6300_v56 }
 0x8e5   : > { %v6304_v30 = vpop.eup %6303  ;;  %4634 = vst [vmem:[%s7342_s29 + $0x368] sm:$0xff] %v6302_v32 }
 0x8e6   : > { %4635 = vst [vmem:[%s7342_s29 + $0x370] sm:$0xff] %v6304_v30 }
 0x8e7 PF: > { %s30_s0 = sadd.s32 1, %s6312_s0  }
 0x8e8   : > { %p27_p4 = scmp.ge.s32.totalorder %s30_s0, 4  }
 0x8ea   :  { %29 = sbr.rel (!%p27_p4) target bundleno = 5 (0x5), region = 137 }

</bundles_post_ra>
